<compile_context>
chip_gen: v7x
topology: tpu7x:2x2x1
jax: 0.10.0
libtpu: 0.0.40
codegen_flags: <defaults>
</compile_context>

<pallas_src>
import jax
import jax.numpy as jnp
from jax import lax
from jax.experimental import pallas as pl
from jax.experimental.pallas import tpu as pltpu

LATENT_DIM = 100
LATENT_PAD = 128           # 100 zero-padded to a full lane tile (exact)
IMG_PIXELS = 28 * 28       # 784
OUT_PAD = 896              # 7 * 128, lane-dense output (extra cols are tanh(0)=0)
BN_EPS = 0.8               # nn.BatchNorm1d(dim, 0.8) -> second positional arg is eps
LRELU_SLOPE = 0.2

# Packed side-parameter slab layout (f32, shape (1, PACK_WIDTH)); every offset
# is a multiple of 128 so in-kernel slices are lane-aligned zero-cost views.
OFF_B1 = 0          # 128
OFF_G2 = 128        # 256
OFF_BE2 = 384       # 256
OFF_G3 = 640        # 512
OFF_BE3 = 1152      # 512
OFF_G4 = 1664       # 1024
OFF_BE4 = 2688      # 1024
OFF_B5 = 3712       # 896
OFF_S4 = 4608       # 1024  (int8 dequant scale for w4)
OFF_S5 = 5632       # 896   (int8 dequant scale for w5)
PACK_WIDTH = 6528   # = 51 * 128


def _leaky_relu(x):
    return jnp.where(x > 0, x, LRELU_SLOPE * x)


def _make_generator_kernel(b_real, b_pad):
    """Build the fused kernel; b_real/b_pad are static (trace-time) ints."""
    needs_mask = b_pad != b_real
    inv_n = 1.0 / float(b_real)

    def kernel(z_ref, w1_ref, w2_ref, w3_ref, w4q_ref, w5q_ref, p_ref, out_ref):

        def seg(off, width):
            # Static lane-aligned slice of the packed side-parameter slab.
            return p_ref[:, off:off + width]                    # (1, width) f32

        def mm(x, w_ref):
            # bf16 x bf16 MXU matmul, f32 accumulation.
            return jnp.dot(x.astype(jnp.bfloat16), w_ref[...],
                           preferred_element_type=jnp.float32)

        def mm_q(x, wq_ref, scale):
            # int8 weights: values in [-127, 127] are exact in bf16; the
            # per-output-column scale commutes through the matmul, so it is
            # applied once to the f32 result.
            w = wq_ref[...].astype(jnp.float32).astype(jnp.bfloat16)
            y = jnp.dot(x.astype(jnp.bfloat16), w,
                        preferred_element_type=jnp.float32)
            return y * scale

        if needs_mask:
            row = lax.broadcasted_iota(jnp.int32, (b_pad, 1), 0)
            row_mask = (row < b_real).astype(jnp.float32)
        else:
            row_mask = None

        def bn_lrelu(x, g, be):
            # PyTorch BatchNorm1d training mode: batch mean, biased batch var.
            if row_mask is None:
                mean = jnp.mean(x, axis=0, keepdims=True)
                d = x - mean
                var = jnp.mean(d * d, axis=0, keepdims=True)
            else:
                mean = jnp.sum(x * row_mask, axis=0, keepdims=True) * inv_n
                d = (x - mean) * row_mask
                var = jnp.sum(d * d, axis=0, keepdims=True) * inv_n
            s = g * lax.rsqrt(var + BN_EPS)                     # gamma folded
            return _leaky_relu((x - mean) * s + be)

        z = z_ref[...]                                          # (b_pad, 128) f32

        # block(100 -> 128, normalize=False): Linear + LeakyReLU(0.2)
        h = _leaky_relu(mm(z, w1_ref) + seg(OFF_B1, 128))

        # block(128 -> 256): Linear (bias folded away by BN) + BN + LeakyReLU
        h = bn_lrelu(mm(h, w2_ref), seg(OFF_G2, 256), seg(OFF_BE2, 256))
        # block(256 -> 512)
        h = bn_lrelu(mm(h, w3_ref), seg(OFF_G3, 512), seg(OFF_BE3, 512))
        # block(512 -> 1024), int8 weights
        h = bn_lrelu(mm_q(h, w4q_ref, seg(OFF_S4, 1024)),
                     seg(OFF_G4, 1024), seg(OFF_BE4, 1024))

        # Linear(1024 -> 784, padded to 896), int8 weights, + Tanh
        out_ref[...] = jnp.tanh(mm_q(h, w5q_ref, seg(OFF_S5, OUT_PAD))
                                + seg(OFF_B5, OUT_PAD))

    return kernel


def _quantize_int8_per_col(w):
    """Symmetric per-output-channel int8 quantization. Zero columns get q=0."""
    absmax = jnp.max(jnp.abs(w), axis=0, keepdims=True)          # (1, fout)
    scale = jnp.where(absmax > 0, absmax / 127.0, 1.0)
    q = jnp.clip(jnp.round(w / scale), -127.0, 127.0).astype(jnp.int8)
    return q, scale.astype(jnp.float32)


def init_generator_params(key):
    """Init mirroring PyTorch Linear default U[-1/sqrt(fan_in), 1/sqrt(fan_in)].

    Weights stored transposed (in_features, out_features): w1..w3 in bf16,
    w4/w5 in int8 with per-column f32 scales.  All tiny (1, N) vectors
    (b1, BN gamma/beta, b5, dequant scales) are packed into one f32 slab.
    b2/b3/b4 are omitted (exact no-op before training-mode BatchNorm).
    """
    dims = [(LATENT_DIM, 128), (128, 256), (256, 512), (512, 1024),
            (1024, IMG_PIXELS)]
    raw_w, raw_b = {}, {}
    for i, (fin, fout) in enumerate(dims, start=1):
        key, kw, kb = jax.random.split(key, 3)
        bound = 1.0 / (float(fin) ** 0.5)
        raw_w[i] = jax.random.uniform(kw, (fin, fout), jnp.float32, -bound, bound)
        raw_b[i] = jax.random.uniform(kb, (1, fout), jnp.float32, -bound, bound)

    params = {}
    # Layer 1: pad K 100 -> 128 (padded rows zero => exact), bf16 weight.
    w1 = jnp.pad(raw_w[1], ((0, LATENT_PAD - LATENT_DIM), (0, 0)))
    params["w1"] = w1.astype(jnp.bfloat16)
    # Layers 2, 3: bf16 weights; bias dropped (BN follows).
    params["w2"] = raw_w[2].astype(jnp.bfloat16)
    params["w3"] = raw_w[3].astype(jnp.bfloat16)
    # Layer 4: int8 weight + per-column scale; bias dropped (BN follows).
    params["w4q"], s4 = _quantize_int8_per_col(raw_w[4])
    # Layer 5: pad N 784 -> 896 (padded cols give tanh(0)=0, sliced off).
    w5 = jnp.pad(raw_w[5], ((0, 0), (0, OUT_PAD - IMG_PIXELS)))
    b5 = jnp.pad(raw_b[5], ((0, 0), (0, OUT_PAD - IMG_PIXELS)))
    params["w5q"], s5 = _quantize_int8_per_col(w5)

    # BN affine params (PyTorch defaults: gamma=1, beta=0).
    g2, be2 = jnp.ones((1, 256), jnp.float32), jnp.zeros((1, 256), jnp.float32)
    g3, be3 = jnp.ones((1, 512), jnp.float32), jnp.zeros((1, 512), jnp.float32)
    g4, be4 = jnp.ones((1, 1024), jnp.float32), jnp.zeros((1, 1024), jnp.float32)

    packed = jnp.concatenate(
        [raw_b[1], g2, be2, g3, be3, g4, be4, b5, s4, s5], axis=1)
    assert packed.shape == (1, PACK_WIDTH), packed.shape
    params["packed"] = packed
    return params


def generator_forward(z, params):
    B = z.shape[0]
    B_pad = ((B + 7) // 8) * 8   # sublane alignment only; BN masks padded rows
    z_pad = jnp.pad(z.astype(jnp.float32),
                    ((0, B_pad - B), (0, LATENT_PAD - LATENT_DIM)))

    args = (
        z_pad,
        params["w1"], params["w2"], params["w3"],
        params["w4q"], params["w5q"],
        params["packed"],
    )
    vmem_spec = pl.BlockSpec(memory_space=pltpu.MemorySpace.VMEM)
    flat = pl.pallas_call(
        _make_generator_kernel(B, B_pad),
        out_shape=jax.ShapeDtypeStruct((B_pad, OUT_PAD), jnp.float32),
        in_specs=[vmem_spec] * len(args),
        out_specs=vmem_spec,
        compiler_params=pltpu.CompilerParams(vmem_limit_bytes=32 << 20),
    )(*args)
    # img = img.view(B, 1, 28, 28)  (NCHW); drop batch / feature padding.
    return flat[:B, :IMG_PIXELS].reshape(B, 1, 28, 28)


if __name__ == "__main__":
    key = jax.random.PRNGKey(0)
    pkey, zkey = jax.random.split(key)
    params = init_generator_params(pkey)

    B = 8  # small batch; BatchNorm (training mode) needs B > 1
    z = jax.random.normal(zkey, (B, LATENT_DIM), jnp.float32)

    img = generator_forward(z, params)
    jax.block_until_ready(img)

    assert img.shape == (B, 1, 28, 28), img.shape
    assert img.dtype == jnp.float32
    assert bool(jnp.all(jnp.isfinite(img)))
    assert bool(jnp.all(jnp.abs(img) <= 1.0))  # tanh range
    print("KERNEL_OK")
</pallas_src>

<mosaic_0001>
module attributes {stable_mosaic.version = 11 : i64} {
  func.func @kernel(%arg0: memref<8x128xf32, #tpu.memory_space<vmem>>, %arg1: memref<128x128xbf16, #tpu.memory_space<vmem>>, %arg2: memref<128x256xbf16, #tpu.memory_space<vmem>>, %arg3: memref<256x512xbf16, #tpu.memory_space<vmem>>, %arg4: memref<512x1024xi8, #tpu.memory_space<vmem>>, %arg5: memref<1024x896xi8, #tpu.memory_space<vmem>>, %arg6: memref<1x6528xf32, #tpu.memory_space<vmem>>, %arg7: memref<8x896xf32, #tpu.memory_space<vmem>>) attributes {dimension_semantics = [], scalar_prefetch = 0 : i64, scratch_operands = 0 : i64, tpu.core_type = #tpu.core_type<tc>} {
    %c0 = arith.constant 0 : index
    %c0_0 = arith.constant 0 : index
    %0 = vector.load %arg0[%c0, %c0_0] : memref<8x128xf32, #tpu.memory_space<vmem>>, vector<8x128xf32>
    %1 = arith.truncf %0 : vector<8x128xf32> to vector<8x128xbf16>
    %c0_1 = arith.constant 0 : index
    %c0_2 = arith.constant 0 : index
    %2 = vector.load %arg1[%c0_1, %c0_2] : memref<128x128xbf16, #tpu.memory_space<vmem>>, vector<128x128xbf16>
    %cst = arith.constant dense<0.000000e+00> : vector<8x128xf32>
    %3 = tpu.matmul %1, %2, %cst {dimension_numbers = #tpu.dot_dimension_numbers<[1], [0], [0], [1], [0, 0, 1, 1], [], []>} : vector<8x128xbf16>, vector<128x128xbf16>, vector<8x128xf32> -> vector<8x128xf32>
    %c0_3 = arith.constant 0 : index
    %c0_4 = arith.constant 0 : index
    %4 = vector.load %arg6[%c0_3, %c0_4] : memref<1x6528xf32, #tpu.memory_space<vmem>>, vector<1x128xf32>
    %5 = vector.broadcast %4 : vector<1x128xf32> to vector<8x128xf32>
    %6 = arith.addf %3, %5 : vector<8x128xf32>
    %cst_5 = arith.constant 0.000000e+00 : f32
    %7 = vector.broadcast %cst_5 : f32 to vector<8x128xf32>
    %8 = arith.cmpf ogt, %6, %7 : vector<8x128xf32>
    %cst_6 = arith.constant 2.000000e-01 : f32
    %9 = vector.broadcast %cst_6 : f32 to vector<8x128xf32>
    %10 = arith.mulf %9, %6 : vector<8x128xf32>
    %11 = arith.select %8, %6, %10 : vector<8x128xi1>, vector<8x128xf32>
    %12 = arith.truncf %11 : vector<8x128xf32> to vector<8x128xbf16>
    %c0_7 = arith.constant 0 : index
    %c0_8 = arith.constant 0 : index
    %13 = vector.load %arg2[%c0_7, %c0_8] : memref<128x256xbf16, #tpu.memory_space<vmem>>, vector<128x256xbf16>
    %cst_9 = arith.constant dense<0.000000e+00> : vector<8x256xf32>
    %14 = tpu.matmul %12, %13, %cst_9 {dimension_numbers = #tpu.dot_dimension_numbers<[1], [0], [0], [1], [0, 0, 1, 1], [], []>} : vector<8x128xbf16>, vector<128x256xbf16>, vector<8x256xf32> -> vector<8x256xf32>
    %c0_10 = arith.constant 0 : index
    %c128 = arith.constant 128 : index
    %15 = vector.load %arg6[%c0_10, %c128] : memref<1x6528xf32, #tpu.memory_space<vmem>>, vector<1x256xf32>
    %c0_11 = arith.constant 0 : index
    %c384 = arith.constant 384 : index
    %16 = vector.load %arg6[%c0_11, %c384] : memref<1x6528xf32, #tpu.memory_space<vmem>>, vector<1x256xf32>
    %cst_12 = arith.constant dense<0.000000e+00> : vector<256xf32>
    %17 = vector.multi_reduction <add>, %14, %cst_12 [0] : vector<8x256xf32> to vector<256xf32>
    %18 = vector.shape_cast %17 : vector<256xf32> to vector<1x256xf32>
    %cst_13 = arith.constant 8.000000e+00 : f32
    %19 = vector.broadcast %cst_13 : f32 to vector<1x256xf32>
    %20 = arith.divf %18, %19 : vector<1x256xf32>
    %21 = vector.broadcast %20 : vector<1x256xf32> to vector<8x256xf32>
    %22 = arith.subf %14, %21 : vector<8x256xf32>
    %23 = arith.mulf %22, %22 : vector<8x256xf32>
    %cst_14 = arith.constant dense<0.000000e+00> : vector<256xf32>
    %24 = vector.multi_reduction <add>, %23, %cst_14 [0] : vector<8x256xf32> to vector<256xf32>
    %25 = vector.shape_cast %24 : vector<256xf32> to vector<1x256xf32>
    %cst_15 = arith.constant 8.000000e+00 : f32
    %26 = vector.broadcast %cst_15 : f32 to vector<1x256xf32>
    %27 = arith.divf %25, %26 : vector<1x256xf32>
    %cst_16 = arith.constant 8.000000e-01 : f32
    %28 = vector.broadcast %cst_16 : f32 to vector<1x256xf32>
    %29 = arith.addf %27, %28 : vector<1x256xf32>
    %30 = math.rsqrt %29 : vector<1x256xf32>
    %31 = arith.mulf %15, %30 : vector<1x256xf32>
    %32 = vector.broadcast %20 : vector<1x256xf32> to vector<8x256xf32>
    %33 = arith.subf %14, %32 : vector<8x256xf32>
    %34 = vector.broadcast %31 : vector<1x256xf32> to vector<8x256xf32>
    %35 = arith.mulf %33, %34 : vector<8x256xf32>
    %36 = vector.broadcast %16 : vector<1x256xf32> to vector<8x256xf32>
    %37 = arith.addf %35, %36 : vector<8x256xf32>
    %cst_17 = arith.constant 0.000000e+00 : f32
    %38 = vector.broadcast %cst_17 : f32 to vector<8x256xf32>
    %39 = arith.cmpf ogt, %37, %38 : vector<8x256xf32>
    %cst_18 = arith.constant 2.000000e-01 : f32
    %40 = vector.broadcast %cst_18 : f32 to vector<8x256xf32>
    %41 = arith.mulf %40, %37 : vector<8x256xf32>
    %42 = arith.select %39, %37, %41 : vector<8x256xi1>, vector<8x256xf32>
    %43 = arith.truncf %42 : vector<8x256xf32> to vector<8x256xbf16>
    %c0_19 = arith.constant 0 : index
    %c0_20 = arith.constant 0 : index
    %44 = vector.load %arg3[%c0_19, %c0_20] : memref<256x512xbf16, #tpu.memory_space<vmem>>, vector<256x512xbf16>
    %cst_21 = arith.constant dense<0.000000e+00> : vector<8x512xf32>
    %45 = tpu.matmul %43, %44, %cst_21 {dimension_numbers = #tpu.dot_dimension_numbers<[1], [0], [0], [1], [0, 0, 1, 1], [], []>} : vector<8x256xbf16>, vector<256x512xbf16>, vector<8x512xf32> -> vector<8x512xf32>
    %c0_22 = arith.constant 0 : index
    %c640 = arith.constant 640 : index
    %46 = vector.load %arg6[%c0_22, %c640] : memref<1x6528xf32, #tpu.memory_space<vmem>>, vector<1x512xf32>
    %c0_23 = arith.constant 0 : index
    %c1152 = arith.constant 1152 : index
    %47 = vector.load %arg6[%c0_23, %c1152] : memref<1x6528xf32, #tpu.memory_space<vmem>>, vector<1x512xf32>
    %cst_24 = arith.constant dense<0.000000e+00> : vector<512xf32>
    %48 = vector.multi_reduction <add>, %45, %cst_24 [0] : vector<8x512xf32> to vector<512xf32>
    %49 = vector.shape_cast %48 : vector<512xf32> to vector<1x512xf32>
    %cst_25 = arith.constant 8.000000e+00 : f32
    %50 = vector.broadcast %cst_25 : f32 to vector<1x512xf32>
    %51 = arith.divf %49, %50 : vector<1x512xf32>
    %52 = vector.broadcast %51 : vector<1x512xf32> to vector<8x512xf32>
    %53 = arith.subf %45, %52 : vector<8x512xf32>
    %54 = arith.mulf %53, %53 : vector<8x512xf32>
    %cst_26 = arith.constant dense<0.000000e+00> : vector<512xf32>
    %55 = vector.multi_reduction <add>, %54, %cst_26 [0] : vector<8x512xf32> to vector<512xf32>
    %56 = vector.shape_cast %55 : vector<512xf32> to vector<1x512xf32>
    %cst_27 = arith.constant 8.000000e+00 : f32
    %57 = vector.broadcast %cst_27 : f32 to vector<1x512xf32>
    %58 = arith.divf %56, %57 : vector<1x512xf32>
    %cst_28 = arith.constant 8.000000e-01 : f32
    %59 = vector.broadcast %cst_28 : f32 to vector<1x512xf32>
    %60 = arith.addf %58, %59 : vector<1x512xf32>
    %61 = math.rsqrt %60 : vector<1x512xf32>
    %62 = arith.mulf %46, %61 : vector<1x512xf32>
    %63 = vector.broadcast %51 : vector<1x512xf32> to vector<8x512xf32>
    %64 = arith.subf %45, %63 : vector<8x512xf32>
    %65 = vector.broadcast %62 : vector<1x512xf32> to vector<8x512xf32>
    %66 = arith.mulf %64, %65 : vector<8x512xf32>
    %67 = vector.broadcast %47 : vector<1x512xf32> to vector<8x512xf32>
    %68 = arith.addf %66, %67 : vector<8x512xf32>
    %cst_29 = arith.constant 0.000000e+00 : f32
    %69 = vector.broadcast %cst_29 : f32 to vector<8x512xf32>
    %70 = arith.cmpf ogt, %68, %69 : vector<8x512xf32>
    %cst_30 = arith.constant 2.000000e-01 : f32
    %71 = vector.broadcast %cst_30 : f32 to vector<8x512xf32>
    %72 = arith.mulf %71, %68 : vector<8x512xf32>
    %73 = arith.select %70, %68, %72 : vector<8x512xi1>, vector<8x512xf32>
    %c0_31 = arith.constant 0 : index
    %c4608 = arith.constant 4608 : index
    %74 = vector.load %arg6[%c0_31, %c4608] : memref<1x6528xf32, #tpu.memory_space<vmem>>, vector<1x1024xf32>
    %c0_32 = arith.constant 0 : index
    %c0_33 = arith.constant 0 : index
    %75 = vector.load %arg4[%c0_32, %c0_33] : memref<512x1024xi8, #tpu.memory_space<vmem>>, vector<512x1024xi8>
    %76 = arith.sitofp %75 : vector<512x1024xi8> to vector<512x1024xf32>
    %77 = arith.truncf %76 : vector<512x1024xf32> to vector<512x1024xbf16>
    %78 = arith.truncf %73 : vector<8x512xf32> to vector<8x512xbf16>
    %cst_34 = arith.constant dense<0.000000e+00> : vector<8x1024xf32>
    %79 = tpu.matmul %78, %77, %cst_34 {dimension_numbers = #tpu.dot_dimension_numbers<[1], [0], [0], [1], [0, 0, 1, 1], [], []>} : vector<8x512xbf16>, vector<512x1024xbf16>, vector<8x1024xf32> -> vector<8x1024xf32>
    %80 = vector.broadcast %74 : vector<1x1024xf32> to vector<8x1024xf32>
    %81 = arith.mulf %79, %80 : vector<8x1024xf32>
    %c0_35 = arith.constant 0 : index
    %c1664 = arith.constant 1664 : index
    %82 = vector.load %arg6[%c0_35, %c1664] : memref<1x6528xf32, #tpu.memory_space<vmem>>, vector<1x1024xf32>
    %c0_36 = arith.constant 0 : index
    %c2688 = arith.constant 2688 : index
    %83 = vector.load %arg6[%c0_36, %c2688] : memref<1x6528xf32, #tpu.memory_space<vmem>>, vector<1x1024xf32>
    %cst_37 = arith.constant dense<0.000000e+00> : vector<1024xf32>
    %84 = vector.multi_reduction <add>, %81, %cst_37 [0] : vector<8x1024xf32> to vector<1024xf32>
    %85 = vector.shape_cast %84 : vector<1024xf32> to vector<1x1024xf32>
    %cst_38 = arith.constant 8.000000e+00 : f32
    %86 = vector.broadcast %cst_38 : f32 to vector<1x1024xf32>
    %87 = arith.divf %85, %86 : vector<1x1024xf32>
    %88 = vector.broadcast %87 : vector<1x1024xf32> to vector<8x1024xf32>
    %89 = arith.subf %81, %88 : vector<8x1024xf32>
    %90 = arith.mulf %89, %89 : vector<8x1024xf32>
    %cst_39 = arith.constant dense<0.000000e+00> : vector<1024xf32>
    %91 = vector.multi_reduction <add>, %90, %cst_39 [0] : vector<8x1024xf32> to vector<1024xf32>
    %92 = vector.shape_cast %91 : vector<1024xf32> to vector<1x1024xf32>
    %cst_40 = arith.constant 8.000000e+00 : f32
    %93 = vector.broadcast %cst_40 : f32 to vector<1x1024xf32>
    %94 = arith.divf %92, %93 : vector<1x1024xf32>
    %cst_41 = arith.constant 8.000000e-01 : f32
    %95 = vector.broadcast %cst_41 : f32 to vector<1x1024xf32>
    %96 = arith.addf %94, %95 : vector<1x1024xf32>
    %97 = math.rsqrt %96 : vector<1x1024xf32>
    %98 = arith.mulf %82, %97 : vector<1x1024xf32>
    %99 = vector.broadcast %87 : vector<1x1024xf32> to vector<8x1024xf32>
    %100 = arith.subf %81, %99 : vector<8x1024xf32>
    %101 = vector.broadcast %98 : vector<1x1024xf32> to vector<8x1024xf32>
    %102 = arith.mulf %100, %101 : vector<8x1024xf32>
    %103 = vector.broadcast %83 : vector<1x1024xf32> to vector<8x1024xf32>
    %104 = arith.addf %102, %103 : vector<8x1024xf32>
    %cst_42 = arith.constant 0.000000e+00 : f32
    %105 = vector.broadcast %cst_42 : f32 to vector<8x1024xf32>
    %106 = arith.cmpf ogt, %104, %105 : vector<8x1024xf32>
    %cst_43 = arith.constant 2.000000e-01 : f32
    %107 = vector.broadcast %cst_43 : f32 to vector<8x1024xf32>
    %108 = arith.mulf %107, %104 : vector<8x1024xf32>
    %109 = arith.select %106, %104, %108 : vector<8x1024xi1>, vector<8x1024xf32>
    %c0_44 = arith.constant 0 : index
    %c5632 = arith.constant 5632 : index
    %110 = vector.load %arg6[%c0_44, %c5632] : memref<1x6528xf32, #tpu.memory_space<vmem>>, vector<1x896xf32>
    %c0_45 = arith.constant 0 : index
    %c0_46 = arith.constant 0 : index
    %111 = vector.load %arg5[%c0_45, %c0_46] : memref<1024x896xi8, #tpu.memory_space<vmem>>, vector<1024x896xi8>
    %112 = arith.sitofp %111 : vector<1024x896xi8> to vector<1024x896xf32>
    %113 = arith.truncf %112 : vector<1024x896xf32> to vector<1024x896xbf16>
    %114 = arith.truncf %109 : vector<8x1024xf32> to vector<8x1024xbf16>
    %cst_47 = arith.constant dense<0.000000e+00> : vector<8x896xf32>
    %115 = tpu.matmul %114, %113, %cst_47 {dimension_numbers = #tpu.dot_dimension_numbers<[1], [0], [0], [1], [0, 0, 1, 1], [], []>} : vector<8x1024xbf16>, vector<1024x896xbf16>, vector<8x896xf32> -> vector<8x896xf32>
    %116 = vector.broadcast %110 : vector<1x896xf32> to vector<8x896xf32>
    %117 = arith.mulf %115, %116 : vector<8x896xf32>
    %c0_48 = arith.constant 0 : index
    %c3712 = arith.constant 3712 : index
    %118 = vector.load %arg6[%c0_48, %c3712] : memref<1x6528xf32, #tpu.memory_space<vmem>>, vector<1x896xf32>
    %119 = vector.broadcast %118 : vector<1x896xf32> to vector<8x896xf32>
    %120 = arith.addf %117, %119 : vector<8x896xf32>
    %121 = math.tanh %120 : vector<8x896xf32>
    %c0_49 = arith.constant 0 : index
    %c0_50 = arith.constant 0 : index
    %122 = vector.load %arg7[%c0_49, %c0_50] : memref<8x896xf32, #tpu.memory_space<vmem>>, vector<8x896xf32>
    tpu.vector_store %arg7[%c0_49, %c0_50], %121 {strides = array<i32>} : memref<8x896xf32, #tpu.memory_space<vmem>>, vector<8x896xf32>,
    return
  }
}

</mosaic_0001>

<bundles_post_ra>
// kernel: tpu_custom_call.1
= control target key start
LH: loop header
LB: loop body
LE: loop exit
PB: predicated region body
PF: predicated region fallthrough
CT: control target
= control target key end

     0   :  { %12 = vsyncpa [#allocation3], 0  ;;  %s4776_s0 = inlined_call_operand.hbm [shape: f32[8,128], index: 0, kind: input, shape index: {}]   ;;  %s4777_s1 = inlined_call_operand.hbm [shape: bf16[128,128], index: 1, kind: input, shape index: {}]   ;;  %s4778_s2 = inlined_call_operand.hbm [shape: bf16[128,256], index: 2, kind: input, shape index: {}]   ;;  %s4779_s3 = inlined_call_operand.hbm [shape: bf16[256,512], index: 3, kind: input, shape index: {}]   ;;  %s4780_s4 = inlined_call_operand.hbm [shape: s8[512,1024], index: 4, kind: input, shape index: {}]   ;;  %s4781_s5 = inlined_call_operand.hbm [shape: s8[1024,896], index: 5, kind: input, shape index: {}]   ;;  %s4782_s6 = inlined_call_operand.hbm [shape: f32[1,6528], index: 6, kind: input, shape index: {}]   ;;  %s4783_s7 = inlined_call_operand.hbm [shape: f32[8,896], index: 7, kind: output, shape index: {}]  }
   0x1   :  { %13 = vsyncpa [#allocation6], 0 }
   0x2   :  { %14 = vsyncpa [#allocation9], 0 }
   0x3   :  { %15 = vsyncpa [#allocation12], 0 }
   0x4   :  { %16 = vsyncpa [#allocation4], 0  ;;  %s4277_s24 = smov [#allocation5]   ;;  %s4091_s28 = scalar_lea.hbm %s4777_s1, 1024 }
   0x5   :  { %s32_s25 = sshll.u32 %s4277_s24, 4  ;;  %p4092_p0 = scmp.ne.s32.totalorder %s4777_s1, %s4091_s28  ;;  %s33_s25 = int_to_ptr.vmem [resolvable:$true] %s32_s25 }
   0x6   :  { %p4095_p1 = scmp.lt.u32.totalorder %s4091_s28, %s4777_s1 }
   0x8   :  { %p4097_p2 = pnand %p4095_p1, %p4092_p0 }
   0xa   :  { %4100 = shalt.err (!%p4097_p2)
}
   0xb   :  { %s4101_s10 = scalar_lea.vmem %s33_s25, 1024  ;;  %p4106_p4 = scmp.lt.s32.totalorder %s33_s25, %s33_s25 }
   0xc   :  { %p4102_p3 = scmp.ne.s32.totalorder %s33_s25, %s4101_s10  ;;  %p4107_p5 = scmp.lt.s32.totalorder %s4101_s10, %s4101_s10 }
   0xe   :  { %p4108_p6 = por %p4107_p5, %p4106_p4 }
  0x10   :  { %p4109_p7 = pnand %p4108_p6, %p4102_p3 }
  0x12   :  { %4112 = shalt.err (!%p4109_p7)
}
  0x13   :  { %s4278_s11 = smov 64   ;;  %s4279_s12 = smov 4  }
  0x14   :  { %38 = dma.hbm_to_vmem [thread:$0]  %s4777_s1, 1024, %s33_s25, [#allocation6], %s4278_s11, %s4278_s11, %s4279_s12  }
  0x15   :  { %s4280_s15 = smov [#allocation8]   ;;  %s4113_s19 = scalar_lea.hbm %s4779_s3, 8192 }
  0x16   :  { %s56_s16 = sshll.u32 %s4280_s15, 4  ;;  %p4114_p8 = scmp.ne.s32.totalorder %s4779_s3, %s4113_s19  ;;  %s57_s16 = int_to_ptr.vmem [resolvable:$true] %s56_s16 }
  0x17   :  { %p4117_p9 = scmp.lt.u32.totalorder %s4113_s19, %s4779_s3 }
  0x19   :  { %p4119_p10 = pnand %p4117_p9, %p4114_p8 }
  0x1b   :  { %4122 = shalt.err (!%p4119_p10)
}
  0x1c   :  { %s4123_s24 = scalar_lea.vmem %s57_s16, 8192  ;;  %p4128_p12 = scmp.lt.s32.totalorder %s57_s16, %s57_s16 }
  0x1d   :  { %p4124_p11 = scmp.ne.s32.totalorder %s57_s16, %s4123_s24  ;;  %p4129_p13 = scmp.lt.s32.totalorder %s4123_s24, %s4123_s24 }
  0x1f   :  { %p4130_p0 = por %p4129_p13, %p4128_p12 }
  0x21   :  { %p4131_p1 = pnand %p4130_p0, %p4124_p11 }
  0x23   :  { %4134 = shalt.err (!%p4131_p1)
}
  0x24   :  { %s4281_s1 = smov 256   ;;  %s4282_s25 = smov 16  }
  0x25   :  { %62 = dma.hbm_to_vmem [thread:$0]  %s4779_s3, 8192, %s57_s16, [#allocation9], %s4281_s1, %s4281_s1, %s4282_s25  }
  0x26   :  { %s4283_s28 = smov [#allocation11]   ;;  %s4135_s9 = scalar_lea.hbm %s4781_s5, 28672 }
  0x27   :  { %s80_s29 = sshll.u32 %s4283_s28, 4  ;;  %p4136_p2 = scmp.ne.s32.totalorder %s4781_s5, %s4135_s9  ;;  %s81_s29 = int_to_ptr.vmem [resolvable:$true] %s80_s29 }
  0x28   :  { %p4139_p3 = scmp.lt.u32.totalorder %s4135_s9, %s4781_s5 }
  0x2a   :  { %p4141_p4 = pnand %p4139_p3, %p4136_p2 }
  0x2c   :  { %4144 = shalt.err (!%p4141_p4)
}
  0x2d   :  { %s4145_s15 = scalar_lea.vmem %s81_s29, 28672  ;;  %p4150_p6 = scmp.lt.s32.totalorder %s81_s29, %s81_s29 }
  0x2e   :  { %p4146_p5 = scmp.ne.s32.totalorder %s81_s29, %s4145_s15  ;;  %p4151_p7 = scmp.lt.s32.totalorder %s4145_s15, %s4145_s15 }
  0x30   :  { %p4152_p8 = por %p4151_p7, %p4150_p6 }
  0x32   :  { %p4153_p9 = pnand %p4152_p8, %p4146_p5 }
  0x34   :  { %4156 = shalt.err (!%p4153_p9)
}
  0x35   :  { %s4284_s3 = smov 896   ;;  %s4285_s16 = smov 56  }
  0x36   :  { %86 = dma.hbm_to_vmem [thread:$0]  %s4781_s5, 28672, %s81_s29, [#allocation12], %s4284_s3, %s4284_s3, %s4285_s16  }
  0x37   :  { %s4286_s19 = smov [#allocation2]   ;;  %s4287_s21 = smov [#allocation7]  }
  0x38   :  { %s23_s20 = sshll.u32 %s4286_s19, 4  ;;  %s44_s22 = sshll.u32 %s4287_s21, 4  ;;  %s24_s20 = int_to_ptr.vmem [resolvable:$true] %s23_s20  ;;  %s45_s22 = int_to_ptr.vmem [resolvable:$true] %s44_s22 }
  0x39   :  { %s4157_s1 = scalar_lea.hbm %s4776_s0, 128 }
  0x3a   :  { %p4158_p10 = scmp.ne.s32.totalorder %s4776_s0, %s4157_s1  ;;  %p4161_p11 = scmp.lt.u32.totalorder %s4157_s1, %s4776_s0 }
  0x3c   :  { %p4163_p12 = pnand %p4161_p11, %p4158_p10 }
  0x3e   :  { %4166 = shalt.err (!%p4163_p12)
}
  0x3f   :  { %s4167_s5 = scalar_lea.vmem %s24_s20, 128  ;;  %p4172_p0 = scmp.lt.s32.totalorder %s24_s20, %s24_s20 }
  0x40   :  { %p4168_p13 = scmp.ne.s32.totalorder %s24_s20, %s4167_s5  ;;  %p4173_p1 = scmp.lt.s32.totalorder %s4167_s5, %s4167_s5 }
  0x42   :  { %p4174_p2 = por %p4173_p1, %p4172_p0 }
  0x44   :  { %p4175_p3 = pnand %p4174_p2, %p4168_p13 }
  0x46   :  { %4178 = shalt.err (!%p4175_p3)
}
  0x47   :  { %26 = dma.hbm_to_vmem [thread:$0]  %s4776_s0, 128, %s24_s20, [#allocation3]  }
  0x48   :  { %s4179_s10 = scalar_lea.hbm %s4778_s2, 2048 }
  0x49   :  { %p4180_p4 = scmp.ne.s32.totalorder %s4778_s2, %s4179_s10  ;;  %p4183_p5 = scmp.lt.u32.totalorder %s4179_s10, %s4778_s2 }
  0x4b   :  { %p4185_p6 = pnand %p4183_p5, %p4180_p4 }
  0x4d   :  { %4188 = shalt.err (!%p4185_p6)
}
  0x4e   :  { %s4189_s3 = scalar_lea.vmem %s45_s22, 2048  ;;  %p4194_p8 = scmp.lt.s32.totalorder %s45_s22, %s45_s22 }
  0x4f   :  { %p4190_p7 = scmp.ne.s32.totalorder %s45_s22, %s4189_s3  ;;  %p4195_p9 = scmp.lt.s32.totalorder %s4189_s3, %s4189_s3 }
  0x51   :  { %p4196_p10 = por %p4195_p9, %p4194_p8 }
  0x53   :  { %p4197_p11 = pnand %p4196_p10, %p4190_p7 }
  0x55   :  { %4200 = shalt.err (!%p4197_p11)
}
  0x56   :  { %s4288_s0 = smov 128   ;;  %s4289_s16 = smov 8  }
  0x57   :  { %50 = dma.hbm_to_vmem [thread:$0]  %s4778_s2, 2048, %s45_s22, [#allocation6], %s4288_s0, %s4288_s0, %s4289_s16  }
  0x58   :  { %s4290_s19 = smov [#allocation10]   ;;  %s4201_s24 = scalar_lea.hbm %s4780_s4, 16384 }
  0x59   :  { %s68_s20 = sshll.u32 %s4290_s19, 4  ;;  %p4202_p12 = scmp.ne.s32.totalorder %s4780_s4, %s4201_s24  ;;  %s69_s20 = int_to_ptr.vmem [resolvable:$true] %s68_s20 }
  0x5a   :  { %p4205_p13 = scmp.lt.u32.totalorder %s4201_s24, %s4780_s4 }
  0x5c   :  { %p4207_p0 = pnand %p4205_p13, %p4202_p12 }
  0x5e   :  { %4210 = shalt.err (!%p4207_p0)
}
  0x5f   :  { %s4211_s28 = scalar_lea.vmem %s69_s20, 16384  ;;  %p4216_p2 = scmp.lt.s32.totalorder %s69_s20, %s69_s20 }
  0x60   :  { %p4212_p1 = scmp.ne.s32.totalorder %s69_s20, %s4211_s28  ;;  %p4217_p3 = scmp.lt.s32.totalorder %s4211_s28, %s4211_s28 }
  0x62   :  { %p4218_p4 = por %p4217_p3, %p4216_p2 }
  0x64   :  { %p4219_p5 = pnand %p4218_p4, %p4212_p1 }
  0x66   :  { %4222 = shalt.err (!%p4219_p5)
}
  0x67   :  { %s4291_s2 = smov 1024   ;;  %s4292_s29 = smov [#allocation13]  }
  0x68   :  { %74 = dma.hbm_to_vmem [thread:$0]  %s4780_s4, 16384, %s69_s20, [#allocation9], %s4291_s2, %s4291_s2, %s4278_s11  }
  0x69   :  { %s93_s30 = sshll.u32 %s4292_s29, 4  ;;  %s4223_s10 = scalar_lea.hbm %s4782_s6, 816  ;;  %s94_s30 = int_to_ptr.vmem [resolvable:$true] %s93_s30 }
  0x6a   :  { %p4224_p6 = scmp.ne.s32.totalorder %s4782_s6, %s4223_s10  ;;  %p4227_p7 = scmp.lt.u32.totalorder %s4223_s10, %s4782_s6 }
  0x6c   :  { %p4229_p8 = pnand %p4227_p7, %p4224_p6 }
  0x6e   :  { %4232 = shalt.err (!%p4229_p8)
}
  0x6f   :  { %s4233_s3 = scalar_lea.vmem %s94_s30, 816  ;;  %s4237_s4 = scalar_lea.vmem %s94_s30, 832 }
  0x70   :  { %p4234_p9 = scmp.ne.s32.totalorder %s94_s30, %s4233_s3  ;;  %p4238_p10 = scmp.lt.s32.totalorder %s94_s30, %s94_s30 }
  0x71   :  { %p4239_p11 = scmp.lt.s32.totalorder %s4237_s4, %s4233_s3 }
  0x73   :  { %p4240_p12 = por %p4239_p11, %p4238_p10 }
  0x75   :  { %p4241_p13 = pnand %p4240_p12, %p4234_p9 }
  0x77   :  { %4244 = shalt.err (!%p4241_p13)
}
  0x78   :  { %96 = dma.hbm_to_vmem [thread:$0]  %s4782_s6, 816, %s94_s30, [#allocation12]  }
  0x79   :  { %4267 = dma.done.wait [#allocation3], 128  }
  0x7a   :  { %4268 = vsyncadd [#allocation3], 4294967168 }
  0x7b   :  { %4269 = dma.done.wait [#allocation6], 3072  }
  0x7c   :  { %4270 = vsyncadd [#allocation6], 4294964224 }
  0x7d   :  { %4271 = dma.done.wait [#allocation9], 24576  }
  0x7e   :  { %4272 = vsyncadd [#allocation9], 4294942720 }
  0x7f   :  { %4273 = dma.done.wait [#allocation12], 29488  }
  0x80   :  { %4274 = vsyncadd [#allocation12], 4294937808  ;;  %v4293_v0 = vmov 0.0   ;;  %vm4294_vm0 = vmmov 0   ;;  %v3921_v1 = vld [vmem:[#allocation5] sm:$0xff]   ;;  %v3922_v2 = vld [vmem:[#allocation5 + $0x8] sm:$0xff]  }
  0x81   :  { %3828 = vmatprep.subr.bf16.mxu0 %v4293_v0  ;;  %3844 = vmatprep.mubr.msk.bf16.mxu0 %vm4294_vm0, %v4293_v0  ;;  %v3923_v3 = vld [vmem:[#allocation5 + $0x10] sm:$0xff]   ;;  %v3929_v4 = vld [vmem:[#allocation7 + $0x4] ss:$8 sps:$4 sm:$0xff]   ;;  %v3931_v5 = vld [vmem:[#allocation7] ss:$8 sps:$4 sm:$0xff]   ;;  %v4295_v27 = vmov 0  }
  0x82   :  { %3829 = vmatpush3.bf16.msra.mxu0 %v3921_v1  ;;  %v3924_v6 = vld [vmem:[#allocation5 + $0x18] sm:$0xff]   ;;  %332 = vmatprep.subr.bf16.mxu1 %v3929_v4  ;;  %v3935_v9 = vld [vmem:[#allocation7 + $0x24] ss:$8 sps:$4 sm:$0xff]   ;;  %v3937_v12 = vld [vmem:[#allocation7 + $0x20] ss:$8 sps:$4 sm:$0xff]   ;;  %s4297_s6 = smov [#allocation14]  }
  0x83   :  { %3830 = vmatprep.subr.bf16.mxu0 %v4293_v0  ;;  %v3932_v7 = vld [vmem:[#allocation7 + $0x14] ss:$8 sps:$4 sm:$0xff]   ;;  %333 = vmatpush1.bf16.msra.mxu1 %v3931_v5  ;;  %v3934_v8 = vld [vmem:[#allocation7 + $0x10] ss:$8 sps:$4 sm:$0xff]   ;;  %v3925_v10 = vld [vmem:[#allocation5 + $0x20] sm:$0xff]   ;;  %s3630_s16 = sshll.u32 %s4297_s6, 4  ;;  %s3631_s16 = int_to_ptr.vmem [resolvable:$true] %s3630_s16 }
  0x84   :  { %334 = vmatprep.subr.bf16.mxu1 %v3932_v7  ;;  %v3926_v11 = vld [vmem:[#allocation5 + $0x28] sm:$0xff]   ;;  %v3938_v13 = vld [vmem:[#allocation7 + $0x34] ss:$8 sps:$4 sm:$0xff]   ;;  %v3940_v14 = vld [vmem:[#allocation7 + $0x30] ss:$8 sps:$4 sm:$0xff]   ;;  %364 = vmatprep.mubr.bf16.mxu1 %v4295_v27  ;;  %s4245_s17 = scalar_lea.vmem %s3631_s16, 896  ;;  %p4250_p1 = scmp.lt.s32.totalorder %s3631_s16, %s3631_s16 }
  0x85   :  { %v3941_v15 = vld [vmem:[#allocation7 + $0x44] ss:$8 sps:$4 sm:$0xff]   ;;  %v3927_v16 = vld [vmem:[#allocation5 + $0x30] sm:$0xff]   ;;  %v3943_v17 = vld [vmem:[#allocation7 + $0x40] ss:$8 sps:$4 sm:$0xff]   ;;  %p4246_p0 = scmp.ne.s32.totalorder %s3631_s16, %s4245_s17  ;;  %p4251_p2 = scmp.lt.s32.totalorder %s4245_s17, %s4245_s17 }
  0x86   :  { %3831 = vmatpush3.bf16.msra.mxu0 %v3922_v2  ;;  %v3944_v18 = vld [vmem:[#allocation7 + $0x54] ss:$8 sps:$4 sm:$0xff]   ;;  %v3946_v21 = vld [vmem:[#allocation7 + $0x50] ss:$8 sps:$4 sm:$0xff]   ;;  %v3947_v23 = vld [vmem:[#allocation7 + $0x64] ss:$8 sps:$4 sm:$0xff]  }
  0x87   :  { %3832 = vmatprep.subr.bf16.mxu0 %v4293_v0  ;;  %335 = vmatpush1.bf16.msra.mxu1 %v3934_v8  ;;  %v3928_v19 = vld [vmem:[#allocation5 + $0x38] sm:$0xff]   ;;  %v3949_v24 = vld [vmem:[#allocation7 + $0x60] ss:$8 sps:$4 sm:$0xff]   ;;  %v3955_v37 = vld [vmem:[#allocation8 + $0x4] ss:$16 sps:$4 sm:$0xff]   ;;  %p4252_p3 = por %p4251_p2, %p4250_p1 }
  0x88   :  { %336 = vmatprep.subr.bf16.mxu1 %v3935_v9  ;;  %v119_v20 = vld [vmem:[#allocation2] sm:$0xff]  ;;  %v3642_v28 = vld [vmem:[#allocation13] ss:$0 sm:$0xff]  ;;  %v3958_v39 = vld [vmem:[#allocation8 + $0x24] ss:$16 sps:$4 sm:$0xff]  }
  0x89   :  { %v120_v22 = vpack.c.bf16 %v119_v20, %v119_v20  ;;  %v3950_v25 = vld [vmem:[#allocation7 + $0x74] ss:$8 sps:$4 sm:$0xff]   ;;  %v3952_v26 = vld [vmem:[#allocation7 + $0x70] ss:$8 sps:$4 sm:$0xff]   ;;  %p4253_p4 = pnand %p4252_p3, %p4246_p0 }
  0x8a   :  { %3833 = vmatpush3.bf16.msra.mxu0 %v3923_v3  ;;  %v3953_v38 = vld [vmem:[#allocation8] ss:$16 sps:$4 sm:$0xff]   ;;  %v3961_v41 = vld [vmem:[#allocation8 + $0x44] ss:$16 sps:$4 sm:$0xff]   ;;  %v4003_v5 = vld [vmem:[#allocation8 + $0xc] ss:$16 sps:$4 sm:$0xff]  }
  0x8b   :  { %3834 = vmatprep.subr.bf16.mxu0 %v4293_v0  ;;  %337 = vmatpush1.bf16.msra.mxu1 %v3937_v12  ;;  %v3956_v40 = vld [vmem:[#allocation8 + $0x20] ss:$16 sps:$4 sm:$0xff]   ;;  %v3964_v43 = vld [vmem:[#allocation8 + $0x64] ss:$16 sps:$4 sm:$0xff]  }
  0x8c   :  { %338 = vmatprep.subr.bf16.mxu1 %v3938_v13  ;;  %v3959_v42 = vld [vmem:[#allocation8 + $0x40] ss:$16 sps:$4 sm:$0xff]   ;;  %v3967_v45 = vld [vmem:[#allocation8 + $0x84] ss:$16 sps:$4 sm:$0xff]  }
  0x8d   :  { %v3962_v44 = vld [vmem:[#allocation8 + $0x60] ss:$16 sps:$4 sm:$0xff]   ;;  %v3970_v47 = vld [vmem:[#allocation8 + $0xa4] ss:$16 sps:$4 sm:$0xff]  }
  0x8e   :  { %3835 = vmatpush3.bf16.msra.mxu0 %v3924_v6  ;;  %v3965_v46 = vld [vmem:[#allocation8 + $0x80] ss:$16 sps:$4 sm:$0xff]   ;;  %v3973_v49 = vld [vmem:[#allocation8 + $0xc4] ss:$16 sps:$4 sm:$0xff]  }
  0x8f   :  { %3836 = vmatprep.subr.bf16.mxu0 %v4293_v0  ;;  %339 = vmatpush1.bf16.msra.mxu1 %v3940_v14  ;;  %v3968_v48 = vld [vmem:[#allocation8 + $0xa0] ss:$16 sps:$4 sm:$0xff]   ;;  %v3976_v51 = vld [vmem:[#allocation8 + $0xe4] ss:$16 sps:$4 sm:$0xff]  }
  0x90   :  { %340 = vmatprep.subr.bf16.mxu1 %v3941_v15  ;;  %v3971_v50 = vld [vmem:[#allocation8 + $0xc0] ss:$16 sps:$4 sm:$0xff]   ;;  %v3979_v53 = vld [vmem:[#allocation8 + $0x104] ss:$16 sps:$4 sm:$0xff]  }
  0x91   :  { %v3974_v52 = vld [vmem:[#allocation8 + $0xe0] ss:$16 sps:$4 sm:$0xff]   ;;  %v3982_v55 = vld [vmem:[#allocation8 + $0x124] ss:$16 sps:$4 sm:$0xff]  }
  0x92   :  { %3837 = vmatpush3.bf16.msra.mxu0 %v3925_v10  ;;  %v3977_v54 = vld [vmem:[#allocation8 + $0x100] ss:$16 sps:$4 sm:$0xff]   ;;  %v3985_v57 = vld [vmem:[#allocation8 + $0x144] ss:$16 sps:$4 sm:$0xff]  }
  0x93   :  { %3838 = vmatprep.subr.bf16.mxu0 %v4293_v0  ;;  %341 = vmatpush1.bf16.msra.mxu1 %v3943_v17  ;;  %v3980_v56 = vld [vmem:[#allocation8 + $0x120] ss:$16 sps:$4 sm:$0xff]   ;;  %v3988_v59 = vld [vmem:[#allocation8 + $0x164] ss:$16 sps:$4 sm:$0xff]  }
  0x94   :  { %342 = vmatprep.subr.bf16.mxu1 %v3944_v18  ;;  %v3983_v58 = vld [vmem:[#allocation8 + $0x140] ss:$16 sps:$4 sm:$0xff]   ;;  %v3991_v61 = vld [vmem:[#allocation8 + $0x184] ss:$16 sps:$4 sm:$0xff]  }
  0x95   :  { %v3986_v60 = vld [vmem:[#allocation8 + $0x160] ss:$16 sps:$4 sm:$0xff]   ;;  %v3994_v63 = vld [vmem:[#allocation8 + $0x1a4] ss:$16 sps:$4 sm:$0xff]  }
  0x96   :  { %3839 = vmatpush3.bf16.msra.mxu0 %v3926_v11  ;;  %v3989_v62 = vld [vmem:[#allocation8 + $0x180] ss:$16 sps:$4 sm:$0xff]   ;;  %v3997_v1 = vld [vmem:[#allocation8 + $0x1c4] ss:$16 sps:$4 sm:$0xff]  }
  0x97   :  { %3840 = vmatprep.subr.bf16.mxu0 %v4293_v0  ;;  %343 = vmatpush1.bf16.msra.mxu1 %v3946_v21  ;;  %v3995_v2 = vld [vmem:[#allocation8 + $0x1c0] ss:$16 sps:$4 sm:$0xff]   ;;  %v4000_v4 = vld [vmem:[#allocation8 + $0x1e4] ss:$16 sps:$4 sm:$0xff]  }
  0x98   :  { %344 = vmatprep.subr.bf16.mxu1 %v3947_v23  ;;  %v3998_v3 = vld [vmem:[#allocation8 + $0x1e0] ss:$16 sps:$4 sm:$0xff]  }
  0x9a   :  { %3841 = vmatpush3.bf16.msra.mxu0 %v3927_v16 }
  0x9b   :  { %3842 = vmatprep.subr.bf16.mxu0 %v4293_v0  ;;  %345 = vmatpush1.bf16.msra.mxu1 %v3949_v24  ;;  %v3992_v0 = vld [vmem:[#allocation8 + $0x1a0] ss:$16 sps:$4 sm:$0xff]  }
  0x9c   :  { %346 = vmatprep.subr.bf16.mxu1 %v3950_v25 }
  0x9e   :  { %3843 = vmatpush3.bf16.msra.mxu0 %v3928_v19 }
  0x9f   :  { %347 = vmatpush1.bf16.msra.mxu1 %v3952_v26 }
  0xa0   :  { %849 = vmatprep.subr.bf16.mxu1 %v3955_v37 }
  0xa1   :  { %3845 = vmatmul.mubr.bf16.vlgmr.msra.gmra.mrb[0].mxu0 %v120_v22 }
 0x174   :  { %v226_v29 = vpop.f32.mrb[0].mxu0 }
 0x175   :  { %v227_v30 = vadd.f32 %v3642_v28, %v226_v29  ;;  %v3846_v31 = vpop.f32.mrb[1].mxu0 }
 0x176   :  { %v229_v32 = vpop.f32.mrb[2].mxu0 }
 0x177   :  { %vm232_vm1 = vcmp.gt.f32.partialorder %v227_v30, 0.0  ;;  %v233_v33 = vmul.f32 0.2, %v227_v30  ;;  %v3847_v34 = vpop.f32.mrb[3].mxu0 }
 0x179   :  { %v234_v35 = vsel %vm232_vm1, %v227_v30, %v233_v33 }
 0x17a   :  { %v235_v36 = vpack.c.bf16 %v234_v35, %v234_v35 }
 0x17c   :  { %365 = vmatmul.mubr.bf16.vlgmr.msra.gmra.mrb[0].mxu1 %v235_v36 }
 0x17d   :  { %850 = vmatpush1.bf16.msra.mxu1 %v3953_v38 }
 0x17e   :  { %851 = vmatprep.subr.bf16.mxu1 %v3958_v39 }
 0x181   :  { %852 = vmatpush1.bf16.msra.mxu1 %v3956_v40 }
 0x182   :  { %853 = vmatprep.subr.bf16.mxu1 %v3961_v41 }
 0x185   :  { %854 = vmatpush1.bf16.msra.mxu1 %v3959_v42 }
 0x186   :  { %855 = vmatprep.subr.bf16.mxu1 %v3964_v43 }
 0x189   :  { %856 = vmatpush1.bf16.msra.mxu1 %v3962_v44  ;;  %v4296_v44 = vmov 1966171168  }
 0x18a   :  { %857 = vmatprep.subr.bf16.mxu1 %v3967_v45  ;;  %v416_v45 = vunpack.c.l.s4 %v4296_v44 }
 0x18d   :  { %858 = vmatpush1.bf16.msra.mxu1 %v3965_v46  ;;  %v418_v46 = vlaneseq }
 0x18e   :  { %859 = vmatprep.subr.bf16.mxu1 %v3970_v47  ;;  %v417_v47 = vunpack.c.0.s8 %v416_v45  ;;  %v1098_v45 = vld [vmem:[#allocation10] sm:$0xff] }
 0x191   :  { %860 = vmatpush1.bf16.msra.mxu1 %v3968_v48  ;;  %v4425_v48 = vshrl.u32 %v418_v46, 7  ;;  %v1100_v46 = vld [vmem:[#allocation10 + $0x10] sm:$0xff] }
 0x192   :  { %861 = vmatprep.subr.bf16.mxu1 %v3973_v49 }
 0x195   :  { %862 = vmatpush1.bf16.msra.mxu1 %v3971_v50  ;;  %v4428_v50 = vsub.s32 %v417_v47, %v4425_v48  ;;  %v1226_v47 = vunpack.c.l.s8.bf16 %v1098_v45 }
 0x196   :  { %863 = vmatprep.subr.bf16.mxu1 %v3976_v51 }
 0x199   :  { %864 = vmatpush1.bf16.msra.mxu1 %v3974_v52 }
 0x19a   :  { %865 = vmatprep.subr.bf16.mxu1 %v3979_v53 }
 0x19d   :  { %866 = vmatpush1.bf16.msra.mxu1 %v3977_v54  ;;  %v373_v54 = vld [vmem:[#allocation13 + $0x1] sm:$0x3] }
 0x19e   :  { %867 = vmatprep.subr.bf16.mxu1 %v3982_v55 }
 0x1a1   :  { %868 = vmatpush1.bf16.msra.mxu1 %v3980_v56  ;;  %v4433_v56 = vsub.s32 0, %v4425_v48 }
 0x1a2   :  { %869 = vmatprep.subr.bf16.mxu1 %v3985_v57  ;;  %v4436_v57 = vsub.s32 1, %v4425_v48 }
 0x1a5   :  { %870 = vmatpush1.bf16.msra.mxu1 %v3983_v58  ;;  %v374_v58 = vld [vmem:[#allocation13 + $0x3] sm:$0x3] }
 0x1a6   :  { %871 = vmatprep.subr.bf16.mxu1 %v3988_v59 }
 0x1a9   :  { %872 = vmatpush1.bf16.msra.mxu1 %v3986_v60 }
 0x1aa   :  { %873 = vmatprep.subr.bf16.mxu1 %v3991_v61 }
 0x1ad   :  { %874 = vmatpush1.bf16.msra.mxu1 %v3989_v62  ;;  %v448_v62 = vrot.slane %v374_v58, %v4433_v56 }
 0x1ae   :  { %875 = vmatprep.subr.bf16.mxu1 %v3994_v63  ;;  %v452_v63 = vrot.slane %v374_v58, %v4436_v57  ;;  %v1109_v58 = vld [vmem:[#allocation10 + $0x58] sm:$0xff] }
 0x1b1   :  { %876 = vmatpush1.bf16.msra.mxu1 %v3992_v0 }
 0x1b2   :  { %877 = vmatprep.subr.bf16.mxu1 %v3997_v1 }
 0x1b5   :  { %878 = vmatpush1.bf16.msra.mxu1 %v3995_v2 }
 0x1b6   :  { %879 = vmatprep.subr.bf16.mxu1 %v4000_v4 }
 0x1b9   :  { %880 = vmatpush1.bf16.msra.mxu1 %v3998_v3 }
 0x1ba   :  { %890 = vmatprep.subr.bf16.mxu1 %v4003_v5 }
 0x24f   :  { %v366_v6 = vpop.f32.mrb[0].mxu1 }
 0x250   :  { %v375_v7 = vrot.slane %v366_v6, 4  ;;  %v368_v8 = vpop.f32.mrb[1].mxu1 }
 0x251   :  { %v381_v9 = vrot.slane %v368_v8, 4  ;;  %v370_v10 = vpop.f32.mrb[2].mxu1 }
 0x252   :  { %v376_v11 = vadd.f32 %v375_v7, %v366_v6  ;;  %v371_v12 = vpop.f32.mrb[3].mxu1 }
 0x253   :  { %v382_v13 = vadd.f32 %v381_v9, %v368_v8  ;;  %v4001_v9 = vld [vmem:[#allocation8 + $0x8] ss:$16 sps:$4 sm:$0xff]  }
 0x254   :  { %v377_v14 = vrot.slane %v376_v11, 2  ;;  %v4004_v12 = vld [vmem:[#allocation8 + $0x28] ss:$16 sps:$4 sm:$0xff]  }
 0x255   :  { %v383_v15 = vrot.slane %v382_v13, 2 }
 0x256   :  { %v378_v16 = vadd.f32 %v377_v14, %v376_v11  ;;  %v4006_v11 = vld [vmem:[#allocation8 + $0x2c] ss:$16 sps:$4 sm:$0xff]   ;;  %v4007_v14 = vld [vmem:[#allocation8 + $0x48] ss:$16 sps:$4 sm:$0xff]  }
 0x257   :  { %v384_v17 = vadd.f32 %v383_v15, %v382_v13  ;;  %v4009_v13 = vld [vmem:[#allocation8 + $0x4c] ss:$16 sps:$4 sm:$0xff]  }
 0x258   :  { %v379_v18 = vrot.slane %v378_v16, 1  ;;  %v4012_v15 = vld [vmem:[#allocation8 + $0x6c] ss:$16 sps:$4 sm:$0xff]  }
 0x259   :  { %v385_v19 = vrot.slane %v384_v17, 1 }
 0x25a   :  { %v380_v20 = vadd.f32 %v379_v18, %v378_v16  ;;  %v4010_v16 = vld [vmem:[#allocation8 + $0x68] ss:$16 sps:$4 sm:$0xff]  }
 0x25b   :  { %v386_v21 = vadd.f32 %v385_v19, %v384_v17  ;;  %v4015_v17 = vld [vmem:[#allocation8 + $0x8c] ss:$16 sps:$4 sm:$0xff]   ;;  %v4013_v18 = vld [vmem:[#allocation8 + $0x88] ss:$16 sps:$4 sm:$0xff]  }
 0x25c   :  { %v388_v22 = vmul.f32 0.125, %v380_v20  ;;  %v4018_v19 = vld [vmem:[#allocation8 + $0xac] ss:$16 sps:$4 sm:$0xff]   ;;  %v4016_v20 = vld [vmem:[#allocation8 + $0xa8] ss:$16 sps:$4 sm:$0xff]  }
 0x25d   :  { %v389_v23 = vmul.f32 0.125, %v386_v21  ;;  %v4021_v21 = vld [vmem:[#allocation8 + $0xcc] ss:$16 sps:$4 sm:$0xff]  }
 0x25e   :  { %v390_v24 = vsub.f32 %v366_v6, %v388_v22  ;;  %v4019_v22 = vld [vmem:[#allocation8 + $0xc8] ss:$16 sps:$4 sm:$0xff]  }
 0x25f   :  { %v391_v25 = vsub.f32 %v368_v8, %v389_v23  ;;  %v4024_v23 = vld [vmem:[#allocation8 + $0xec] ss:$16 sps:$4 sm:$0xff]  }
 0x260   :  { %v392_v26 = vmul.f32 %v390_v24, %v390_v24 }
 0x261   :  { %v393_v27 = vmul.f32 %v391_v25, %v391_v25 }
 0x262   :  { %v394_v28 = vrot.slane %v392_v26, 4 }
 0x263   :  { %v400_v29 = vrot.slane %v393_v27, 4 }
 0x264   :  { %v395_v30 = vadd.f32 %v394_v28, %v392_v26  ;;  %v4025_v26 = vld [vmem:[#allocation8 + $0x108] ss:$16 sps:$4 sm:$0xff]  }
 0x265   :  { %v401_v31 = vadd.f32 %v400_v29, %v393_v27  ;;  %v4030_v27 = vld [vmem:[#allocation8 + $0x12c] ss:$16 sps:$4 sm:$0xff]   ;;  %v4028_v28 = vld [vmem:[#allocation8 + $0x128] ss:$16 sps:$4 sm:$0xff]  }
 0x266   :  { %v396_v32 = vrot.slane %v395_v30, 2  ;;  %v4033_v29 = vld [vmem:[#allocation8 + $0x14c] ss:$16 sps:$4 sm:$0xff]  }
 0x267   :  { %v402_v33 = vrot.slane %v401_v31, 2 }
 0x268   :  { %v397_v34 = vadd.f32 %v396_v32, %v395_v30  ;;  %v4031_v30 = vld [vmem:[#allocation8 + $0x148] ss:$16 sps:$4 sm:$0xff]  }
 0x269   :  { %v403_v35 = vadd.f32 %v402_v33, %v401_v31  ;;  %v4036_v31 = vld [vmem:[#allocation8 + $0x16c] ss:$16 sps:$4 sm:$0xff]   ;;  %v4034_v32 = vld [vmem:[#allocation8 + $0x168] ss:$16 sps:$4 sm:$0xff]  }
 0x26a   :  { %v398_v36 = vrot.slane %v397_v34, 1  ;;  %v4039_v33 = vld [vmem:[#allocation8 + $0x18c] ss:$16 sps:$4 sm:$0xff]  }
 0x26b   :  { %v404_v37 = vrot.slane %v403_v35, 1 }
 0x26c   :  { %v399_v38 = vadd.f32 %v398_v36, %v397_v34  ;;  %v4037_v34 = vld [vmem:[#allocation8 + $0x188] ss:$16 sps:$4 sm:$0xff]  }
 0x26d   :  { %v405_v39 = vadd.f32 %v404_v37, %v403_v35  ;;  %v4042_v35 = vld [vmem:[#allocation8 + $0x1ac] ss:$16 sps:$4 sm:$0xff]   ;;  %v4040_v36 = vld [vmem:[#allocation8 + $0x1a8] ss:$16 sps:$4 sm:$0xff]  }
 0x26e   :  { %v406_v40 = vmul.f32 0.125, %v399_v38  ;;  %v4045_v37 = vld [vmem:[#allocation8 + $0x1cc] ss:$16 sps:$4 sm:$0xff]   ;;  %v4043_v38 = vld [vmem:[#allocation8 + $0x1c8] ss:$16 sps:$4 sm:$0xff]  }
 0x26f   :  { %v407_v41 = vmul.f32 0.125, %v405_v39  ;;  %v4048_v39 = vld [vmem:[#allocation8 + $0x1ec] ss:$16 sps:$4 sm:$0xff]  }
 0x270   :  { %v408_v42 = vadd.f32 0.8, %v406_v40  ;;  %v4046_v40 = vld [vmem:[#allocation8 + $0x1e8] ss:$16 sps:$4 sm:$0xff]  }
 0x271   :  { %v409_v43 = vadd.f32 0.8, %v407_v41  ;;  %v1099_v41 = vld [vmem:[#allocation10 + $0x8] sm:$0xff] }
 0x272   :  { %4049 = vrsqrt.f32 %v408_v42  ;;  %v1101_v42 = vld [vmem:[#allocation10 + $0x18] sm:$0xff] }
 0x273   :  { %4051 = vrsqrt.f32 %v409_v43  ;;  %v1227_v43 = vunpack.c.l.s8.bf16 %v1099_v41  ;;  %v1229_v44 = vunpack.c.l.s8.bf16 %v1101_v42 }
 0x275   :  { %1486 = vmatprep.subr.bf16.mxu0 %v1227_v43 }
 0x276   :  { %1487 = vmatpush1.bf16.msra.mxu0 %v1226_v47 }
 0x27c   :  { %v4050_v49 = vpop.eup %4049 }
 0x27d   :  { %v4052_v51 = vpop.eup %4051 }
 0x27e   :  { %v414_v52 = vcombine.low %v4050_v49, %v4052_v51  ;;  %v1228_v49 = vunpack.c.l.s8.bf16 %v1100_v46  ;;  %v1235_v51 = vunpack.c.h.s8.bf16 %v1099_v41  ;;  %v1139_v41 = vld [vmem:[#allocation10 + $0x148] sm:$0xff] }
 0x27f   :  { %v1307_v43 = vunpack.c.l.s8.bf16 %v1139_v41 }
 0x280   :  { %v421_v53 = vrot.slane %v414_v52, %v4428_v50  ;;  %v1237_v52 = vunpack.c.h.s8.bf16 %v1101_v42  ;;  %1488 = vmatprep.subr.bf16.mxu0 %v1235_v51  ;;  %v1141_v42 = vld [vmem:[#allocation10 + $0x158] sm:$0xff]  ;;  %v1315_v51 = vunpack.c.h.s8.bf16 %v1139_v41 }
 0x282   :  { %v428_v55 = vrot.slane %v421_v53, %v4428_v50  ;;  %v1234_v53 = vunpack.c.h.s8.bf16 %v1098_v45  ;;  %v1138_v45 = vld [vmem:[#allocation10 + $0x140] sm:$0xff] }
 0x283   :  { %v1306_v47 = vunpack.c.l.s8.bf16 %v1138_v45 }
 0x284   :  { %v430_v59 = vmul.f32 %v428_v55, %v373_v54  ;;  %v1236_v54 = vunpack.c.h.s8.bf16 %v1100_v46  ;;  %1489 = vmatpush1.bf16.msra.mxu0 %v1234_v53  ;;  %v1107_v55 = vld [vmem:[#allocation10 + $0x48] sm:$0xff]  ;;  %v1140_v46 = vld [vmem:[#allocation10 + $0x150] sm:$0xff]  ;;  %v1314_v53 = vunpack.c.h.s8.bf16 %v1138_v45 }
 0x286   :  { %v435_v60 = vrot.slane %v430_v59, %v4433_v56  ;;  %v439_v61 = vrot.slane %v430_v59, %v4436_v57  ;;  %v1243_v59 = vunpack.c.l.s8.bf16 %v1107_v55 }
 0x288   :  { %v442_v0 = vmul.f32 %v435_v60, %v390_v24  ;;  %v443_v1 = vmul.f32 %v439_v61, %v391_v25  ;;  %v4022_v24 = vld [vmem:[#allocation8 + $0xe8] ss:$16 sps:$4 sm:$0xff]   ;;  %v4027_v25 = vld [vmem:[#allocation8 + $0x10c] ss:$16 sps:$4 sm:$0xff]   ;;  %v1245_v60 = vunpack.c.l.s8.bf16 %v1109_v58  ;;  %v1106_v61 = vld [vmem:[#allocation10 + $0x40] sm:$0xff]  ;;  %1490 = vmatprep.subr.bf16.mxu0 %v1243_v59 }
 0x28a   :  { %v456_v2 = vadd.f32 %v452_v63, %v443_v1  ;;  %v455_v3 = vadd.f32 %v448_v62, %v442_v0  ;;  %v1108_v62 = vld [vmem:[#allocation10 + $0x50] sm:$0xff]  ;;  %v1242_v63 = vunpack.c.l.s8.bf16 %v1106_v61  ;;  %v1251_v1 = vunpack.c.h.s8.bf16 %v1107_v55  ;;  %v1147_v55 = vld [vmem:[#allocation10 + $0x188] sm:$0xff] }
 0x28b   :  { %v1244_v0 = vunpack.c.l.s8.bf16 %v1108_v62  ;;  %v1323_v59 = vunpack.c.l.s8.bf16 %v1147_v55 }
 0x28c   :  { %vm458_vm2 = vcmp.gt.f32.partialorder %v456_v2, 0.0  ;;  %v460_v4 = vmul.f32 0.2, %v456_v2  ;;  %vm457_vm3 = vcmp.gt.f32.partialorder %v455_v3, 0.0  ;;  %v459_v5 = vmul.f32 0.2, %v455_v3  ;;  %1491 = vmatpush1.bf16.msra.mxu0 %v1242_v63 }
 0x28d   :  { %1492 = vmatprep.subr.bf16.mxu0 %v1251_v1  ;;  %v1331_v1 = vunpack.c.h.s8.bf16 %v1147_v55 }
 0x28e   :  { %v462_v6 = vsel %vm458_vm2, %v456_v2, %v460_v4  ;;  %v461_v7 = vsel %vm457_vm3, %v455_v3, %v459_v5  ;;  %v1253_v2 = vunpack.c.h.s8.bf16 %v1109_v58  ;;  %v1250_v3 = vunpack.c.h.s8.bf16 %v1106_v61  ;;  %v1115_v5 = vld [vmem:[#allocation10 + $0x88] sm:$0xff]  ;;  %v1149_v58 = vld [vmem:[#allocation10 + $0x198] sm:$0xff]  ;;  %v1146_v61 = vld [vmem:[#allocation10 + $0x180] sm:$0xff] }
 0x28f   :  { %v464_v8 = vpack.c.bf16 %v462_v6, %v462_v6  ;;  %v4442_v10 = vpack.c.bf16 %v461_v7, %v461_v7  ;;  %v1252_v4 = vunpack.c.h.s8.bf16 %v1108_v62  ;;  %v1117_v6 = vld [vmem:[#allocation10 + $0x98] sm:$0xff]  ;;  %v1259_v7 = vunpack.c.l.s8.bf16 %v1115_v5  ;;  %v1148_v62 = vld [vmem:[#allocation10 + $0x190] sm:$0xff] }
 0x290   :  { %1493 = vmatpush1.bf16.msra.mxu0 %v1250_v3  ;;  %v1322_v63 = vunpack.c.l.s8.bf16 %v1146_v61  ;;  %v1330_v3 = vunpack.c.h.s8.bf16 %v1146_v61 }
 0x291   :  { %881 = vmatprep.mubr.bf16.mxu1 %v464_v8  ;;  %1494 = vmatprep.subr.bf16.mxu0 %v1259_v7 }
 0x292   :  { %882 = vmatmul.mubr.bf16.vlgmr.msra.gmra.mrb[4].mxu1 %v4442_v10 }
 0x293   :  { %891 = vmatpush1.bf16.msra.mxu1 %v4001_v9  ;;  %922 = vmatprep.mubr.bf16.mxu1 %v464_v8  ;;  %v1261_v8 = vunpack.c.l.s8.bf16 %v1117_v6  ;;  %v1114_v9 = vld [vmem:[#allocation10 + $0x80] sm:$0xff] }
 0x294   :  { %892 = vmatprep.subr.bf16.mxu1 %v4006_v11  ;;  %v1258_v11 = vunpack.c.l.s8.bf16 %v1114_v9 }
 0x296   :  { %1495 = vmatpush1.bf16.msra.mxu0 %v1258_v11 }
 0x297   :  { %893 = vmatpush1.bf16.msra.mxu1 %v4004_v12 }
 0x298   :  { %894 = vmatprep.subr.bf16.mxu1 %v4009_v13  ;;  %v1267_v13 = vunpack.c.h.s8.bf16 %v1115_v5  ;;  %v1155_v5 = vld [vmem:[#allocation10 + $0x1c8] sm:$0xff] }
 0x299   :  { %v1339_v7 = vunpack.c.l.s8.bf16 %v1155_v5 }
 0x29a   :  { %1496 = vmatprep.subr.bf16.mxu0 %v1267_v13  ;;  %v1347_v13 = vunpack.c.h.s8.bf16 %v1155_v5 }
 0x29b   :  { %895 = vmatpush1.bf16.msra.mxu1 %v4007_v14  ;;  %v1269_v14 = vunpack.c.h.s8.bf16 %v1117_v6  ;;  %v1157_v6 = vld [vmem:[#allocation10 + $0x1d8] sm:$0xff] }
 0x29c   :  { %896 = vmatprep.subr.bf16.mxu1 %v4012_v15  ;;  %v1266_v15 = vunpack.c.h.s8.bf16 %v1114_v9  ;;  %v1154_v9 = vld [vmem:[#allocation10 + $0x1c0] sm:$0xff] }
 0x29d   :  { %v1338_v11 = vunpack.c.l.s8.bf16 %v1154_v9 }
 0x29e   :  { %1497 = vmatpush1.bf16.msra.mxu0 %v1266_v15  ;;  %v1346_v15 = vunpack.c.h.s8.bf16 %v1154_v9 }
 0x29f   :  { %897 = vmatpush1.bf16.msra.mxu1 %v4010_v16 }
 0x2a0   :  { %898 = vmatprep.subr.bf16.mxu1 %v4015_v17  ;;  %v1123_v17 = vld [vmem:[#allocation10 + $0xc8] sm:$0xff] }
 0x2a3   :  { %899 = vmatpush1.bf16.msra.mxu1 %v4013_v18  ;;  %v1125_v18 = vld [vmem:[#allocation10 + $0xd8] sm:$0xff] }
 0x2a4   :  { %900 = vmatprep.subr.bf16.mxu1 %v4018_v19  ;;  %v1275_v19 = vunpack.c.l.s8.bf16 %v1123_v17 }
 0x2a6   :  { %1498 = vmatprep.subr.bf16.mxu0 %v1275_v19 }
 0x2a7   :  { %901 = vmatpush1.bf16.msra.mxu1 %v4016_v20  ;;  %v1277_v20 = vunpack.c.l.s8.bf16 %v1125_v18 }
 0x2a8   :  { %902 = vmatprep.subr.bf16.mxu1 %v4021_v21  ;;  %v1122_v21 = vld [vmem:[#allocation10 + $0xc0] sm:$0xff] }
 0x2ab   :  { %903 = vmatpush1.bf16.msra.mxu1 %v4019_v22  ;;  %v1124_v22 = vld [vmem:[#allocation10 + $0xd0] sm:$0xff] }
 0x2ac   :  { %904 = vmatprep.subr.bf16.mxu1 %v4024_v23  ;;  %v1274_v23 = vunpack.c.l.s8.bf16 %v1122_v21 }
 0x2ae   :  { %1499 = vmatpush1.bf16.msra.mxu0 %v1274_v23 }
 0x2af   :  { %905 = vmatpush1.bf16.msra.mxu1 %v4022_v24  ;;  %v1276_v24 = vunpack.c.l.s8.bf16 %v1124_v22 }
 0x2b0   :  { %906 = vmatprep.subr.bf16.mxu1 %v4027_v25  ;;  %v1283_v25 = vunpack.c.h.s8.bf16 %v1123_v17 }
 0x2b2   :  { %1500 = vmatprep.subr.bf16.mxu0 %v1283_v25 }
 0x2b3   :  { %907 = vmatpush1.bf16.msra.mxu1 %v4025_v26  ;;  %v1285_v26 = vunpack.c.h.s8.bf16 %v1125_v18 }
 0x2b4   :  { %908 = vmatprep.subr.bf16.mxu1 %v4030_v27  ;;  %v1282_v27 = vunpack.c.h.s8.bf16 %v1122_v21  ;;  %v4448_v21 = vld [vmem:[#allocation10 + $0x218] sm:$0xff] }
 0x2b5   :  { %v1357_v25 = vunpack.c.l.s8.bf16 %v4448_v21 }
 0x2b6   :  { %1501 = vmatpush1.bf16.msra.mxu0 %v1282_v27 }
 0x2b7   :  { %909 = vmatpush1.bf16.msra.mxu1 %v4028_v28  ;;  %v1284_v28 = vunpack.c.h.s8.bf16 %v1124_v22 }
 0x2b8   :  { %910 = vmatprep.subr.bf16.mxu1 %v4033_v29  ;;  %v1131_v29 = vld [vmem:[#allocation10 + $0x108] sm:$0xff] }
 0x2bb   :  { %911 = vmatpush1.bf16.msra.mxu1 %v4031_v30  ;;  %v1133_v30 = vld [vmem:[#allocation10 + $0x118] sm:$0xff] }
 0x2bc   :  { %912 = vmatprep.subr.bf16.mxu1 %v4036_v31  ;;  %v1291_v31 = vunpack.c.l.s8.bf16 %v1131_v29 }
 0x2be   :  { %1502 = vmatprep.subr.bf16.mxu0 %v1291_v31 }
 0x2bf   :  { %913 = vmatpush1.bf16.msra.mxu1 %v4034_v32  ;;  %v1293_v32 = vunpack.c.l.s8.bf16 %v1133_v30 }
 0x2c0   :  { %914 = vmatprep.subr.bf16.mxu1 %v4039_v33  ;;  %v1130_v33 = vld [vmem:[#allocation10 + $0x100] sm:$0xff] }
 0x2c3   :  { %915 = vmatpush1.bf16.msra.mxu1 %v4037_v34  ;;  %v1132_v34 = vld [vmem:[#allocation10 + $0x110] sm:$0xff] }
 0x2c4   :  { %916 = vmatprep.subr.bf16.mxu1 %v4042_v35  ;;  %v1290_v35 = vunpack.c.l.s8.bf16 %v1130_v33 }
 0x2c6   :  { %1503 = vmatpush1.bf16.msra.mxu0 %v1290_v35 }
 0x2c7   :  { %917 = vmatpush1.bf16.msra.mxu1 %v4040_v36  ;;  %v1292_v36 = vunpack.c.l.s8.bf16 %v1132_v34 }
 0x2c8   :  { %918 = vmatprep.subr.bf16.mxu1 %v4045_v37  ;;  %v1299_v37 = vunpack.c.h.s8.bf16 %v1131_v29 }
 0x2ca   :  { %1504 = vmatprep.subr.bf16.mxu0 %v1299_v37 }
 0x2cb   :  { %919 = vmatpush1.bf16.msra.mxu1 %v4043_v38  ;;  %v1301_v38 = vunpack.c.h.s8.bf16 %v1133_v30 }
 0x2cc   :  { %920 = vmatprep.subr.bf16.mxu1 %v4048_v39  ;;  %v1298_v39 = vunpack.c.h.s8.bf16 %v1130_v33 }
 0x2ce   :  { %1505 = vmatpush1.bf16.msra.mxu0 %v1298_v39 }
 0x2cf   :  { %921 = vmatpush1.bf16.msra.mxu1 %v4046_v40  ;;  %v1300_v40 = vunpack.c.h.s8.bf16 %v1132_v34  ;;  %1506 = vmatprep.subr.bf16.mxu0 %v1307_v43 }
 0x2d0   :  { %1568 = vmatprep.subr.bf16.mxu1 %v1229_v44  ;;  %v1309_v44 = vunpack.c.l.s8.bf16 %v1141_v42 }
 0x2d2   :  { %923 = vmatmul.mubr.bf16.vlgmr.msra.gmra.mrb[8].mxu1 %v4442_v10  ;;  %v1116_v10 = vld [vmem:[#allocation10 + $0x90] sm:$0xff]  ;;  %1507 = vmatpush1.bf16.msra.mxu0 %v1306_v47 }
 0x2d3   :  { %1569 = vmatpush1.bf16.msra.mxu1 %v1228_v49  ;;  %v1260_v12 = vunpack.c.l.s8.bf16 %v1116_v10  ;;  %v1268_v16 = vunpack.c.h.s8.bf16 %v1116_v10  ;;  %v1308_v49 = vunpack.c.l.s8.bf16 %v1140_v46  ;;  %1508 = vmatprep.subr.bf16.mxu0 %v1315_v51  ;;  %v1156_v10 = vld [vmem:[#allocation10 + $0x1d0] sm:$0xff] }
 0x2d4   :  { %1570 = vmatprep.subr.bf16.mxu1 %v1237_v52  ;;  %v1317_v52 = vunpack.c.h.s8.bf16 %v1141_v42 }
 0x2d6   :  { %1509 = vmatpush1.bf16.msra.mxu0 %v1314_v53 }
 0x2d7   :  { %1571 = vmatpush1.bf16.msra.mxu1 %v1236_v54  ;;  %v1316_v54 = vunpack.c.h.s8.bf16 %v1140_v46  ;;  %1510 = vmatprep.subr.bf16.mxu0 %v1323_v59 }
 0x2d8   :  { %1572 = vmatprep.subr.bf16.mxu1 %v1245_v60  ;;  %v1325_v60 = vunpack.c.l.s8.bf16 %v1149_v58 }
 0x2da   :  { %1511 = vmatpush1.bf16.msra.mxu0 %v1322_v63 }
 0x2db   :  { %1573 = vmatpush1.bf16.msra.mxu1 %v1244_v0  ;;  %v1324_v0 = vunpack.c.l.s8.bf16 %v1148_v62  ;;  %1512 = vmatprep.subr.bf16.mxu0 %v1331_v1 }
 0x2dc   :  { %1574 = vmatprep.subr.bf16.mxu1 %v1253_v2  ;;  %v1333_v2 = vunpack.c.h.s8.bf16 %v1149_v58 }
 0x2de   :  { %1513 = vmatpush1.bf16.msra.mxu0 %v1330_v3 }
 0x2df   :  { %1575 = vmatpush1.bf16.msra.mxu1 %v1252_v4  ;;  %v1332_v4 = vunpack.c.h.s8.bf16 %v1148_v62  ;;  %1514 = vmatprep.subr.bf16.mxu0 %v1339_v7 }
 0x2e0   :  { %1576 = vmatprep.subr.bf16.mxu1 %v1261_v8  ;;  %v1341_v8 = vunpack.c.l.s8.bf16 %v1157_v6 }
 0x2e2   :  { %1515 = vmatpush1.bf16.msra.mxu0 %v1338_v11 }
 0x2e3   :  { %1577 = vmatpush1.bf16.msra.mxu1 %v1260_v12  ;;  %v1340_v12 = vunpack.c.l.s8.bf16 %v1156_v10  ;;  %1516 = vmatprep.subr.bf16.mxu0 %v1347_v13 }
 0x2e4   :  { %1578 = vmatprep.subr.bf16.mxu1 %v1269_v14  ;;  %v1349_v14 = vunpack.c.h.s8.bf16 %v1157_v6 }
 0x2e6   :  { %1517 = vmatpush1.bf16.msra.mxu0 %v1346_v15 }
 0x2e7   :  { %1579 = vmatpush1.bf16.msra.mxu1 %v1268_v16  ;;  %v1348_v16 = vunpack.c.h.s8.bf16 %v1156_v10 }
 0x2e8   :  { %1580 = vmatprep.subr.bf16.mxu1 %v1277_v20  ;;  %v4446_v20 = vld [vmem:[#allocation10 + $0x208] sm:$0xff] }
 0x2eb   :  { %1581 = vmatpush1.bf16.msra.mxu1 %v1276_v24  ;;  %v1355_v24 = vunpack.c.l.s8.bf16 %v4446_v20 }
 0x2ec   :  { %1582 = vmatprep.subr.bf16.mxu1 %v1285_v26 }
 0x2ed   :  { %1527 = vmatprep.subr.bf16.mxu0 %v1355_v24 }
 0x2ef   :  { %1583 = vmatpush1.bf16.msra.mxu1 %v1284_v28 }
 0x2f0   :  { %1584 = vmatprep.subr.bf16.mxu1 %v1293_v32 }
 0x2f3   :  { %1585 = vmatpush1.bf16.msra.mxu1 %v1292_v36 }
 0x2f4   :  { %1586 = vmatprep.subr.bf16.mxu1 %v1301_v38 }
 0x2f7   :  { %1587 = vmatpush1.bf16.msra.mxu1 %v1300_v40 }
 0x2f8   :  { %1588 = vmatprep.subr.bf16.mxu1 %v1309_v44 }
 0x2fb   :  { %1589 = vmatpush1.bf16.msra.mxu1 %v1308_v49 }
 0x2fc   :  { %1590 = vmatprep.subr.bf16.mxu1 %v1317_v52 }
 0x2ff   :  { %1591 = vmatpush1.bf16.msra.mxu1 %v1316_v54 }
 0x300   :  { %1592 = vmatprep.subr.bf16.mxu1 %v1325_v60 }
 0x303   :  { %1593 = vmatpush1.bf16.msra.mxu1 %v1324_v0 }
 0x304   :  { %1594 = vmatprep.subr.bf16.mxu1 %v1333_v2 }
 0x307   :  { %1595 = vmatpush1.bf16.msra.mxu1 %v1332_v4 }
 0x308   :  { %1596 = vmatprep.subr.bf16.mxu1 %v1341_v8 }
 0x30b   :  { %1597 = vmatpush1.bf16.msra.mxu1 %v1340_v12 }
 0x30c   :  { %1598 = vmatprep.subr.bf16.mxu1 %v1349_v14 }
 0x30f   :  { %1599 = vmatpush1.bf16.msra.mxu1 %v1348_v16 }
 0x310   :  { %1609 = vmatprep.subr.bf16.mxu1 %v1357_v25 }
 0x365   :  { %v883_v17 = vpop.f32.mrb[4].mxu1 }
 0x366   :  { %v933_v18 = vrot.slane %v883_v17, 4  ;;  %v885_v19 = vpop.f32.mrb[5].mxu1 }
 0x367   :  { %v939_v22 = vrot.slane %v885_v19, 4  ;;  %v887_v23 = vpop.f32.mrb[6].mxu1 }
 0x368   :  { %v934_v26 = vadd.f32 %v933_v18, %v883_v17  ;;  %v888_v27 = vpop.f32.mrb[7].mxu1 }
 0x369   :  { %v940_v28 = vadd.f32 %v939_v22, %v885_v19 }
 0x36a   :  { %v935_v29 = vrot.slane %v934_v26, 2 }
 0x36b   :  { %v941_v30 = vrot.slane %v940_v28, 2 }
 0x36c   :  { %v936_v31 = vadd.f32 %v935_v29, %v934_v26 }
 0x36d   :  { %v942_v32 = vadd.f32 %v941_v30, %v940_v28 }
 0x36e   :  { %v937_v33 = vrot.slane %v936_v31, 1 }
 0x36f   :  { %v943_v34 = vrot.slane %v942_v32, 1 }
 0x370   :  { %v938_v35 = vadd.f32 %v937_v33, %v936_v31 }
 0x371   :  { %v944_v36 = vadd.f32 %v943_v34, %v942_v32 }
 0x372   :  { %v957_v37 = vmul.f32 0.125, %v938_v35 }
 0x373   :  { %v958_v38 = vmul.f32 0.125, %v944_v36 }
 0x374   :  { %v4452_v39 = vsub.f32 %v883_v17, %v957_v37 }
 0x375   :  { %v4454_v40 = vsub.f32 %v885_v19, %v958_v38 }
 0x376   :  { %v965_v41 = vmul.f32 %v4452_v39, %v4452_v39 }
 0x377   :  { %v966_v42 = vmul.f32 %v4454_v40, %v4454_v40 }
 0x378   :  { %v969_v43 = vrot.slane %v965_v41, 4 }
 0x379   :  { %v975_v44 = vrot.slane %v966_v42, 4 }
 0x37a   :  { %v970_v45 = vadd.f32 %v969_v43, %v965_v41 }
 0x37b   :  { %v976_v46 = vadd.f32 %v975_v44, %v966_v42 }
 0x37c   :  { %v971_v47 = vrot.slane %v970_v45, 2 }
 0x37d   :  { %v977_v49 = vrot.slane %v976_v46, 2 }
 0x37e   :  { %v972_v51 = vadd.f32 %v971_v47, %v970_v45 }
 0x37f   :  { %v978_v52 = vadd.f32 %v977_v49, %v976_v46 }
 0x380   :  { %v973_v53 = vrot.slane %v972_v51, 1 }
 0x381   :  { %v979_v54 = vrot.slane %v978_v52, 1 }
 0x382   :  { %v974_v55 = vadd.f32 %v973_v53, %v972_v51  ;;  %v932_v53 = vld [vmem:[#allocation13 + $0x9] sm:$0xf] }
 0x383   :  { %v980_v58 = vadd.f32 %v979_v54, %v978_v52  ;;  %v931_v52 = vld [vmem:[#allocation13 + $0x5] sm:$0xf] }
 0x384   :  { %v993_v59 = vmul.f32 0.125, %v974_v55  ;;  %v4464_v55 = vsub.s32 3, %v4425_v48 }
 0x385   :  { %v994_v60 = vmul.f32 0.125, %v980_v58  ;;  %v4467_v58 = vsub.s32 2, %v4425_v48 }
 0x386   :  { %v997_v61 = vadd.f32 0.8, %v993_v59 }
 0x387   :  { %v998_v62 = vadd.f32 0.8, %v994_v60  ;;  %v1076_v60 = vrot.slane %v932_v53, %v4464_v55 }
 0x388   :  { %4053 = vrsqrt.f32 %v997_v61  ;;  %v1068_v61 = vrot.slane %v932_v53, %v4436_v57 }
 0x389   :  { %4055 = vrsqrt.f32 %v998_v62  ;;  %v1064_v62 = vrot.slane %v932_v53, %v4433_v56 }
 0x392   :  { %v4054_v63 = vpop.eup %4053 }
 0x393   :  { %v4056_v0 = vpop.eup %4055 }
 0x394   :  { %v1009_v1 = vcombine.low %v4054_v63, %v4056_v0  ;;  %v1072_v63 = vrot.slane %v932_v53, %v4467_v58  ;;  %v1187_v53 = vld [vmem:[#allocation10 + $0x2c8] sm:$0xff] }
 0x396   :  { %v1017_v47 = vrot.slane %v1009_v1, %v4428_v50 }
 0x3a5   :  { %v924_v2 = vpop.f32.mrb[8].mxu1 }
 0x3a6   :  { %v945_v3 = vrot.slane %v924_v2, 4  ;;  %v926_v4 = vpop.f32.mrb[9].mxu1 }
 0x3a7   :  { %v951_v5 = vrot.slane %v926_v4, 4  ;;  %v928_v6 = vpop.f32.mrb[10].mxu1 }
 0x3a8   :  { %v946_v7 = vadd.f32 %v945_v3, %v924_v2  ;;  %v929_v8 = vpop.f32.mrb[11].mxu1 }
 0x3a9   :  { %v952_v9 = vadd.f32 %v951_v5, %v926_v4 }
 0x3aa   :  { %v947_v10 = vrot.slane %v946_v7, 2 }
 0x3ab   :  { %v953_v11 = vrot.slane %v952_v9, 2 }
 0x3ac   :  { %v948_v12 = vadd.f32 %v947_v10, %v946_v7 }
 0x3ad   :  { %v954_v13 = vadd.f32 %v953_v11, %v952_v9 }
 0x3ae   :  { %v949_v14 = vrot.slane %v948_v12, 1 }
 0x3af   :  { %v955_v15 = vrot.slane %v954_v13, 1 }
 0x3b0   :  { %v950_v16 = vadd.f32 %v949_v14, %v948_v12  ;;  %v1162_v12 = vld [vmem:[#allocation10 + $0x200] sm:$0xff] }
 0x3b1   :  { %v956_v17 = vadd.f32 %v955_v15, %v954_v13  ;;  %v1164_v13 = vld [vmem:[#allocation10 + $0x210] sm:$0xff] }
 0x3b2   :  { %v959_v18 = vmul.f32 0.125, %v950_v16 }
 0x3b3   :  { %v960_v19 = vmul.f32 0.125, %v956_v17 }
 0x3b4   :  { %v963_v22 = vsub.f32 %v924_v2, %v959_v18  ;;  %v1354_v18 = vunpack.c.l.s8.bf16 %v1162_v12 }
 0x3b5   :  { %v964_v23 = vsub.f32 %v926_v4, %v960_v19 }
 0x3b6   :  { %v967_v24 = vmul.f32 %v963_v22, %v963_v22 }
 0x3b7   :  { %v968_v25 = vmul.f32 %v964_v23, %v964_v23 }
 0x3b8   :  { %v981_v26 = vrot.slane %v967_v24, 4 }
 0x3b9   :  { %v987_v27 = vrot.slane %v968_v25, 4 }
 0x3ba   :  { %v982_v28 = vadd.f32 %v981_v26, %v967_v24  ;;  %v1363_v24 = vunpack.c.h.s8.bf16 %v4446_v20  ;;  %v1171_v26 = vld [vmem:[#allocation10 + $0x248] sm:$0xff] }
 0x3bb   :  { %v988_v29 = vadd.f32 %v987_v27, %v968_v25  ;;  %v1365_v25 = vunpack.c.h.s8.bf16 %v4448_v21  ;;  %v1173_v27 = vld [vmem:[#allocation10 + $0x258] sm:$0xff]  ;;  %v1172_v21 = vld [vmem:[#allocation10 + $0x250] sm:$0xff] }
 0x3bc   :  { %v983_v30 = vrot.slane %v982_v28, 2  ;;  %v1373_v20 = vunpack.c.l.s8.bf16 %v1173_v27 }
 0x3bd   :  { %v989_v31 = vrot.slane %v988_v29, 2 }
 0x3be   :  { %v984_v32 = vadd.f32 %v983_v30, %v982_v28  ;;  %v1364_v30 = vunpack.c.h.s8.bf16 %v1164_v13 }
 0x3bf   :  { %v990_v33 = vadd.f32 %v989_v31, %v988_v29  ;;  %v1362_v29 = vunpack.c.h.s8.bf16 %v1162_v12  ;;  %v1371_v31 = vunpack.c.l.s8.bf16 %v1171_v26  ;;  %v1194_v12 = vld [vmem:[#allocation10 + $0x300] sm:$0xff] }
 0x3c0   :  { %v985_v34 = vrot.slane %v984_v32, 1 }
 0x3c1   :  { %v991_v35 = vrot.slane %v990_v33, 1 }
 0x3c2   :  { %v986_v36 = vadd.f32 %v985_v34, %v984_v32  ;;  %v1170_v32 = vld [vmem:[#allocation10 + $0x240] sm:$0xff]  ;;  %v1372_v34 = vunpack.c.l.s8.bf16 %v1172_v21 }
 0x3c3   :  { %v992_v37 = vadd.f32 %v991_v35, %v990_v33  ;;  %v1370_v33 = vunpack.c.l.s8.bf16 %v1170_v32  ;;  %v1379_v35 = vunpack.c.h.s8.bf16 %v1171_v26  ;;  %v1202_v26 = vld [vmem:[#allocation10 + $0x340] sm:$0xff] }
 0x3c4   :  { %v995_v38 = vmul.f32 0.125, %v986_v36  ;;  %v1381_v36 = vunpack.c.h.s8.bf16 %v1173_v27  ;;  %v1204_v27 = vld [vmem:[#allocation10 + $0x350] sm:$0xff] }
 0x3c5   :  { %v996_v41 = vmul.f32 0.125, %v992_v37  ;;  %v1179_v37 = vld [vmem:[#allocation10 + $0x288] sm:$0xff] }
 0x3c6   :  { %v999_v42 = vadd.f32 0.8, %v995_v38  ;;  %v1181_v38 = vld [vmem:[#allocation10 + $0x298] sm:$0xff] }
 0x3c7   :  { %v1000_v43 = vadd.f32 0.8, %v996_v41  ;;  %v1378_v41 = vunpack.c.h.s8.bf16 %v1170_v32  ;;  %v1211_v32 = vld [vmem:[#allocation10 + $0x388] sm:$0xff] }
 0x3c8   :  { %4057 = vrsqrt.f32 %v999_v42  ;;  %v1380_v42 = vunpack.c.h.s8.bf16 %v1172_v21  ;;  %v1213_v21 = vld [vmem:[#allocation10 + $0x398] sm:$0xff] }
 0x3c9   :  { %4059 = vrsqrt.f32 %v1000_v43  ;;  %v1387_v43 = vunpack.c.l.s8.bf16 %v1179_v37 }
 0x3d2   :  { %v4058_v44 = vpop.eup %4057 }
 0x3d3   :  { %v4060_v45 = vpop.eup %4059 }
 0x3d4   :  { %v1010_v46 = vcombine.low %v4058_v44, %v4060_v45  ;;  %v1389_v44 = vunpack.c.l.s8.bf16 %v1181_v38  ;;  %v1178_v45 = vld [vmem:[#allocation10 + $0x280] sm:$0xff] }
 0x3d6   :  { %v1024_v49 = vrot.slane %v1010_v46, %v4428_v50  ;;  %v1180_v46 = vld [vmem:[#allocation10 + $0x290] sm:$0xff] }
 0x3d8   :  { %v1025_v51 = vcombine.low %v1017_v47, %v1024_v49  ;;  %v1386_v47 = vunpack.c.l.s8.bf16 %v1178_v45  ;;  %v1388_v49 = vunpack.c.l.s8.bf16 %v1180_v46 }
 0x3da   :  { %v1032_v54 = vrot.slane %v1025_v51, %v4428_v50  ;;  %v1395_v51 = vunpack.c.h.s8.bf16 %v1179_v37  ;;  %v1210_v37 = vld [vmem:[#allocation10 + $0x380] sm:$0xff] }
 0x3dc   :  { %v1034_v59 = vmul.f32 %v1032_v54, %v931_v52  ;;  %v1397_v52 = vunpack.c.h.s8.bf16 %v1181_v38  ;;  %v1189_v54 = vld [vmem:[#allocation10 + $0x2d8] sm:$0xff]  ;;  %v1212_v38 = vld [vmem:[#allocation10 + $0x390] sm:$0xff] }
 0x3de   :  { %v1051_v0 = vrot.slane %v1034_v59, %v4464_v55  ;;  %v1043_v1 = vrot.slane %v1034_v59, %v4436_v57  ;;  %v1039_v2 = vrot.slane %v1034_v59, %v4433_v56  ;;  %v1047_v3 = vrot.slane %v1034_v59, %v4467_v58 }
 0x3df   :  { %v1394_v59 = vunpack.c.h.s8.bf16 %v1178_v45  ;;  %v1219_v45 = vld [vmem:[#allocation10 + $0x3c8] sm:$0xff] }
 0x3e0   :  { %v1059_v4 = vmul.f32 %v1051_v0, %v964_v23  ;;  %v1057_v5 = vmul.f32 %v1043_v1, %v4454_v40  ;;  %v1056_v6 = vmul.f32 %v1039_v2, %v4452_v39  ;;  %v1058_v7 = vmul.f32 %v1047_v3, %v963_v22  ;;  %v1188_v0 = vld [vmem:[#allocation10 + $0x2d0] sm:$0xff] }
 0x3e1   :  { %v1356_v39 = vunpack.c.l.s8.bf16 %v1164_v13  ;;  %v1404_v2 = vunpack.c.l.s8.bf16 %v1188_v0  ;;  %v1411_v3 = vunpack.c.h.s8.bf16 %v1187_v53  ;;  %v1196_v13 = vld [vmem:[#allocation10 + $0x310] sm:$0xff] }
 0x3e2   :  { %v1084_v8 = vadd.f32 %v1076_v60, %v1059_v4  ;;  %v1082_v9 = vadd.f32 %v1068_v61, %v1057_v5  ;;  %v1081_v10 = vadd.f32 %v1064_v62, %v1056_v6  ;;  %v4479_v11 = vadd.f32 %v1072_v63, %v1058_v7  ;;  %v1186_v63 = vld [vmem:[#allocation10 + $0x2c0] sm:$0xff]  ;;  %v1195_v5 = vld [vmem:[#allocation10 + $0x308] sm:$0xff]  ;;  %v1197_v6 = vld [vmem:[#allocation10 + $0x318] sm:$0xff] }
 0x3e3   :  { %v1396_v60 = vunpack.c.h.s8.bf16 %v1180_v46  ;;  %v1403_v61 = vunpack.c.l.s8.bf16 %v1187_v53  ;;  %v1405_v62 = vunpack.c.l.s8.bf16 %v1189_v54  ;;  %v1402_v1 = vunpack.c.l.s8.bf16 %v1186_v63  ;;  %v1221_v46 = vld [vmem:[#allocation10 + $0x3d8] sm:$0xff]  ;;  %v1218_v53 = vld [vmem:[#allocation10 + $0x3c0] sm:$0xff] }
 0x3e4   :  { %v1092_v14 = vmul.f32 0.2, %v1084_v8  ;;  %vm1086_vm4 = vcmp.gt.f32.partialorder %v1082_v9, 0.0  ;;  %v1090_v15 = vmul.f32 0.2, %v1082_v9  ;;  %vm1085_vm5 = vcmp.gt.f32.partialorder %v1081_v10, 0.0 }
 0x3e5   :  { %v1089_v16 = vmul.f32 0.2, %v1081_v10  ;;  %vm1088_vm6 = vcmp.gt.f32.partialorder %v1084_v8, 0.0  ;;  %v1413_v4 = vunpack.c.h.s8.bf16 %v1189_v54  ;;  %v1410_v7 = vunpack.c.h.s8.bf16 %v1186_v63  ;;  %v1220_v54 = vld [vmem:[#allocation10 + $0x3d0] sm:$0xff] }
 0x3e6   :  { %v1094_v17 = vsel %vm1086_vm4, %v1082_v9, %v1090_v15  ;;  %v1096_v22 = vsel %vm1088_vm6, %v1084_v8, %v1092_v14  ;;  %v1412_v8 = vunpack.c.h.s8.bf16 %v1188_v0  ;;  %v1419_v9 = vunpack.c.l.s8.bf16 %v1195_v5  ;;  %v1103_v0 = vld [vmem:[#allocation10 + $0x28] sm:$0xff] }
 0x3e7   :  { %v4481_v19 = vpack.c.bf16 %v1094_v17, %v1094_v17  ;;  %v1093_v40 = vsel %vm1085_vm5, %v1081_v10, %v1089_v16  ;;  %v4491_v28 = vpack.c.bf16 %v1096_v22, %v1096_v22  ;;  %v1421_v10 = vunpack.c.l.s8.bf16 %v1197_v6 }
 0x3e8   :  { %v4483_v23 = vpack.c.bf16 %v1093_v40, %v1093_v40  ;;  %v1418_v14 = vunpack.c.l.s8.bf16 %v1194_v12  ;;  %v1420_v15 = vunpack.c.l.s8.bf16 %v1196_v13  ;;  %v1427_v16 = vunpack.c.h.s8.bf16 %v1195_v5  ;;  %v1205_v40 = vld [vmem:[#allocation10 + $0x358] sm:$0xff] }
 0x3e9   :  { %1518 = vmatprep.mubr.bf16.mxu0 %v4481_v19  ;;  %1600 = vmatprep.mubr.bf16.mxu1 %v4481_v19  ;;  %v1429_v17 = vunpack.c.h.s8.bf16 %v1197_v6  ;;  %v1428_v22 = vunpack.c.h.s8.bf16 %v1196_v13  ;;  %v1091_v63 = vmul.f32 0.2, %v4479_v11  ;;  %vm1087_vm7 = vcmp.gt.f32.partialorder %v4479_v11, 0.0  ;;  %v1102_v6 = vld [vmem:[#allocation10 + $0x20] sm:$0xff] }
 0x3ea   :  { %1519 = vmatmul.mubr.bf16.vlgmr.msra.gmra.mrb[4].mxu0 %v4483_v23  ;;  %1601 = vmatmul.mubr.bf16.vlgmr.msra.gmra.mrb[12].mxu1 %v4483_v23  ;;  %v1239_v13 = vunpack.c.h.s8.bf16 %v1103_v0 }
 0x3eb   :  { %1528 = vmatpush1.bf16.msra.mxu0 %v1354_v18  ;;  %1610 = vmatpush1.bf16.msra.mxu1 %v1356_v39  ;;  %v1203_v18 = vld [vmem:[#allocation10 + $0x348] sm:$0xff]  ;;  %v1426_v39 = vunpack.c.h.s8.bf16 %v1194_v12 }
 0x3ec   :  { %1559 = vmatprep.mubr.bf16.mxu0 %v4491_v28  ;;  %1641 = vmatprep.mubr.bf16.mxu1 %v4491_v28 }
 0x3ed   :  { %1529 = vmatprep.subr.bf16.mxu0 %v1363_v24  ;;  %1611 = vmatprep.subr.bf16.mxu1 %v1365_v25  ;;  %v1435_v24 = vunpack.c.l.s8.bf16 %v1203_v18  ;;  %v1437_v25 = vunpack.c.l.s8.bf16 %v1205_v40 }
 0x3ef   :  { %1530 = vmatpush1.bf16.msra.mxu0 %v1362_v29  ;;  %1612 = vmatpush1.bf16.msra.mxu1 %v1364_v30  ;;  %v1434_v29 = vunpack.c.l.s8.bf16 %v1202_v26  ;;  %v1436_v30 = vunpack.c.l.s8.bf16 %v1204_v27 }
 0x3f0   :  { %1531 = vmatprep.subr.bf16.mxu0 %v1371_v31  ;;  %1613 = vmatprep.subr.bf16.mxu1 %v1373_v20  ;;  %v1443_v31 = vunpack.c.h.s8.bf16 %v1203_v18  ;;  %v1445_v20 = vunpack.c.h.s8.bf16 %v1205_v40  ;;  %v1110_v40 = vld [vmem:[#allocation10 + $0x60] sm:$0xff] }
 0x3f3   :  { %1532 = vmatpush1.bf16.msra.mxu0 %v1370_v33  ;;  %1614 = vmatpush1.bf16.msra.mxu1 %v1372_v34  ;;  %v1442_v33 = vunpack.c.h.s8.bf16 %v1202_v26  ;;  %v1444_v34 = vunpack.c.h.s8.bf16 %v1204_v27 }
 0x3f4   :  { %1533 = vmatprep.subr.bf16.mxu0 %v1379_v35  ;;  %1615 = vmatprep.subr.bf16.mxu1 %v1381_v36  ;;  %v1451_v35 = vunpack.c.l.s8.bf16 %v1211_v32  ;;  %v1453_v36 = vunpack.c.l.s8.bf16 %v1213_v21 }
 0x3f7   :  { %1534 = vmatpush1.bf16.msra.mxu0 %v1378_v41  ;;  %1616 = vmatpush1.bf16.msra.mxu1 %v1380_v42  ;;  %v1450_v41 = vunpack.c.l.s8.bf16 %v1210_v37  ;;  %v1452_v42 = vunpack.c.l.s8.bf16 %v1212_v38 }
 0x3f8   :  { %1535 = vmatprep.subr.bf16.mxu0 %v1387_v43  ;;  %1617 = vmatprep.subr.bf16.mxu1 %v1389_v44  ;;  %v1459_v43 = vunpack.c.h.s8.bf16 %v1211_v32  ;;  %v1461_v44 = vunpack.c.h.s8.bf16 %v1213_v21  ;;  %v1118_v32 = vld [vmem:[#allocation10 + $0xa0] sm:$0xff] }
 0x3fb   :  { %1536 = vmatpush1.bf16.msra.mxu0 %v1386_v47  ;;  %1618 = vmatpush1.bf16.msra.mxu1 %v1388_v49  ;;  %v1458_v47 = vunpack.c.h.s8.bf16 %v1210_v37  ;;  %v1460_v49 = vunpack.c.h.s8.bf16 %v1212_v38  ;;  %v1127_v38 = vld [vmem:[#allocation10 + $0xe8] sm:$0xff] }
 0x3fc   :  { %1537 = vmatprep.subr.bf16.mxu0 %v1395_v51  ;;  %1619 = vmatprep.subr.bf16.mxu1 %v1397_v52  ;;  %v1467_v51 = vunpack.c.l.s8.bf16 %v1219_v45  ;;  %v1469_v52 = vunpack.c.l.s8.bf16 %v1221_v46 }
 0x3ff   :  { %1538 = vmatpush1.bf16.msra.mxu0 %v1394_v59  ;;  %1620 = vmatpush1.bf16.msra.mxu1 %v1396_v60  ;;  %v1466_v59 = vunpack.c.l.s8.bf16 %v1218_v53  ;;  %v1468_v60 = vunpack.c.l.s8.bf16 %v1220_v54 }
 0x400   :  { %1539 = vmatprep.subr.bf16.mxu0 %v1403_v61  ;;  %1621 = vmatprep.subr.bf16.mxu1 %v1405_v62  ;;  %v1475_v61 = vunpack.c.h.s8.bf16 %v1219_v45  ;;  %v1477_v62 = vunpack.c.h.s8.bf16 %v1221_v46  ;;  %v1126_v45 = vld [vmem:[#allocation10 + $0xe0] sm:$0xff] }
 0x403   :  { %1540 = vmatpush1.bf16.msra.mxu0 %v1402_v1  ;;  %1622 = vmatpush1.bf16.msra.mxu1 %v1404_v2  ;;  %v1105_v1 = vld [vmem:[#allocation10 + $0x38] sm:$0xff]  ;;  %v1474_v2 = vunpack.c.h.s8.bf16 %v1218_v53 }
 0x404   :  { %1541 = vmatprep.subr.bf16.mxu0 %v1411_v3  ;;  %1623 = vmatprep.subr.bf16.mxu1 %v1413_v4  ;;  %v1476_v3 = vunpack.c.h.s8.bf16 %v1220_v54  ;;  %v1231_v4 = vunpack.c.l.s8.bf16 %v1103_v0  ;;  %v1233_v5 = vunpack.c.l.s8.bf16 %v1105_v1  ;;  %v1135_v54 = vld [vmem:[#allocation10 + $0x128] sm:$0xff] }
 0x407   :  { %1542 = vmatpush1.bf16.msra.mxu0 %v1410_v7  ;;  %1624 = vmatpush1.bf16.msra.mxu1 %v1412_v8  ;;  %v1095_v7 = vsel %vm1087_vm7, %v4479_v11, %v1091_v63  ;;  %v1104_v8 = vld [vmem:[#allocation10 + $0x30] sm:$0xff]  ;;  %v1238_v11 = vunpack.c.h.s8.bf16 %v1102_v6  ;;  %v1134_v63 = vld [vmem:[#allocation10 + $0x120] sm:$0xff] }
 0x408   :  { %1543 = vmatprep.subr.bf16.mxu0 %v1419_v9  ;;  %1625 = vmatprep.subr.bf16.mxu1 %v1421_v10  ;;  %v1230_v9 = vunpack.c.l.s8.bf16 %v1102_v6  ;;  %v4498_v10 = vpack.c.bf16 %v1095_v7, %v1095_v7  ;;  %v1232_v12 = vunpack.c.l.s8.bf16 %v1104_v8  ;;  %v1143_v6 = vld [vmem:[#allocation10 + $0x168] sm:$0xff]  ;;  %v1145_v7 = vld [vmem:[#allocation10 + $0x178] sm:$0xff] }
 0x40b   :  { %1544 = vmatpush1.bf16.msra.mxu0 %v1418_v14  ;;  %1626 = vmatpush1.bf16.msra.mxu1 %v1420_v15  ;;  %v1241_v14 = vunpack.c.h.s8.bf16 %v1105_v1  ;;  %v1111_v15 = vld [vmem:[#allocation10 + $0x68] sm:$0xff]  ;;  %v1136_v1 = vld [vmem:[#allocation10 + $0x130] sm:$0xff] }
 0x40c   :  { %1545 = vmatprep.subr.bf16.mxu0 %v1427_v16  ;;  %1627 = vmatprep.subr.bf16.mxu1 %v1429_v17  ;;  %v1113_v16 = vld [vmem:[#allocation10 + $0x78] sm:$0xff]  ;;  %v1240_v17 = vunpack.c.h.s8.bf16 %v1104_v8  ;;  %v1247_v18 = vunpack.c.l.s8.bf16 %v1111_v15  ;;  %v1255_v26 = vunpack.c.h.s8.bf16 %v1111_v15  ;;  %v1302_v8 = vunpack.c.h.s8.bf16 %v1134_v63  ;;  %v1144_v15 = vld [vmem:[#allocation10 + $0x170] sm:$0xff] }
 0x40d   :  { %v1257_v27 = vunpack.c.h.s8.bf16 %v1113_v16 }
 0x40f   :  { %1546 = vmatpush1.bf16.msra.mxu0 %v1426_v39  ;;  %1628 = vmatpush1.bf16.msra.mxu1 %v1428_v22  ;;  %v1249_v39 = vunpack.c.l.s8.bf16 %v1113_v16  ;;  %v1112_v22 = vld [vmem:[#allocation10 + $0x70] sm:$0xff] }
 0x410   :  { %1547 = vmatprep.subr.bf16.mxu0 %v1435_v24  ;;  %1629 = vmatprep.subr.bf16.mxu1 %v1437_v25  ;;  %v1246_v24 = vunpack.c.l.s8.bf16 %v1110_v40  ;;  %v1248_v25 = vunpack.c.l.s8.bf16 %v1112_v22 }
 0x413   :  { %1548 = vmatpush1.bf16.msra.mxu0 %v1434_v29  ;;  %1630 = vmatpush1.bf16.msra.mxu1 %v1436_v30  ;;  %v1119_v29 = vld [vmem:[#allocation10 + $0xa8] sm:$0xff]  ;;  %v1121_v30 = vld [vmem:[#allocation10 + $0xb8] sm:$0xff] }
 0x414   :  { %1549 = vmatprep.subr.bf16.mxu0 %v1443_v31  ;;  %1631 = vmatprep.subr.bf16.mxu1 %v1445_v20  ;;  %v1254_v31 = vunpack.c.h.s8.bf16 %v1110_v40  ;;  %v1263_v20 = vunpack.c.l.s8.bf16 %v1119_v29  ;;  %v1265_v21 = vunpack.c.l.s8.bf16 %v1121_v30  ;;  %v1273_v37 = vunpack.c.h.s8.bf16 %v1121_v30  ;;  %v1151_v40 = vld [vmem:[#allocation10 + $0x1a8] sm:$0xff] }
 0x417   :  { %1550 = vmatpush1.bf16.msra.mxu0 %v1442_v33  ;;  %1632 = vmatpush1.bf16.msra.mxu1 %v1444_v34  ;;  %v1120_v33 = vld [vmem:[#allocation10 + $0xb0] sm:$0xff]  ;;  %v1262_v34 = vunpack.c.l.s8.bf16 %v1118_v32 }
 0x418   :  { %1551 = vmatprep.subr.bf16.mxu0 %v1451_v35  ;;  %1633 = vmatprep.subr.bf16.mxu1 %v1453_v36  ;;  %v1264_v35 = vunpack.c.l.s8.bf16 %v1120_v33  ;;  %v1271_v36 = vunpack.c.h.s8.bf16 %v1119_v29  ;;  %v1152_v29 = vld [vmem:[#allocation10 + $0x1b0] sm:$0xff] }
 0x41b   :  { %1552 = vmatpush1.bf16.msra.mxu0 %v1450_v41  ;;  %1634 = vmatpush1.bf16.msra.mxu1 %v1452_v42  ;;  %v1129_v41 = vld [vmem:[#allocation10 + $0xf8] sm:$0xff]  ;;  %v1270_v42 = vunpack.c.h.s8.bf16 %v1118_v32  ;;  %v1159_v32 = vld [vmem:[#allocation10 + $0x1e8] sm:$0xff] }
 0x41c   :  { %1553 = vmatprep.subr.bf16.mxu0 %v1459_v43  ;;  %1635 = vmatprep.subr.bf16.mxu1 %v1461_v44  ;;  %v1272_v43 = vunpack.c.h.s8.bf16 %v1120_v33  ;;  %v1279_v44 = vunpack.c.l.s8.bf16 %v1127_v38  ;;  %v1281_v46 = vunpack.c.l.s8.bf16 %v1129_v41  ;;  %v1289_v53 = vunpack.c.h.s8.bf16 %v1129_v41 }
 0x41f   :  { %1554 = vmatpush1.bf16.msra.mxu0 %v1458_v47  ;;  %1636 = vmatpush1.bf16.msra.mxu1 %v1460_v49  ;;  %v1128_v47 = vld [vmem:[#allocation10 + $0xf0] sm:$0xff]  ;;  %v1278_v49 = vunpack.c.l.s8.bf16 %v1126_v45 }
 0x420   :  { %1555 = vmatprep.subr.bf16.mxu0 %v1467_v51  ;;  %1637 = vmatprep.subr.bf16.mxu1 %v1469_v52  ;;  %v1280_v51 = vunpack.c.l.s8.bf16 %v1128_v47  ;;  %v1287_v52 = vunpack.c.h.s8.bf16 %v1127_v38  ;;  %v1160_v38 = vld [vmem:[#allocation10 + $0x1f0] sm:$0xff] }
 0x423   :  { %1556 = vmatpush1.bf16.msra.mxu0 %v1466_v59  ;;  %1638 = vmatpush1.bf16.msra.mxu1 %v1468_v60  ;;  %v1137_v59 = vld [vmem:[#allocation10 + $0x138] sm:$0xff]  ;;  %v1286_v60 = vunpack.c.h.s8.bf16 %v1126_v45  ;;  %v1167_v45 = vld [vmem:[#allocation10 + $0x228] sm:$0xff] }
 0x424   :  { %1557 = vmatprep.subr.bf16.mxu0 %v1475_v61  ;;  %1639 = vmatprep.subr.bf16.mxu1 %v1477_v62  ;;  %v1288_v61 = vunpack.c.h.s8.bf16 %v1128_v47  ;;  %v1295_v62 = vunpack.c.l.s8.bf16 %v1135_v54  ;;  %v1297_v0 = vunpack.c.l.s8.bf16 %v1137_v59 }
 0x427   :  { %1558 = vmatpush1.bf16.msra.mxu0 %v1474_v2  ;;  %1640 = vmatpush1.bf16.msra.mxu1 %v1476_v3  ;;  %v1294_v2 = vunpack.c.l.s8.bf16 %v1134_v63  ;;  %v1296_v3 = vunpack.c.l.s8.bf16 %v1136_v1 }
 0x428   :  { %1650 = vmatprep.subr.bf16.mxu0 %v1231_v4  ;;  %1732 = vmatprep.subr.bf16.mxu1 %v1233_v5  ;;  %v1303_v4 = vunpack.c.h.s8.bf16 %v1135_v54  ;;  %v1305_v5 = vunpack.c.h.s8.bf16 %v1137_v59  ;;  %v1168_v54 = vld [vmem:[#allocation10 + $0x230] sm:$0xff] }
 0x42a   :  { %1560 = vmatmul.mubr.bf16.vlgmr.msra.gmra.mrb[4].mxu0 %v4498_v10  ;;  %1642 = vmatmul.mubr.bf16.vlgmr.msra.gmra.mrb[12].mxu1 %v4498_v10 }
 0x42b   :  { %1651 = vmatpush1.bf16.msra.mxu0 %v1230_v9  ;;  %1682 = vmatprep.mubr.bf16.mxu0 %v4481_v19  ;;  %v1304_v9 = vunpack.c.h.s8.bf16 %v1136_v1 }
 0x42c   :  { %1733 = vmatpush1.bf16.msra.mxu1 %v1232_v12  ;;  %1764 = vmatprep.mubr.bf16.mxu1 %v4481_v19  ;;  %v1256_v19 = vunpack.c.h.s8.bf16 %v1112_v22  ;;  %v1311_v12 = vunpack.c.l.s8.bf16 %v1143_v6 }
 0x42d   :  { %1652 = vmatprep.subr.bf16.mxu0 %v1239_v13  ;;  %1734 = vmatprep.subr.bf16.mxu1 %v1241_v14  ;;  %v1142_v13 = vld [vmem:[#allocation10 + $0x160] sm:$0xff]  ;;  %v1313_v14 = vunpack.c.l.s8.bf16 %v1145_v7 }
 0x42e   :  { %v1310_v16 = vunpack.c.l.s8.bf16 %v1142_v13  ;;  %v1318_v22 = vunpack.c.h.s8.bf16 %v1142_v13  ;;  %v1185_v13 = vld [vmem:[#allocation10 + $0x2b8] sm:$0xff] }
 0x42f   :  { %1653 = vmatpush1.bf16.msra.mxu0 %v1238_v11  ;;  %v1312_v11 = vunpack.c.l.s8.bf16 %v1144_v15 }
 0x430   :  { %1735 = vmatpush1.bf16.msra.mxu1 %v1240_v17  ;;  %1654 = vmatprep.subr.bf16.mxu0 %v1247_v18  ;;  %v1319_v17 = vunpack.c.h.s8.bf16 %v1143_v6  ;;  %v1321_v18 = vunpack.c.h.s8.bf16 %v1145_v7  ;;  %v1176_v6 = vld [vmem:[#allocation10 + $0x270] sm:$0xff] }
 0x431   :  { %1736 = vmatprep.subr.bf16.mxu1 %v1249_v39  ;;  %v1153_v39 = vld [vmem:[#allocation10 + $0x1b8] sm:$0xff] }
 0x433   :  { %1655 = vmatpush1.bf16.msra.mxu0 %v1246_v24  ;;  %v1320_v24 = vunpack.c.h.s8.bf16 %v1144_v15  ;;  %v1384_v15 = vunpack.c.h.s8.bf16 %v1176_v6 }
 0x434   :  { %1737 = vmatpush1.bf16.msra.mxu1 %v1248_v25  ;;  %1656 = vmatprep.subr.bf16.mxu0 %v1255_v26  ;;  %v1327_v25 = vunpack.c.l.s8.bf16 %v1151_v40  ;;  %v1150_v26 = vld [vmem:[#allocation10 + $0x1a0] sm:$0xff] }
 0x435   :  { %1738 = vmatprep.subr.bf16.mxu1 %v1257_v27  ;;  %v1329_v27 = vunpack.c.l.s8.bf16 %v1153_v39  ;;  %v1326_v30 = vunpack.c.l.s8.bf16 %v1150_v26  ;;  %v1334_v33 = vunpack.c.h.s8.bf16 %v1150_v26 }
 0x437   :  { %1657 = vmatpush1.bf16.msra.mxu0 %v1254_v31  ;;  %v1328_v31 = vunpack.c.l.s8.bf16 %v1152_v29 }
 0x438   :  { %1739 = vmatpush1.bf16.msra.mxu1 %v1256_v19  ;;  %1658 = vmatprep.subr.bf16.mxu0 %v1263_v20  ;;  %v1335_v19 = vunpack.c.h.s8.bf16 %v1151_v40  ;;  %v1337_v20 = vunpack.c.h.s8.bf16 %v1153_v39 }
 0x439   :  { %1740 = vmatprep.subr.bf16.mxu1 %v1265_v21  ;;  %v1161_v21 = vld [vmem:[#allocation10 + $0x1f8] sm:$0xff] }
 0x43b   :  { %1659 = vmatpush1.bf16.msra.mxu0 %v1262_v34  ;;  %v1336_v34 = vunpack.c.h.s8.bf16 %v1152_v29 }
 0x43c   :  { %1741 = vmatpush1.bf16.msra.mxu1 %v1264_v35  ;;  %1660 = vmatprep.subr.bf16.mxu0 %v1271_v36  ;;  %v1343_v35 = vunpack.c.l.s8.bf16 %v1159_v32  ;;  %v1158_v36 = vld [vmem:[#allocation10 + $0x1e0] sm:$0xff] }
 0x43d   :  { %1742 = vmatprep.subr.bf16.mxu1 %v1273_v37  ;;  %v1345_v37 = vunpack.c.l.s8.bf16 %v1161_v21  ;;  %v1342_v41 = vunpack.c.l.s8.bf16 %v1158_v36  ;;  %v1350_v47 = vunpack.c.h.s8.bf16 %v1158_v36 }
 0x43f   :  { %1661 = vmatpush1.bf16.msra.mxu0 %v1270_v42  ;;  %v1344_v42 = vunpack.c.l.s8.bf16 %v1160_v38 }
 0x440   :  { %1743 = vmatpush1.bf16.msra.mxu1 %v1272_v43  ;;  %1662 = vmatprep.subr.bf16.mxu0 %v1279_v44  ;;  %v1351_v43 = vunpack.c.h.s8.bf16 %v1159_v32  ;;  %v1353_v44 = vunpack.c.h.s8.bf16 %v1161_v21 }
 0x441   :  { %1744 = vmatprep.subr.bf16.mxu1 %v1281_v46  ;;  %v1169_v46 = vld [vmem:[#allocation10 + $0x238] sm:$0xff] }
 0x442   :  { %v1369_v63 = vunpack.c.h.s8.bf16 %v1169_v46 }
 0x443   :  { %1663 = vmatpush1.bf16.msra.mxu0 %v1278_v49  ;;  %v1352_v49 = vunpack.c.h.s8.bf16 %v1160_v38 }
 0x444   :  { %1745 = vmatpush1.bf16.msra.mxu1 %v1280_v51  ;;  %1664 = vmatprep.subr.bf16.mxu0 %v1287_v52  ;;  %v1359_v51 = vunpack.c.l.s8.bf16 %v1167_v45  ;;  %v1166_v52 = vld [vmem:[#allocation10 + $0x220] sm:$0xff] }
 0x445   :  { %1746 = vmatprep.subr.bf16.mxu1 %v1289_v53  ;;  %v1361_v53 = vunpack.c.l.s8.bf16 %v1169_v46  ;;  %v1358_v59 = vunpack.c.l.s8.bf16 %v1166_v52  ;;  %v1366_v1 = vunpack.c.h.s8.bf16 %v1166_v52 }
 0x447   :  { %1665 = vmatpush1.bf16.msra.mxu0 %v1286_v60  ;;  %v1360_v60 = vunpack.c.l.s8.bf16 %v1168_v54 }
 0x448   :  { %1747 = vmatpush1.bf16.msra.mxu1 %v1288_v61  ;;  %1666 = vmatprep.subr.bf16.mxu0 %v1295_v62  ;;  %v1367_v61 = vunpack.c.h.s8.bf16 %v1167_v45  ;;  %v1175_v62 = vld [vmem:[#allocation10 + $0x268] sm:$0xff] }
 0x449   :  { %1748 = vmatprep.subr.bf16.mxu1 %v1297_v0  ;;  %v1177_v0 = vld [vmem:[#allocation10 + $0x278] sm:$0xff] }
 0x44b   :  { %1667 = vmatpush1.bf16.msra.mxu0 %v1294_v2  ;;  %v1368_v2 = vunpack.c.h.s8.bf16 %v1168_v54 }
 0x44c   :  { %1749 = vmatpush1.bf16.msra.mxu1 %v1296_v3  ;;  %1668 = vmatprep.subr.bf16.mxu0 %v1303_v4  ;;  %v1375_v3 = vunpack.c.l.s8.bf16 %v1175_v62  ;;  %v1174_v4 = vld [vmem:[#allocation10 + $0x260] sm:$0xff] }
 0x44d   :  { %1750 = vmatprep.subr.bf16.mxu1 %v1305_v5  ;;  %v1377_v5 = vunpack.c.l.s8.bf16 %v1177_v0  ;;  %v1374_v7 = vunpack.c.l.s8.bf16 %v1174_v4 }
 0x44f   :  { %1669 = vmatpush1.bf16.msra.mxu0 %v1302_v8  ;;  %v1376_v8 = vunpack.c.l.s8.bf16 %v1176_v6 }
 0x450   :  { %1751 = vmatpush1.bf16.msra.mxu1 %v1304_v9  ;;  %1670 = vmatprep.subr.bf16.mxu0 %v1311_v12  ;;  %v1385_v9 = vunpack.c.h.s8.bf16 %v1177_v0  ;;  %v1183_v12 = vld [vmem:[#allocation10 + $0x2a8] sm:$0xff] }
 0x451   :  { %1752 = vmatprep.subr.bf16.mxu1 %v1313_v14  ;;  %v1382_v14 = vunpack.c.h.s8.bf16 %v1174_v4  ;;  %v1399_v39 = vunpack.c.h.s8.bf16 %v1183_v12 }
 0x453   :  { %1671 = vmatpush1.bf16.msra.mxu0 %v1310_v16  ;;  %v1182_v16 = vld [vmem:[#allocation10 + $0x2a0] sm:$0xff] }
 0x454   :  { %1753 = vmatpush1.bf16.msra.mxu1 %v1312_v11  ;;  %1672 = vmatprep.subr.bf16.mxu0 %v1319_v17  ;;  %v1393_v11 = vunpack.c.l.s8.bf16 %v1185_v13  ;;  %v1184_v17 = vld [vmem:[#allocation10 + $0x2b0] sm:$0xff]  ;;  %v1398_v26 = vunpack.c.h.s8.bf16 %v1182_v16 }
 0x455   :  { %1754 = vmatprep.subr.bf16.mxu1 %v1321_v18  ;;  %v1390_v18 = vunpack.c.l.s8.bf16 %v1182_v16  ;;  %v1392_v40 = vunpack.c.l.s8.bf16 %v1184_v17 }
 0x457   :  { %1673 = vmatpush1.bf16.msra.mxu0 %v1318_v22  ;;  %v1401_v22 = vunpack.c.h.s8.bf16 %v1185_v13 }
 0x458   :  { %1755 = vmatpush1.bf16.msra.mxu1 %v1320_v24  ;;  %1674 = vmatprep.subr.bf16.mxu0 %v1327_v25  ;;  %v1191_v24 = vld [vmem:[#allocation10 + $0x2e8] sm:$0xff]  ;;  %v1193_v25 = vld [vmem:[#allocation10 + $0x2f8] sm:$0xff] }
 0x459   :  { %1756 = vmatprep.subr.bf16.mxu1 %v1329_v27  ;;  %v1400_v27 = vunpack.c.h.s8.bf16 %v1184_v17  ;;  %v1407_v29 = vunpack.c.l.s8.bf16 %v1191_v24  ;;  %v1415_v21 = vunpack.c.h.s8.bf16 %v1191_v24 }
 0x45b   :  { %1675 = vmatpush1.bf16.msra.mxu0 %v1326_v30  ;;  %v1190_v30 = vld [vmem:[#allocation10 + $0x2e0] sm:$0xff] }
 0x45c   :  { %1757 = vmatpush1.bf16.msra.mxu1 %v1328_v31  ;;  %1676 = vmatprep.subr.bf16.mxu0 %v1335_v19  ;;  %v1409_v31 = vunpack.c.l.s8.bf16 %v1193_v25  ;;  %v1192_v19 = vld [vmem:[#allocation10 + $0x2f0] sm:$0xff]  ;;  %v1414_v36 = vunpack.c.h.s8.bf16 %v1190_v30 }
 0x45d   :  { %1758 = vmatprep.subr.bf16.mxu1 %v1337_v20  ;;  %v1406_v20 = vunpack.c.l.s8.bf16 %v1190_v30  ;;  %v1408_v32 = vunpack.c.l.s8.bf16 %v1192_v19  ;;  %v4510_v30 = vld [vmem:[#allocation13 + $0x24] sm:$0xff] }
 0x45f   :  { %1677 = vmatpush1.bf16.msra.mxu0 %v1334_v33  ;;  %v1417_v33 = vunpack.c.h.s8.bf16 %v1193_v25 }
 0x460   :  { %1759 = vmatpush1.bf16.msra.mxu1 %v1336_v34  ;;  %1678 = vmatprep.subr.bf16.mxu0 %v1343_v35  ;;  %v1199_v34 = vld [vmem:[#allocation10 + $0x328] sm:$0xff]  ;;  %v1201_v35 = vld [vmem:[#allocation10 + $0x338] sm:$0xff] }
 0x461   :  { %1760 = vmatprep.subr.bf16.mxu1 %v1345_v37  ;;  %v1416_v37 = vunpack.c.h.s8.bf16 %v1192_v19  ;;  %v1423_v38 = vunpack.c.l.s8.bf16 %v1199_v34  ;;  %v1431_v46 = vunpack.c.h.s8.bf16 %v1199_v34  ;;  %v1826_v19 = vrot.slane %v4510_v30, %v4467_v58 }
 0x463   :  { %1679 = vmatpush1.bf16.msra.mxu0 %v1342_v41  ;;  %v1198_v41 = vld [vmem:[#allocation10 + $0x320] sm:$0xff] }
 0x464   :  { %1761 = vmatpush1.bf16.msra.mxu1 %v1344_v42  ;;  %1680 = vmatprep.subr.bf16.mxu0 %v1351_v43  ;;  %v1425_v42 = vunpack.c.l.s8.bf16 %v1201_v35  ;;  %v1200_v43 = vld [vmem:[#allocation10 + $0x330] sm:$0xff]  ;;  %v1430_v52 = vunpack.c.h.s8.bf16 %v1198_v41 }
 0x465   :  { %1762 = vmatprep.subr.bf16.mxu1 %v1353_v44  ;;  %v1422_v44 = vunpack.c.l.s8.bf16 %v1198_v41  ;;  %v1424_v45 = vunpack.c.l.s8.bf16 %v1200_v43 }
 0x467   :  { %1681 = vmatpush1.bf16.msra.mxu0 %v1350_v47  ;;  %v1433_v47 = vunpack.c.h.s8.bf16 %v1201_v35 }
 0x468   :  { %1763 = vmatpush1.bf16.msra.mxu1 %v1352_v49  ;;  %1691 = vmatprep.subr.bf16.mxu0 %v1359_v51  ;;  %v1207_v49 = vld [vmem:[#allocation10 + $0x368] sm:$0xff]  ;;  %v1209_v51 = vld [vmem:[#allocation10 + $0x378] sm:$0xff] }
 0x469   :  { %1773 = vmatprep.subr.bf16.mxu1 %v1361_v53  ;;  %v1432_v53 = vunpack.c.h.s8.bf16 %v1200_v43  ;;  %v1439_v54 = vunpack.c.l.s8.bf16 %v1207_v49  ;;  %v1447_v0 = vunpack.c.h.s8.bf16 %v1207_v49 }
 0x46a   :  { %1683 = vmatmul.mubr.bf16.vlgmr.msra.gmra.mrb[8].mxu0 %v4483_v23 }
 0x46b   :  { %1765 = vmatmul.mubr.bf16.vlgmr.msra.gmra.mrb[16].mxu1 %v4483_v23  ;;  %1692 = vmatpush1.bf16.msra.mxu0 %v1358_v59  ;;  %v1383_v23 = vunpack.c.h.s8.bf16 %v1175_v62  ;;  %v1206_v59 = vld [vmem:[#allocation10 + $0x360] sm:$0xff] }
 0x46c   :  { %1723 = vmatprep.mubr.bf16.mxu0 %v4491_v28  ;;  %1774 = vmatpush1.bf16.msra.mxu1 %v1360_v60  ;;  %v1441_v60 = vunpack.c.l.s8.bf16 %v1209_v51  ;;  %v1438_v62 = vunpack.c.l.s8.bf16 %v1206_v59  ;;  %v1446_v4 = vunpack.c.h.s8.bf16 %v1206_v59 }
 0x46d   :  { %1805 = vmatprep.mubr.bf16.mxu1 %v4491_v28  ;;  %1693 = vmatprep.subr.bf16.mxu0 %v1367_v61  ;;  %v1391_v28 = vunpack.c.l.s8.bf16 %v1183_v12  ;;  %v1208_v61 = vld [vmem:[#allocation10 + $0x370] sm:$0xff] }
 0x46e   :  { %1775 = vmatprep.subr.bf16.mxu1 %v1369_v63  ;;  %v1440_v63 = vunpack.c.l.s8.bf16 %v1208_v61 }
 0x46f   :  { %1694 = vmatpush1.bf16.msra.mxu0 %v1366_v1  ;;  %v1449_v1 = vunpack.c.h.s8.bf16 %v1209_v51 }
 0x470   :  { %1776 = vmatpush1.bf16.msra.mxu1 %v1368_v2  ;;  %1695 = vmatprep.subr.bf16.mxu0 %v1375_v3  ;;  %v1215_v2 = vld [vmem:[#allocation10 + $0x3a8] sm:$0xff]  ;;  %v1217_v3 = vld [vmem:[#allocation10 + $0x3b8] sm:$0xff] }
 0x471   :  { %1777 = vmatprep.subr.bf16.mxu1 %v1377_v5  ;;  %v1448_v5 = vunpack.c.h.s8.bf16 %v1208_v61  ;;  %v1455_v6 = vunpack.c.l.s8.bf16 %v1215_v2  ;;  %v1463_v13 = vunpack.c.h.s8.bf16 %v1215_v2  ;;  %v2192_v61 = vld [vmem:[#allocation11 + $0x8] sm:$0xff] }
 0x473   :  { %1696 = vmatpush1.bf16.msra.mxu0 %v1374_v7  ;;  %v1214_v7 = vld [vmem:[#allocation10 + $0x3a0] sm:$0xff] }
 0x474   :  { %1778 = vmatpush1.bf16.msra.mxu1 %v1376_v8  ;;  %1697 = vmatprep.subr.bf16.mxu0 %v1383_v23  ;;  %v1457_v8 = vunpack.c.l.s8.bf16 %v1217_v3  ;;  %v1216_v23 = vld [vmem:[#allocation10 + $0x3b0] sm:$0xff]  ;;  %v1462_v16 = vunpack.c.h.s8.bf16 %v1214_v7 }
 0x475   :  { %1779 = vmatprep.subr.bf16.mxu1 %v1385_v9  ;;  %v1454_v9 = vunpack.c.l.s8.bf16 %v1214_v7  ;;  %v1456_v12 = vunpack.c.l.s8.bf16 %v1216_v23 }
 0x477   :  { %1698 = vmatpush1.bf16.msra.mxu0 %v1382_v14  ;;  %v1465_v14 = vunpack.c.h.s8.bf16 %v1217_v3  ;;  %v2191_v3 = vld [vmem:[#allocation11] sm:$0xff] }
 0x478   :  { %1780 = vmatpush1.bf16.msra.mxu1 %v1384_v15  ;;  %1699 = vmatprep.subr.bf16.mxu0 %v1391_v28  ;;  %v1223_v15 = vld [vmem:[#allocation10 + $0x3e8] sm:$0xff]  ;;  %v1225_v28 = vld [vmem:[#allocation10 + $0x3f8] sm:$0xff]  ;;  %v2415_v7 = vunpack.c.l.s8.bf16 %v2191_v3 }
 0x479   :  { %1781 = vmatprep.subr.bf16.mxu1 %v1393_v11  ;;  %v1464_v11 = vunpack.c.h.s8.bf16 %v1216_v23  ;;  %v1471_v17 = vunpack.c.l.s8.bf16 %v1223_v15  ;;  %v1479_v25 = vunpack.c.h.s8.bf16 %v1223_v15 }
 0x47b   :  { %1700 = vmatpush1.bf16.msra.mxu0 %v1390_v18  ;;  %v1222_v18 = vld [vmem:[#allocation10 + $0x3e0] sm:$0xff] }
 0x47c   :  { %1782 = vmatpush1.bf16.msra.mxu1 %v1392_v40  ;;  %1701 = vmatprep.subr.bf16.mxu0 %v1399_v39  ;;  %v1473_v40 = vunpack.c.l.s8.bf16 %v1225_v28  ;;  %v1224_v39 = vld [vmem:[#allocation10 + $0x3f0] sm:$0xff] }
 0x47d   :  { %1783 = vmatprep.subr.bf16.mxu1 %v1401_v22  ;;  %v1470_v22 = vunpack.c.l.s8.bf16 %v1222_v18  ;;  %v1472_v24 = vunpack.c.l.s8.bf16 %v1224_v39 }
 0x47f   :  { %1702 = vmatpush1.bf16.msra.mxu0 %v1398_v26  ;;  %v1481_v26 = vunpack.c.h.s8.bf16 %v1225_v28  ;;  %v2423_v28 = vunpack.c.h.s8.bf16 %v2192_v61 }
 0x480   :  { %1784 = vmatpush1.bf16.msra.mxu1 %v1400_v27  ;;  %1703 = vmatprep.subr.bf16.mxu0 %v1407_v29  ;;  %v1478_v27 = vunpack.c.h.s8.bf16 %v1222_v18  ;;  %v1480_v29 = vunpack.c.h.s8.bf16 %v1224_v39  ;;  %v2422_v18 = vunpack.c.h.s8.bf16 %v2191_v3  ;;  %v2207_v3 = vld [vmem:[#allocation11 + $0x80] sm:$0xff] }
 0x481   :  { %1785 = vmatprep.subr.bf16.mxu1 %v1409_v31  ;;  %v1818_v31 = vrot.slane %v4510_v30, %v4433_v56 }
 0x483   :  { %1704 = vmatpush1.bf16.msra.mxu0 %v1406_v20  ;;  %v1822_v20 = vrot.slane %v4510_v30, %v4436_v57 }
 0x484   :  { %1786 = vmatpush1.bf16.msra.mxu1 %v1408_v32  ;;  %1705 = vmatprep.subr.bf16.mxu0 %v1415_v21  ;;  %v1830_v32 = vrot.slane %v4510_v30, %v4464_v55 }
 0x485   :  { %1787 = vmatprep.subr.bf16.mxu1 %v1417_v33 }
 0x487   :  { %1706 = vmatpush1.bf16.msra.mxu0 %v1414_v36 }
 0x488   :  { %1788 = vmatpush1.bf16.msra.mxu1 %v1416_v37  ;;  %1707 = vmatprep.subr.bf16.mxu0 %v1423_v38 }
 0x489   :  { %1789 = vmatprep.subr.bf16.mxu1 %v1425_v42 }
 0x48b   :  { %1708 = vmatpush1.bf16.msra.mxu0 %v1422_v44 }
 0x48c   :  { %1790 = vmatpush1.bf16.msra.mxu1 %v1424_v45  ;;  %1709 = vmatprep.subr.bf16.mxu0 %v1431_v46 }
 0x48d   :  { %1791 = vmatprep.subr.bf16.mxu1 %v1433_v47 }
 0x48f   :  { %1710 = vmatpush1.bf16.msra.mxu0 %v1430_v52 }
 0x490   :  { %1792 = vmatpush1.bf16.msra.mxu1 %v1432_v53  ;;  %1711 = vmatprep.subr.bf16.mxu0 %v1439_v54 }
 0x491   :  { %1793 = vmatprep.subr.bf16.mxu1 %v1441_v60 }
 0x493   :  { %1712 = vmatpush1.bf16.msra.mxu0 %v1438_v62  ;;  %v2194_v62 = vld [vmem:[#allocation11 + $0x18] sm:$0xff] }
 0x494   :  { %1794 = vmatpush1.bf16.msra.mxu1 %v1440_v63  ;;  %1713 = vmatprep.subr.bf16.mxu0 %v1447_v0  ;;  %v2418_v2 = vunpack.c.l.s8.bf16 %v2194_v62 }
 0x495   :  { %1795 = vmatprep.subr.bf16.mxu1 %v1449_v1  ;;  %v2416_v1 = vunpack.c.l.s8.bf16 %v2192_v61  ;;  %v2208_v61 = vld [vmem:[#allocation11 + $0x88] sm:$0xff] }
 0x497   :  { %1714 = vmatpush1.bf16.msra.mxu0 %v1446_v4  ;;  %v2193_v4 = vld [vmem:[#allocation11 + $0x10] sm:$0xff] }
 0x498   :  { %1796 = vmatpush1.bf16.msra.mxu1 %v1448_v5  ;;  %1715 = vmatprep.subr.bf16.mxu0 %v1455_v6 }
 0x499   :  { %1797 = vmatprep.subr.bf16.mxu1 %v1457_v8  ;;  %v2417_v8 = vunpack.c.l.s8.bf16 %v2193_v4 }
 0x49b   :  { %1716 = vmatpush1.bf16.msra.mxu0 %v1454_v9 }
 0x49c   :  { %1798 = vmatpush1.bf16.msra.mxu1 %v1456_v12  ;;  %1717 = vmatprep.subr.bf16.mxu0 %v1463_v13 }
 0x49d   :  { %1799 = vmatprep.subr.bf16.mxu1 %v1465_v14 }
 0x49f   :  { %1718 = vmatpush1.bf16.msra.mxu0 %v1462_v16  ;;  %v2425_v16 = vunpack.c.h.s8.bf16 %v2194_v62 }
 0x4a0   :  { %1800 = vmatpush1.bf16.msra.mxu1 %v1464_v11  ;;  %1719 = vmatprep.subr.bf16.mxu0 %v1471_v17 }
 0x4a1   :  { %1801 = vmatprep.subr.bf16.mxu1 %v1473_v40  ;;  %v2424_v40 = vunpack.c.h.s8.bf16 %v2193_v4 }
 0x4a3   :  { %1720 = vmatpush1.bf16.msra.mxu0 %v1470_v22 }
 0x4a4   :  { %1802 = vmatpush1.bf16.msra.mxu1 %v1472_v24  ;;  %1721 = vmatprep.subr.bf16.mxu0 %v1479_v25 }
 0x4a5   :  { %1803 = vmatprep.subr.bf16.mxu1 %v1481_v26  ;;  %v2199_v26 = vld [vmem:[#allocation11 + $0x40] sm:$0xff] }
 0x4a7   :  { %1722 = vmatpush1.bf16.msra.mxu0 %v1478_v27  ;;  %v2201_v27 = vld [vmem:[#allocation11 + $0x50] sm:$0xff] }
 0x4a8   :  { %1804 = vmatpush1.bf16.msra.mxu1 %v1480_v29  ;;  %2871 = vmatprep.subr.bf16.mxu0 %v2416_v1  ;;  %v2446_v1 = vunpack.c.l.s8.bf16 %v2208_v61 }
 0x4a9   :  { %3035 = vmatprep.subr.bf16.mxu1 %v2418_v2  ;;  %v2205_v2 = vld [vmem:[#allocation11 + $0x70] sm:$0xff] }
 0x4aa   :  { %1724 = vmatmul.mubr.bf16.vlgmr.msra.gmra.mrb[8].mxu0 %v4498_v10 }
 0x4ab   :  { %1806 = vmatmul.mubr.bf16.vlgmr.msra.gmra.mrb[16].mxu1 %v4498_v10  ;;  %2872 = vmatpush1.bf16.msra.mxu0 %v2415_v7  ;;  %v2445_v7 = vunpack.c.l.s8.bf16 %v2207_v3 }
 0x4ac   :  { %3036 = vmatpush1.bf16.msra.mxu1 %v2417_v8  ;;  %2873 = vmatprep.subr.bf16.mxu0 %v2423_v28  ;;  %v2453_v28 = vunpack.c.h.s8.bf16 %v2208_v61  ;;  %v2219_v61 = vld [vmem:[#allocation11 + $0xe0] sm:$0xff] }
 0x4ad   :  { %3037 = vmatprep.subr.bf16.mxu1 %v2425_v16 }
 0x4af   :  { %2874 = vmatpush1.bf16.msra.mxu0 %v2422_v18  ;;  %v2452_v18 = vunpack.c.h.s8.bf16 %v2207_v3  ;;  %v2478_v3 = vunpack.c.h.s8.bf16 %v2219_v61 }
 0x4b0   :  { %3038 = vmatpush1.bf16.msra.mxu1 %v2424_v40 }
 0x4fd   :  { %v1561_v21 = vpop.f32.mrb[4].mxu0  ;;  %v1643_v33 = vpop.f32.mrb[12].mxu1 }
 0x4fe   :  { %v4520_v34 = vmul.f32 %v1818_v31, %v1561_v21  ;;  %v4522_v35 = vmul.f32 %v1826_v19, %v1643_v33  ;;  %v1563_v10 = vpop.f32.mrb[5].mxu0  ;;  %v1645_v36 = vpop.f32.mrb[13].mxu1  ;;  %v2430_v19 = vunpack.c.l.s8.bf16 %v2199_v26  ;;  %v2200_v21 = vld [vmem:[#allocation11 + $0x48] sm:$0xff] }
 0x4ff   :  { %v4524_v37 = vmul.f32 %v1822_v20, %v1563_v10  ;;  %v4526_v38 = vmul.f32 %v1830_v32, %v1645_v36  ;;  %v1565_v41 = vpop.f32.mrb[6].mxu0  ;;  %v1647_v42 = vpop.f32.mrb[14].mxu1  ;;  %v2432_v20 = vunpack.c.l.s8.bf16 %v2201_v27  ;;  %v2198_v32 = vld [vmem:[#allocation11 + $0x38] sm:$0xff] }
 0x500   :  { %v1865_v43 = vrot.slane %v4520_v34, 4  ;;  %v1877_v44 = vrot.slane %v4522_v35, 4  ;;  %v1566_v45 = vpop.f32.mrb[7].mxu0  ;;  %v1648_v46 = vpop.f32.mrb[15].mxu1  ;;  %v2429_v36 = vunpack.c.l.s8.bf16 %v2198_v32  ;;  %v2431_v41 = vunpack.c.l.s8.bf16 %v2200_v21  ;;  %2875 = vmatprep.subr.bf16.mxu0 %v2430_v19 }
 0x501   :  { %v1871_v47 = vrot.slane %v4524_v37, 4  ;;  %v1883_v49 = vrot.slane %v4526_v38, 4  ;;  %3039 = vmatprep.subr.bf16.mxu1 %v2432_v20  ;;  %v2437_v45 = vunpack.c.h.s8.bf16 %v2199_v26  ;;  %v2439_v46 = vunpack.c.h.s8.bf16 %v2201_v27  ;;  %v2215_v26 = vld [vmem:[#allocation11 + $0xc0] sm:$0xff]  ;;  %v2212_v20 = vld [vmem:[#allocation11 + $0xa8] sm:$0xff] }
 0x502   :  { %v1866_v51 = vadd.f32 %v1865_v43, %v4520_v34  ;;  %v1878_v52 = vadd.f32 %v1877_v44, %v4522_v35  ;;  %2876 = vmatpush1.bf16.msra.mxu0 %v2429_v36  ;;  %3040 = vmatpush1.bf16.msra.mxu1 %v2431_v41  ;;  %v2460_v19 = vunpack.c.l.s8.bf16 %v2215_v26  ;;  %v2457_v41 = vunpack.c.l.s8.bf16 %v2212_v20 }
 0x503   :  { %v1872_v53 = vadd.f32 %v1871_v47, %v4524_v37  ;;  %v1884_v54 = vadd.f32 %v1883_v49, %v4526_v38  ;;  %v2436_v49 = vunpack.c.h.s8.bf16 %v2198_v32  ;;  %2877 = vmatprep.subr.bf16.mxu0 %v2437_v45  ;;  %3041 = vmatprep.subr.bf16.mxu1 %v2439_v46  ;;  %v2214_v32 = vld [vmem:[#allocation11 + $0xb8] sm:$0xff] }
 0x504   :  { %v1867_v59 = vrot.slane %v1866_v51, 2  ;;  %v1879_v60 = vrot.slane %v1878_v52, 2 }
 0x505   :  { %v1873_v63 = vrot.slane %v1872_v53, 2  ;;  %v1885_v0 = vrot.slane %v1884_v54, 2 }
 0x506   :  { %v1868_v5 = vadd.f32 %v1867_v59, %v1866_v51  ;;  %v1880_v6 = vadd.f32 %v1879_v60, %v1878_v52  ;;  %v2438_v51 = vunpack.c.h.s8.bf16 %v2200_v21  ;;  %2878 = vmatpush1.bf16.msra.mxu0 %v2436_v49  ;;  %v2206_v60 = vld [vmem:[#allocation11 + $0x78] sm:$0xff]  ;;  %v2467_v49 = vunpack.c.h.s8.bf16 %v2215_v26 }
 0x507   :  { %v1874_v23 = vadd.f32 %v1873_v63, %v1872_v53  ;;  %v1886_v9 = vadd.f32 %v1885_v0, %v1884_v54  ;;  %v2444_v0 = vunpack.c.l.s8.bf16 %v2206_v60 }
 0x508   :  { %v1869_v12 = vrot.slane %v1868_v5, 1  ;;  %v1881_v13 = vrot.slane %v1880_v6, 1  ;;  %3042 = vmatpush1.bf16.msra.mxu1 %v2438_v51  ;;  %v2464_v51 = vunpack.c.h.s8.bf16 %v2212_v20  ;;  %v2233_v20 = vld [vmem:[#allocation11 + $0x150] sm:$0xff] }
 0x509   :  { %v1875_v14 = vrot.slane %v1874_v23, 1  ;;  %v1887_v15 = vrot.slane %v1886_v9, 1  ;;  %2879 = vmatprep.subr.bf16.mxu0 %v2444_v0  ;;  %3043 = vmatprep.subr.bf16.mxu1 %v2446_v1 }
 0x50a   :  { %v1870_v11 = vadd.f32 %v1869_v12, %v1868_v5  ;;  %v1882_v17 = vadd.f32 %v1881_v13, %v1880_v6  ;;  %v2443_v6 = vunpack.c.l.s8.bf16 %v2205_v2 }
 0x50b   :  { %v1876_v39 = vadd.f32 %v1875_v14, %v1874_v23  ;;  %v1888_v22 = vadd.f32 %v1887_v15, %v1886_v9  ;;  %v2451_v15 = vunpack.c.h.s8.bf16 %v2206_v60 }
 0x50c   :  { %v1913_v24 = vmul.f32 0.125, %v1870_v11  ;;  %v1915_v25 = vmul.f32 0.125, %v1882_v17  ;;  %2880 = vmatpush1.bf16.msra.mxu0 %v2443_v6  ;;  %3044 = vmatpush1.bf16.msra.mxu1 %v2445_v7  ;;  %v2450_v17 = vunpack.c.h.s8.bf16 %v2205_v2  ;;  %v2227_v6 = vld [vmem:[#allocation11 + $0x120] sm:$0xff]  ;;  %v2229_v7 = vld [vmem:[#allocation11 + $0x130] sm:$0xff] }
 0x50d   :  { %v1914_v29 = vmul.f32 0.125, %v1876_v39  ;;  %v1916_v31 = vmul.f32 0.125, %v1888_v22  ;;  %2881 = vmatprep.subr.bf16.mxu0 %v2451_v15  ;;  %3045 = vmatprep.subr.bf16.mxu1 %v2453_v28 }
 0x50e   :  { %v4537_v33 = vsub.f32 %v4520_v34, %v1913_v24  ;;  %v4540_v10 = vsub.f32 %v4522_v35, %v1915_v25  ;;  %v2213_v25 = vld [vmem:[#allocation11 + $0xb0] sm:$0xff] }
 0x50f   :  { %v4543_v42 = vsub.f32 %v4524_v37, %v1914_v29  ;;  %v4546_v43 = vsub.f32 %v4526_v38, %v1916_v31  ;;  %v2458_v31 = vunpack.c.l.s8.bf16 %v2213_v25 }
 0x510   :  { %v1929_v44 = vmul.f32 %v4537_v33, %v4537_v33  ;;  %v1931_v34 = vmul.f32 %v4540_v10, %v4540_v10  ;;  %2882 = vmatpush1.bf16.msra.mxu0 %v2450_v17  ;;  %3046 = vmatpush1.bf16.msra.mxu1 %v2452_v18 }
 0x511   :  { %v1930_v35 = vmul.f32 %v4543_v42, %v4543_v42  ;;  %v1932_v37 = vmul.f32 %v4546_v43, %v4546_v43  ;;  %2883 = vmatprep.subr.bf16.mxu0 %v2458_v31  ;;  %3047 = vmatprep.subr.bf16.mxu1 %v2460_v19 }
 0x512   :  { %v1937_v38 = vrot.slane %v1929_v44, 4  ;;  %v1949_v47 = vrot.slane %v1931_v34, 4 }
 0x513   :  { %v1943_v52 = vrot.slane %v1930_v35, 4  ;;  %v1955_v53 = vrot.slane %v1932_v37, 4 }
 0x514   :  { %v1938_v54 = vadd.f32 %v1937_v38, %v1929_v44  ;;  %v1950_v59 = vadd.f32 %v1949_v47, %v1931_v34  ;;  %v2459_v44 = vunpack.c.l.s8.bf16 %v2214_v32  ;;  %2884 = vmatpush1.bf16.msra.mxu0 %v2457_v41  ;;  %v2465_v47 = vunpack.c.h.s8.bf16 %v2213_v25 }
 0x515   :  { %v1944_v62 = vadd.f32 %v1943_v52, %v1930_v35  ;;  %v1956_v63 = vadd.f32 %v1955_v53, %v1932_v37  ;;  %v2466_v52 = vunpack.c.h.s8.bf16 %v2214_v32  ;;  %v2220_v53 = vld [vmem:[#allocation11 + $0xe8] sm:$0xff]  ;;  %v2235_v32 = vld [vmem:[#allocation11 + $0x160] sm:$0xff] }
 0x516   :  { %v1939_v4 = vrot.slane %v1938_v54, 2  ;;  %v1951_v5 = vrot.slane %v1950_v59, 2  ;;  %3048 = vmatpush1.bf16.msra.mxu1 %v2459_v44  ;;  %2885 = vmatprep.subr.bf16.mxu0 %v2465_v47  ;;  %v2479_v1 = vunpack.c.h.s8.bf16 %v2220_v53  ;;  %v2240_v47 = vld [vmem:[#allocation11 + $0x188] sm:$0xff] }
 0x517   :  { %v1945_v8 = vrot.slane %v1944_v62, 2  ;;  %v1957_v23 = vrot.slane %v1956_v63, 2  ;;  %3049 = vmatprep.subr.bf16.mxu1 %v2467_v49  ;;  %v2242_v49 = vld [vmem:[#allocation11 + $0x198] sm:$0xff] }
 0x518   :  { %v1940_v9 = vadd.f32 %v1939_v4, %v1938_v54  ;;  %v1952_v12 = vadd.f32 %v1951_v5, %v1950_v59  ;;  %2886 = vmatpush1.bf16.msra.mxu0 %v2464_v51  ;;  %v2222_v54 = vld [vmem:[#allocation11 + $0xf8] sm:$0xff]  ;;  %v2472_v59 = vunpack.c.l.s8.bf16 %v2220_v53  ;;  %v2513_v51 = vunpack.c.l.s8.bf16 %v2240_v47 }
 0x519   :  { %v1946_v13 = vadd.f32 %v1945_v8, %v1944_v62  ;;  %v1958_v14 = vadd.f32 %v1957_v23, %v1956_v63  ;;  %v2474_v60 = vunpack.c.l.s8.bf16 %v2222_v54  ;;  %v2221_v62 = vld [vmem:[#allocation11 + $0xf0] sm:$0xff]  ;;  %v2471_v63 = vunpack.c.l.s8.bf16 %v2219_v61  ;;  %v4564_v61 = vld [vmem:[#allocation11 + $0x1c8] sm:$0xff] }
 0x51a   :  { %v1941_v16 = vrot.slane %v1940_v9, 1  ;;  %v1953_v11 = vrot.slane %v1952_v12, 1  ;;  %3050 = vmatpush1.bf16.msra.mxu1 %v2466_v52  ;;  %v2473_v0 = vunpack.c.l.s8.bf16 %v2221_v62  ;;  %2887 = vmatprep.subr.bf16.mxu0 %v2472_v59  ;;  %v2481_v2 = vunpack.c.h.s8.bf16 %v2222_v54 }
 0x51b   :  { %v1947_v40 = vrot.slane %v1946_v13, 1  ;;  %v1959_v39 = vrot.slane %v1958_v14, 1  ;;  %3051 = vmatprep.subr.bf16.mxu1 %v2474_v60  ;;  %v2480_v4 = vunpack.c.h.s8.bf16 %v2221_v62  ;;  %v2486_v23 = vunpack.c.l.s8.bf16 %v2227_v6  ;;  %v4566_v62 = vld [vmem:[#allocation11 + $0x1d8] sm:$0xff] }
 0x51c   :  { %v1942_v22 = vadd.f32 %v1941_v16, %v1940_v9  ;;  %v1954_v24 = vadd.f32 %v1953_v11, %v1952_v12  ;;  %2888 = vmatpush1.bf16.msra.mxu0 %v2471_v63  ;;  %v2488_v9 = vunpack.c.l.s8.bf16 %v2229_v7  ;;  %v2226_v12 = vld [vmem:[#allocation11 + $0x118] sm:$0xff]  ;;  %v2515_v52 = vunpack.c.l.s8.bf16 %v2242_v49 }
 0x51d   :  { %v1948_v27 = vadd.f32 %v1947_v40, %v1946_v13  ;;  %v1960_v29 = vadd.f32 %v1959_v39, %v1958_v14  ;;  %2889 = vmatprep.subr.bf16.mxu0 %v2479_v1  ;;  %v2228_v13 = vld [vmem:[#allocation11 + $0x128] sm:$0xff]  ;;  %v2485_v15 = vunpack.c.l.s8.bf16 %v2226_v12  ;;  %v2493_v40 = vunpack.c.h.s8.bf16 %v2227_v6 }
 0x51e   :  { %v1985_v21 = vmul.f32 0.125, %v1942_v22  ;;  %v1987_v36 = vmul.f32 0.125, %v1954_v24  ;;  %3052 = vmatpush1.bf16.msra.mxu1 %v2473_v0  ;;  %v2487_v28 = vunpack.c.l.s8.bf16 %v2228_v13  ;;  %v2495_v39 = vunpack.c.h.s8.bf16 %v2229_v7 }
 0x51f   :  { %v1986_v34 = vmul.f32 0.125, %v1948_v27  ;;  %v1988_v35 = vmul.f32 0.125, %v1960_v29  ;;  %3053 = vmatprep.subr.bf16.mxu1 %v2481_v2  ;;  %v2492_v24 = vunpack.c.h.s8.bf16 %v2226_v12  ;;  %v2494_v25 = vunpack.c.h.s8.bf16 %v2228_v13  ;;  %v2234_v27 = vld [vmem:[#allocation11 + $0x158] sm:$0xff]  ;;  %v2236_v29 = vld [vmem:[#allocation11 + $0x168] sm:$0xff] }
 0x520   :  { %v1993_v37 = vadd.f32 0.8, %v1985_v21  ;;  %v1995_v45 = vadd.f32 0.8, %v1987_v36  ;;  %2890 = vmatpush1.bf16.msra.mxu0 %v2478_v3  ;;  %v2500_v31 = vunpack.c.l.s8.bf16 %v2234_v27  ;;  %v2502_v19 = vunpack.c.l.s8.bf16 %v2236_v29 }
 0x521   :  { %v1994_v46 = vadd.f32 0.8, %v1986_v34  ;;  %v1996_v38 = vadd.f32 0.8, %v1988_v35  ;;  %2891 = vmatprep.subr.bf16.mxu0 %v2486_v23  ;;  %v2499_v21 = vunpack.c.l.s8.bf16 %v2233_v20  ;;  %v2501_v36 = vunpack.c.l.s8.bf16 %v2235_v32 }
 0x522   :  { %4061 = vrsqrt.f32 %v1993_v37  ;;  %3054 = vmatpush1.bf16.msra.mxu1 %v2480_v4  ;;  %v2507_v41 = vunpack.c.h.s8.bf16 %v2234_v27  ;;  %v2509_v44 = vunpack.c.h.s8.bf16 %v2236_v29  ;;  %v2506_v34 = vunpack.c.h.s8.bf16 %v2233_v20  ;;  %v2241_v37 = vld [vmem:[#allocation11 + $0x190] sm:$0xff] }
 0x523   :  { %4063 = vrsqrt.f32 %v1995_v45  ;;  %3055 = vmatprep.subr.bf16.mxu1 %v2488_v9  ;;  %v2508_v35 = vunpack.c.h.s8.bf16 %v2235_v32  ;;  %v2243_v45 = vld [vmem:[#allocation11 + $0x1a0] sm:$0xff]  ;;  %v2521_v53 = vunpack.c.h.s8.bf16 %v2241_v37  ;;  %v2520_v59 = vunpack.c.h.s8.bf16 %v2240_v47 }
 0x524   :  { %4065 = vrsqrt.f32 %v1994_v46  ;;  %2892 = vmatpush1.bf16.msra.mxu0 %v2485_v15  ;;  %v2514_v46 = vunpack.c.l.s8.bf16 %v2241_v37  ;;  %v2523_v54 = vunpack.c.h.s8.bf16 %v2243_v45  ;;  %v2522_v60 = vunpack.c.h.s8.bf16 %v2242_v49 }
 0x525   :  { %4067 = vrsqrt.f32 %v1996_v38  ;;  %2893 = vmatprep.subr.bf16.mxu0 %v2493_v40  ;;  %v2516_v38 = vunpack.c.l.s8.bf16 %v2243_v45  ;;  %v2528_v63 = vunpack.c.l.s8.bf16 %v4564_v61  ;;  %v2530_v0 = vunpack.c.l.s8.bf16 %v4566_v62 }
 0x526   :  { %3056 = vmatpush1.bf16.msra.mxu1 %v2487_v28  ;;  %v4571_v1 = vsub.s32 4, %v4425_v48  ;;  %v4574_v2 = vsub.s32 6, %v4425_v48  ;;  %v4577_v3 = vsub.s32 5, %v4425_v48  ;;  %v4580_v4 = vsub.s32 7, %v4425_v48 }
 0x527   :  { %3057 = vmatprep.subr.bf16.mxu1 %v2495_v39 }
 0x528   :  { %2894 = vmatpush1.bf16.msra.mxu0 %v2492_v24  ;;  %v1842_v6 = vrot.slane %v4510_v30, %v4574_v2  ;;  %v1838_v7 = vrot.slane %v4510_v30, %v4577_v3 }
 0x529   :  { %2895 = vmatprep.subr.bf16.mxu0 %v2500_v31 }
 0x52a   :  { %3058 = vmatpush1.bf16.msra.mxu1 %v2494_v25 }
 0x52b   :  { %3059 = vmatprep.subr.bf16.mxu1 %v2502_v19 }
 0x52c   :  { %v4062_v5 = vpop.eup %4061  ;;  %2896 = vmatpush1.bf16.msra.mxu0 %v2499_v21 }
 0x52d   :  { %v4064_v8 = vpop.eup %4063  ;;  %2897 = vmatprep.subr.bf16.mxu0 %v2507_v41 }
 0x52e   :  { %v4066_v14 = vpop.eup %4065  ;;  %3060 = vmatpush1.bf16.msra.mxu1 %v2501_v36 }
 0x52f   :  { %v4068_v16 = vpop.eup %4067  ;;  %v2017_v11 = vcombine.low %v4062_v5, %v4066_v14  ;;  %3061 = vmatprep.subr.bf16.mxu1 %v2509_v44  ;;  %v1834_v5 = vrot.slane %v4510_v30, %v4571_v1 }
 0x530   :  { %v2018_v17 = vcombine.low %v4064_v8, %v4068_v16  ;;  %2898 = vmatpush1.bf16.msra.mxu0 %v2506_v34  ;;  %v1846_v8 = vrot.slane %v4510_v30, %v4580_v4 }
 0x531   :  { %v4557_v18 = vrot.slane %v2017_v11, %v4428_v50  ;;  %2899 = vmatprep.subr.bf16.mxu0 %v2514_v46 }
 0x532   :  { %v4560_v22 = vrot.slane %v2018_v17, %v4428_v50  ;;  %3062 = vmatpush1.bf16.msra.mxu1 %v2508_v35 }
 0x533   :  { %3063 = vmatprep.subr.bf16.mxu1 %v2516_v38 }
 0x534   :  { %v2049_v26 = vcombine.low %v4557_v18, %v4560_v22  ;;  %2900 = vmatpush1.bf16.msra.mxu0 %v2513_v51 }
 0x535   :  { %2901 = vmatprep.subr.bf16.mxu0 %v2521_v53 }
 0x536   :  { %3064 = vmatpush1.bf16.msra.mxu1 %v2515_v52 }
 0x537   :  { %3065 = vmatprep.subr.bf16.mxu1 %v2523_v54 }
 0x538   :  { %2902 = vmatpush1.bf16.msra.mxu0 %v2520_v59 }
 0x539   :  { %2912 = vmatprep.subr.bf16.mxu0 %v2528_v63 }
 0x53a   :  { %3066 = vmatpush1.bf16.msra.mxu1 %v2522_v60 }
 0x53b   :  { %3076 = vmatprep.subr.bf16.mxu1 %v2530_v0 }
 0x57d   :  { %v1725_v23 = vpop.f32.mrb[8].mxu0 }
 0x57e   :  { %v1859_v9 = vmul.f32 %v1834_v5, %v1725_v23  ;;  %v1807_v12 = vpop.f32.mrb[16].mxu1  ;;  %v1727_v13 = vpop.f32.mrb[9].mxu0 }
 0x57f   :  { %v1861_v14 = vmul.f32 %v1842_v6, %v1807_v12  ;;  %v1860_v15 = vmul.f32 %v1838_v7, %v1727_v13  ;;  %v1809_v48 = vpop.f32.mrb[17].mxu1  ;;  %v1729_v28 = vpop.f32.mrb[10].mxu0 }
 0x580   :  { %v1889_v16 = vrot.slane %v1859_v9, 4  ;;  %v1862_v11 = vmul.f32 %v1846_v8, %v1809_v48  ;;  %v1811_v17 = vpop.f32.mrb[18].mxu1  ;;  %v1730_v40 = vpop.f32.mrb[11].mxu0 }
 0x581   :  { %v1901_v39 = vrot.slane %v1861_v14, 4  ;;  %v1895_v24 = vrot.slane %v1860_v15, 4  ;;  %v1812_v25 = vpop.f32.mrb[19].mxu1 }
 0x582   :  { %v1890_v27 = vadd.f32 %v1889_v16, %v1859_v9  ;;  %v1907_v29 = vrot.slane %v1862_v11, 4 }
 0x583   :  { %v1902_v31 = vadd.f32 %v1901_v39, %v1861_v14  ;;  %v1896_v19 = vadd.f32 %v1895_v24, %v1860_v15 }
 0x584   :  { %v1891_v30 = vrot.slane %v1890_v27, 2  ;;  %v1908_v20 = vadd.f32 %v1907_v29, %v1862_v11 }
 0x585   :  { %v1903_v32 = vrot.slane %v1902_v31, 2  ;;  %v1897_v21 = vrot.slane %v1896_v19, 2 }
 0x586   :  { %v1892_v36 = vadd.f32 %v1891_v30, %v1890_v27  ;;  %v1909_v41 = vrot.slane %v1908_v20, 2 }
 0x587   :  { %v1904_v44 = vadd.f32 %v1903_v32, %v1902_v31  ;;  %v1898_v34 = vadd.f32 %v1897_v21, %v1896_v19 }
 0x588   :  { %v1893_v35 = vrot.slane %v1892_v36, 1  ;;  %v1910_v37 = vadd.f32 %v1909_v41, %v1908_v20 }
 0x589   :  { %v1905_v45 = vrot.slane %v1904_v44, 1  ;;  %v1899_v46 = vrot.slane %v1898_v34, 1 }
 0x58a   :  { %v1894_v38 = vadd.f32 %v1893_v35, %v1892_v36  ;;  %v1911_v47 = vrot.slane %v1910_v37, 1 }
 0x58b   :  { %v1906_v49 = vadd.f32 %v1905_v45, %v1904_v44  ;;  %v1900_v51 = vadd.f32 %v1899_v46, %v1898_v34 }
 0x58c   :  { %v1917_v52 = vmul.f32 0.125, %v1894_v38  ;;  %v1912_v53 = vadd.f32 %v1911_v47, %v1910_v37 }
 0x58d   :  { %v1919_v54 = vmul.f32 0.125, %v1906_v49  ;;  %v1918_v59 = vmul.f32 0.125, %v1900_v51 }
 0x58e   :  { %v4590_v60 = vsub.f32 %v1859_v9, %v1917_v52  ;;  %v1920_v63 = vmul.f32 0.125, %v1912_v53 }
 0x58f   :  { %v4592_v0 = vsub.f32 %v1861_v14, %v1919_v54  ;;  %v4594_v5 = vsub.f32 %v1860_v15, %v1918_v59 }
 0x590   :  { %v1933_v6 = vmul.f32 %v4590_v60, %v4590_v60  ;;  %v4598_v7 = vsub.f32 %v1862_v11, %v1920_v63 }
 0x591   :  { %v1935_v8 = vmul.f32 %v4592_v0, %v4592_v0  ;;  %v1934_v23 = vmul.f32 %v4594_v5, %v4594_v5 }
 0x592   :  { %v1961_v12 = vrot.slane %v1933_v6, 4  ;;  %v1936_v9 = vmul.f32 %v4598_v7, %v4598_v7 }
 0x593   :  { %v1973_v13 = vrot.slane %v1935_v8, 4  ;;  %v1967_v14 = vrot.slane %v1934_v23, 4 }
 0x594   :  { %v1962_v48 = vadd.f32 %v1961_v12, %v1933_v6  ;;  %v1979_v15 = vrot.slane %v1936_v9, 4  ;;  %v2057_v12 = vrot.slane %v2049_v26, %v4428_v50 }
 0x595   :  { %v1974_v28 = vadd.f32 %v1973_v13, %v1935_v8  ;;  %v1968_v16 = vadd.f32 %v1967_v14, %v1934_v23  ;;  %v1863_v13 = vld [vmem:[#allocation13 + $0xd] sm:$0xff]  ;;  %v4613_v14 = vld [vmem:[#allocation13 + $0x15] sm:$0xff] }
 0x596   :  { %v1963_v17 = vrot.slane %v1962_v48, 2  ;;  %v1980_v40 = vadd.f32 %v1979_v15, %v1936_v9  ;;  %v2133_v18 = vrot.slane %v4613_v14, %v4464_v55 }
 0x597   :  { %v1975_v11 = vrot.slane %v1974_v28, 2  ;;  %v1969_v39 = vrot.slane %v1968_v16, 2 }
 0x598   :  { %v1964_v24 = vadd.f32 %v1963_v17, %v1962_v48  ;;  %v1981_v25 = vrot.slane %v1980_v40, 2  ;;  %v2121_v17 = vrot.slane %v4613_v14, %v4433_v56 }
 0x599   :  { %v1976_v27 = vadd.f32 %v1975_v11, %v1974_v28  ;;  %v1970_v29 = vadd.f32 %v1969_v39, %v1968_v16  ;;  %v2149_v28 = vrot.slane %v4613_v14, %v4580_v4  ;;  %v2125_v16 = vrot.slane %v4613_v14, %v4436_v57 }
 0x59a   :  { %v1965_v31 = vrot.slane %v1964_v24, 1  ;;  %v1982_v19 = vadd.f32 %v1981_v25, %v1980_v40  ;;  %v2129_v39 = vrot.slane %v4613_v14, %v4467_v58 }
 0x59b   :  { %v1977_v30 = vrot.slane %v1976_v27, 1  ;;  %v1971_v20 = vrot.slane %v1970_v29, 1 }
 0x59c   :  { %v1966_v32 = vadd.f32 %v1965_v31, %v1964_v24  ;;  %v1983_v21 = vrot.slane %v1982_v19, 1 }
 0x59d   :  { %v1978_v36 = vadd.f32 %v1977_v30, %v1976_v27  ;;  %v1972_v41 = vadd.f32 %v1971_v20, %v1970_v29 }
 0x59e   :  { %v1989_v44 = vmul.f32 0.125, %v1966_v32  ;;  %v1984_v34 = vadd.f32 %v1983_v21, %v1982_v19 }
 0x59f   :  { %v1991_v35 = vmul.f32 0.125, %v1978_v36  ;;  %v1990_v37 = vmul.f32 0.125, %v1972_v41  ;;  %v2247_v41 = vld [vmem:[#allocation11 + $0x1c0] sm:$0xff] }
 0x5a0   :  { %v1997_v45 = vadd.f32 0.8, %v1989_v44  ;;  %v1992_v46 = vmul.f32 0.125, %v1984_v34  ;;  %v2249_v44 = vld [vmem:[#allocation11 + $0x1d0] sm:$0xff] }
 0x5a1   :  { %v1999_v38 = vadd.f32 0.8, %v1991_v35  ;;  %v1998_v47 = vadd.f32 0.8, %v1990_v37 }
 0x5a2   :  { %4069 = vrsqrt.f32 %v1997_v45  ;;  %v2000_v49 = vadd.f32 0.8, %v1992_v46 }
 0x5a3   :  { %4071 = vrsqrt.f32 %v1999_v38  ;;  %v2529_v38 = vunpack.c.l.s8.bf16 %v2249_v44 }
 0x5a4   :  { %4073 = vrsqrt.f32 %v1998_v47 }
 0x5a5   :  { %4075 = vrsqrt.f32 %v2000_v49  ;;  %v2137_v49 = vrot.slane %v4613_v14, %v4571_v1 }
 0x5ac   :  { %v4070_v51 = vpop.eup %4069 }
 0x5ad   :  { %v4072_v52 = vpop.eup %4071 }
 0x5ae   :  { %v4074_v53 = vpop.eup %4073 }
 0x5af   :  { %v4076_v54 = vpop.eup %4075  ;;  %v2019_v59 = vcombine.low %v4070_v51, %v4074_v53  ;;  %v2535_v51 = vunpack.c.h.s8.bf16 %v4564_v61  ;;  %v2255_v53 = vld [vmem:[#allocation11 + $0x200] sm:$0xff] }
 0x5b0   :  { %v2020_v63 = vcombine.low %v4072_v52, %v4076_v54  ;;  %v2537_v52 = vunpack.c.h.s8.bf16 %v4566_v62  ;;  %v2257_v54 = vld [vmem:[#allocation11 + $0x210] sm:$0xff]  ;;  %v2542_v61 = vunpack.c.l.s8.bf16 %v2255_v53 }
 0x5b1   :  { %v2041_v6 = vrot.slane %v2019_v59, %v4428_v50  ;;  %v2544_v62 = vunpack.c.l.s8.bf16 %v2257_v54 }
 0x5b2   :  { %v2048_v8 = vrot.slane %v2020_v63, %v4428_v50 }
 0x5b4   :  { %v2050_v23 = vcombine.low %v2041_v6, %v2048_v8  ;;  %v2534_v8 = vunpack.c.h.s8.bf16 %v2247_v41 }
 0x5b6   :  { %v2064_v9 = vrot.slane %v2050_v23, %v4428_v50  ;;  %v2536_v23 = vunpack.c.h.s8.bf16 %v2249_v44 }
 0x5b8   :  { %v2065_v48 = vcombine.low %v2057_v12, %v2064_v9  ;;  %v2254_v12 = vld [vmem:[#allocation11 + $0x1f8] sm:$0xff]  ;;  %v2256_v9 = vld [vmem:[#allocation11 + $0x208] sm:$0xff] }
 0x5ba   :  { %v4615_v15 = vmul.f32 %v2065_v48, %v1863_v13 }
 0x5bc   :  { %v2100_v50 = vrot.slane %v4615_v15, %v4580_v4  ;;  %v2076_v22 = vrot.slane %v4615_v15, %v4436_v57  ;;  %v2072_v26 = vrot.slane %v4615_v15, %v4433_v56  ;;  %v2084_v40 = vrot.slane %v4615_v15, %v4464_v55 }
 0x5bd   :  { %v2080_v11 = vrot.slane %v4615_v15, %v4467_v58  ;;  %v2092_v24 = vrot.slane %v4615_v15, %v4577_v3  ;;  %v2141_v4 = vrot.slane %v4613_v14, %v4577_v3  ;;  %v2088_v37 = vrot.slane %v4615_v15, %v4571_v1 }
 0x5be   :  { %v2116_v25 = vmul.f32 %v2100_v50, %v4598_v7  ;;  %v2110_v27 = vmul.f32 %v2076_v22, %v4543_v42  ;;  %v2109_v29 = vmul.f32 %v2072_v26, %v4537_v33  ;;  %v2112_v31 = vmul.f32 %v2084_v40, %v4546_v43  ;;  %v2262_v50 = vld [vmem:[#allocation11 + $0x238] sm:$0xff]  ;;  %v2264_v22 = vld [vmem:[#allocation11 + $0x248] sm:$0xff] }
 0x5bf   :  { %v2111_v19 = vmul.f32 %v2080_v11, %v4540_v10  ;;  %v2114_v30 = vmul.f32 %v2092_v24, %v4594_v5  ;;  %v2527_v5 = vunpack.c.l.s8.bf16 %v2247_v41  ;;  %v2113_v63 = vmul.f32 %v2088_v37, %v4590_v60  ;;  %v2261_v11 = vld [vmem:[#allocation11 + $0x230] sm:$0xff]  ;;  %v2270_v41 = vld [vmem:[#allocation11 + $0x278] sm:$0xff] }
 0x5c0   :  { %v4647_v20 = vadd.f32 %v2149_v28, %v2116_v25  ;;  %v2159_v32 = vadd.f32 %v2125_v16, %v2110_v27  ;;  %v2158_v21 = vadd.f32 %v2121_v17, %v2109_v29  ;;  %v2161_v36 = vadd.f32 %v2133_v18, %v2112_v31  ;;  %v2269_v29 = vld [vmem:[#allocation11 + $0x270] sm:$0xff]  ;;  %v2271_v31 = vld [vmem:[#allocation11 + $0x280] sm:$0xff] }
 0x5c1   :  { %v4649_v34 = vadd.f32 %v2129_v39, %v2111_v19  ;;  %v4651_v7 = vadd.f32 %v2141_v4, %v2114_v30  ;;  %v2096_v6 = vrot.slane %v4615_v15, %v4574_v2  ;;  %v4674_v13 = vadd.f32 %v2137_v49, %v2113_v63  ;;  %v2263_v39 = vld [vmem:[#allocation11 + $0x240] sm:$0xff] }
 0x5c2   :  { %vm2167_vm8 = vcmp.gt.f32.partialorder %v2159_v32, 0.0  ;;  %v2175_v42 = vmul.f32 0.2, %v2159_v32  ;;  %vm2166_vm9 = vcmp.gt.f32.partialorder %v2158_v21, 0.0  ;;  %v2174_v33 = vmul.f32 0.2, %v2158_v21 }
 0x5c3   :  { %vm2169_vm10 = vcmp.gt.f32.partialorder %v2161_v36, 0.0  ;;  %v2177_v43 = vmul.f32 0.2, %v2161_v36  ;;  %v2145_v60 = vrot.slane %v4613_v14, %v4574_v2  ;;  %v2115_v48 = vmul.f32 %v2096_v6, %v4592_v0  ;;  %v2275_v49 = vld [vmem:[#allocation11 + $0x2a0] sm:$0xff] }
 0x5c4   :  { %v2183_v10 = vsel %vm2167_vm8, %v2159_v32, %v2175_v42  ;;  %v2182_v35 = vsel %vm2166_vm9, %v2158_v21, %v2174_v33  ;;  %v2541_v15 = vunpack.c.l.s8.bf16 %v2254_v12  ;;  %v2543_v28 = vunpack.c.l.s8.bf16 %v2256_v9  ;;  %v2283_v6 = vld [vmem:[#allocation11 + $0x2e0] sm:$0xff] }
 0x5c5   :  { %v4655_v45 = vpack.c.bf16 %v2183_v10, %v2183_v10  ;;  %v4657_v46 = vpack.c.bf16 %v2182_v35, %v2182_v35  ;;  %v2185_v47 = vsel %vm2169_vm10, %v2161_v36, %v2177_v43  ;;  %v2549_v16 = vunpack.c.h.s8.bf16 %v2255_v53  ;;  %v2268_v36 = vld [vmem:[#allocation11 + $0x268] sm:$0xff]  ;;  %v2278_v35 = vld [vmem:[#allocation11 + $0x2b8] sm:$0xff] }
 0x5c6   :  { %v4667_v59 = vpack.c.bf16 %v2185_v47, %v2185_v47  ;;  %v2551_v17 = vunpack.c.h.s8.bf16 %v2257_v54  ;;  %v4679_v18 = vadd.f32 %v2145_v60, %v2115_v48  ;;  %v2548_v26 = vunpack.c.h.s8.bf16 %v2254_v12  ;;  %v2276_v10 = vld [vmem:[#allocation11 + $0x2a8] sm:$0xff] }
 0x5c7   :  { %2903 = vmatprep.mubr.bf16.mxu0 %v4655_v45  ;;  %3067 = vmatprep.mubr.bf16.mxu1 %v4655_v45  ;;  %v2550_v14 = vunpack.c.h.s8.bf16 %v2256_v9  ;;  %v2556_v40 = vunpack.c.l.s8.bf16 %v2262_v50  ;;  %v2558_v0 = vunpack.c.l.s8.bf16 %v2264_v22  ;;  %v2555_v24 = vunpack.c.l.s8.bf16 %v2261_v11  ;;  %v2282_v9 = vld [vmem:[#allocation11 + $0x2d8] sm:$0xff]  ;;  %v2284_v60 = vld [vmem:[#allocation11 + $0x2e8] sm:$0xff] }
 0x5c8   :  { %2904 = vmatmul.mubr.bf16.vlgmr.msra.gmra.mrb[12].mxu0 %v4657_v46  ;;  %3068 = vmatmul.mubr.bf16.vlgmr.msra.gmra.mrb[20].mxu1 %v4657_v46  ;;  %v2557_v4 = vunpack.c.l.s8.bf16 %v2263_v39  ;;  %v2563_v25 = vunpack.c.h.s8.bf16 %v2262_v50  ;;  %v2565_v27 = vunpack.c.h.s8.bf16 %v2264_v22  ;;  %v2562_v19 = vunpack.c.h.s8.bf16 %v2261_v11  ;;  %v2292_v50 = vld [vmem:[#allocation11 + $0x328] sm:$0xff]  ;;  %v2291_v11 = vld [vmem:[#allocation11 + $0x320] sm:$0xff] }
 0x5c9   :  { %2913 = vmatpush1.bf16.msra.mxu0 %v2527_v5  ;;  %3077 = vmatpush1.bf16.msra.mxu1 %v2529_v38  ;;  %v2564_v30 = vunpack.c.h.s8.bf16 %v2263_v39  ;;  %v2570_v32 = vunpack.c.l.s8.bf16 %v2269_v29  ;;  %v2572_v21 = vunpack.c.l.s8.bf16 %v2271_v31  ;;  %v2569_v44 = vunpack.c.l.s8.bf16 %v2268_v36 }
 0x5ca   :  { %2944 = vmatprep.mubr.bf16.mxu0 %v4667_v59  ;;  %3108 = vmatprep.mubr.bf16.mxu1 %v4667_v59  ;;  %v2571_v42 = vunpack.c.l.s8.bf16 %v2270_v41  ;;  %v2577_v33 = vunpack.c.h.s8.bf16 %v2269_v29  ;;  %v2579_v43 = vunpack.c.h.s8.bf16 %v2271_v31  ;;  %v2576_v5 = vunpack.c.h.s8.bf16 %v2268_v36  ;;  %v2299_v29 = vld [vmem:[#allocation11 + $0x360] sm:$0xff]  ;;  %v2298_v36 = vld [vmem:[#allocation11 + $0x358] sm:$0xff] }
 0x5cb   :  { %2914 = vmatprep.subr.bf16.mxu0 %v2535_v51  ;;  %3078 = vmatprep.subr.bf16.mxu1 %v2537_v52  ;;  %v2578_v37 = vunpack.c.h.s8.bf16 %v2270_v41  ;;  %v2584_v38 = vunpack.c.l.s8.bf16 %v2276_v10  ;;  %v2586_v47 = vunpack.c.l.s8.bf16 %v2278_v35  ;;  %v2277_v51 = vld [vmem:[#allocation11 + $0x2b0] sm:$0xff]  ;;  %v2583_v52 = vunpack.c.l.s8.bf16 %v2275_v49 }
 0x5cc   :  { %v2585_v53 = vunpack.c.l.s8.bf16 %v2277_v51  ;;  %v2591_v54 = vunpack.c.h.s8.bf16 %v2276_v10  ;;  %v2593_v63 = vunpack.c.h.s8.bf16 %v2278_v35  ;;  %v2597_v48 = vunpack.c.l.s8.bf16 %v2282_v9  ;;  %v2304_v10 = vld [vmem:[#allocation11 + $0x388] sm:$0xff]  ;;  %v2306_v35 = vld [vmem:[#allocation11 + $0x398] sm:$0xff] }
 0x5cd   :  { %2915 = vmatpush1.bf16.msra.mxu0 %v2534_v8  ;;  %3079 = vmatpush1.bf16.msra.mxu1 %v2536_v23  ;;  %v2285_v8 = vld [vmem:[#allocation11 + $0x2f0] sm:$0xff]  ;;  %v2590_v23 = vunpack.c.h.s8.bf16 %v2275_v49  ;;  %v2604_v22 = vunpack.c.h.s8.bf16 %v2282_v9  ;;  %vm2168_vm11 = vcmp.gt.f32.partialorder %v4649_v34, 0.0  ;;  %vm2171_vm12 = vcmp.gt.f32.partialorder %v4651_v7, 0.0 }
 0x5ce   :  { %2916 = vmatprep.subr.bf16.mxu0 %v2542_v61  ;;  %3080 = vmatprep.subr.bf16.mxu1 %v2544_v62  ;;  %v2592_v61 = vunpack.c.h.s8.bf16 %v2277_v51  ;;  %v2598_v62 = vunpack.c.l.s8.bf16 %v2283_v6  ;;  %v2600_v12 = vunpack.c.l.s8.bf16 %v2285_v8  ;;  %v2642_v49 = vunpack.c.l.s8.bf16 %v2306_v35  ;;  %v2303_v51 = vld [vmem:[#allocation11 + $0x380] sm:$0xff] }
 0x5cf   :  { %vm2170_vm13 = vcmp.gt.f32.partialorder %v4674_v13, 0.0  ;;  %vm2173_vm14 = vcmp.gt.f32.partialorder %v4647_v20, 0.0  ;;  %vm2172_vm15 = vcmp.gt.f32.partialorder %v4679_v18, 0.0 }
 0x5d1   :  { %2917 = vmatpush1.bf16.msra.mxu0 %v2541_v15  ;;  %3081 = vmatpush1.bf16.msra.mxu1 %v2543_v28  ;;  %v2599_v15 = vunpack.c.l.s8.bf16 %v2284_v60  ;;  %v2605_v28 = vunpack.c.h.s8.bf16 %v2283_v6 }
 0x5d2   :  { %2918 = vmatprep.subr.bf16.mxu0 %v2549_v16  ;;  %3082 = vmatprep.subr.bf16.mxu1 %v2551_v17  ;;  %v2607_v16 = vunpack.c.h.s8.bf16 %v2285_v8  ;;  %v2290_v17 = vld [vmem:[#allocation11 + $0x318] sm:$0xff] }
 0x5d5   :  { %2919 = vmatpush1.bf16.msra.mxu0 %v2548_v26  ;;  %3083 = vmatpush1.bf16.msra.mxu1 %v2550_v14  ;;  %v2606_v26 = vunpack.c.h.s8.bf16 %v2284_v60  ;;  %v2612_v14 = vunpack.c.l.s8.bf16 %v2290_v17 }
 0x5d6   :  { %2920 = vmatprep.subr.bf16.mxu0 %v2556_v40  ;;  %3084 = vmatprep.subr.bf16.mxu1 %v2558_v0  ;;  %v2614_v40 = vunpack.c.l.s8.bf16 %v2292_v50  ;;  %v2289_v0 = vld [vmem:[#allocation11 + $0x310] sm:$0xff] }
 0x5d7   :  { %v2611_v39 = vunpack.c.l.s8.bf16 %v2289_v0  ;;  %v2618_v31 = vunpack.c.h.s8.bf16 %v2289_v0 }
 0x5d9   :  { %2921 = vmatpush1.bf16.msra.mxu0 %v2555_v24  ;;  %3085 = vmatpush1.bf16.msra.mxu1 %v2557_v4  ;;  %v2613_v24 = vunpack.c.l.s8.bf16 %v2291_v11  ;;  %v2619_v4 = vunpack.c.h.s8.bf16 %v2290_v17 }
 0x5da   :  { %2922 = vmatprep.subr.bf16.mxu0 %v2563_v25  ;;  %3086 = vmatprep.subr.bf16.mxu1 %v2565_v27  ;;  %v2621_v25 = vunpack.c.h.s8.bf16 %v2292_v50  ;;  %v2297_v27 = vld [vmem:[#allocation11 + $0x350] sm:$0xff] }
 0x5dd   :  { %2923 = vmatpush1.bf16.msra.mxu0 %v2562_v19  ;;  %3087 = vmatpush1.bf16.msra.mxu1 %v2564_v30  ;;  %v2620_v19 = vunpack.c.h.s8.bf16 %v2291_v11  ;;  %v2626_v30 = vunpack.c.l.s8.bf16 %v2297_v27 }
 0x5de   :  { %2924 = vmatprep.subr.bf16.mxu0 %v2570_v32  ;;  %3088 = vmatprep.subr.bf16.mxu1 %v2572_v21  ;;  %v2628_v32 = vunpack.c.l.s8.bf16 %v2299_v29  ;;  %v2296_v21 = vld [vmem:[#allocation11 + $0x348] sm:$0xff] }
 0x5df   :  { %v2625_v41 = vunpack.c.l.s8.bf16 %v2296_v21 }
 0x5e1   :  { %2925 = vmatpush1.bf16.msra.mxu0 %v2569_v44  ;;  %3089 = vmatpush1.bf16.msra.mxu1 %v2571_v42  ;;  %v2627_v44 = vunpack.c.l.s8.bf16 %v2298_v36  ;;  %v2633_v42 = vunpack.c.h.s8.bf16 %v2297_v27 }
 0x5e2   :  { %2926 = vmatprep.subr.bf16.mxu0 %v2577_v33  ;;  %3090 = vmatprep.subr.bf16.mxu1 %v2579_v43  ;;  %v2635_v33 = vunpack.c.h.s8.bf16 %v2299_v29  ;;  %v2176_v43 = vmul.f32 0.2, %v4649_v34 }
 0x5e5   :  { %2927 = vmatpush1.bf16.msra.mxu0 %v2576_v5  ;;  %3091 = vmatpush1.bf16.msra.mxu1 %v2578_v37  ;;  %v2179_v5 = vmul.f32 0.2, %v4651_v7  ;;  %v2632_v37 = vunpack.c.h.s8.bf16 %v2296_v21 }
 0x5e6   :  { %2928 = vmatprep.subr.bf16.mxu0 %v2584_v38  ;;  %3092 = vmatprep.subr.bf16.mxu1 %v2586_v47  ;;  %v2634_v38 = vunpack.c.h.s8.bf16 %v2298_v36  ;;  %v2640_v47 = vunpack.c.l.s8.bf16 %v2304_v10 }
 0x5e9   :  { %2929 = vmatpush1.bf16.msra.mxu0 %v2583_v52  ;;  %3093 = vmatpush1.bf16.msra.mxu1 %v2585_v53  ;;  %v2184_v52 = vsel %vm2168_vm11, %v4649_v34, %v2176_v43  ;;  %v2305_v53 = vld [vmem:[#allocation11 + $0x390] sm:$0xff] }
 0x5ea   :  { %2930 = vmatprep.subr.bf16.mxu0 %v2591_v54  ;;  %3094 = vmatprep.subr.bf16.mxu1 %v2593_v63  ;;  %v2187_v54 = vsel %vm2171_vm12, %v4651_v7, %v2179_v5  ;;  %v2639_v63 = vunpack.c.l.s8.bf16 %v2303_v51  ;;  %v4687_v6 = vpack.c.bf16 %v2184_v52, %v2184_v52  ;;  %v2641_v8 = vunpack.c.l.s8.bf16 %v2305_v53  ;;  %v2313_v34 = vld [vmem:[#allocation11 + $0x3d0] sm:$0xff]  ;;  %v2332_v5 = vld [vmem:[#allocation11 + $0x468] sm:$0xff] }
 0x5eb   :  { %v2646_v7 = vunpack.c.h.s8.bf16 %v2303_v51  ;;  %v2648_v9 = vunpack.c.h.s8.bf16 %v2305_v53  ;;  %v2331_v51 = vld [vmem:[#allocation11 + $0x460] sm:$0xff]  ;;  %v2333_v53 = vld [vmem:[#allocation11 + $0x470] sm:$0xff] }
 0x5ed   :  { %2931 = vmatpush1.bf16.msra.mxu0 %v2590_v23  ;;  %3095 = vmatpush1.bf16.msra.mxu1 %v2592_v61  ;;  %v4689_v23 = vpack.c.bf16 %v2187_v54, %v2187_v54  ;;  %v2647_v61 = vunpack.c.h.s8.bf16 %v2304_v10  ;;  %v2695_v54 = vunpack.c.l.s8.bf16 %v2331_v51 }
 0x5ee   :  { %2932 = vmatprep.subr.bf16.mxu0 %v2598_v62  ;;  %3096 = vmatprep.subr.bf16.mxu1 %v2600_v12  ;;  %v2649_v62 = vunpack.c.h.s8.bf16 %v2306_v35  ;;  %v2311_v12 = vld [vmem:[#allocation11 + $0x3c0] sm:$0xff] }
 0x5ef   :  { %v2654_v60 = vunpack.c.l.s8.bf16 %v2311_v12  ;;  %v2661_v50 = vunpack.c.h.s8.bf16 %v2311_v12  ;;  %v2341_v12 = vld [vmem:[#allocation11 + $0x4b0] sm:$0xff] }
 0x5f1   :  { %2933 = vmatpush1.bf16.msra.mxu0 %v2597_v48  ;;  %3097 = vmatpush1.bf16.msra.mxu1 %v2599_v15  ;;  %v2310_v48 = vld [vmem:[#allocation11 + $0x3b8] sm:$0xff]  ;;  %v2656_v15 = vunpack.c.l.s8.bf16 %v2313_v34 }
 0x5f2   :  { %2934 = vmatprep.subr.bf16.mxu0 %v2605_v28  ;;  %3098 = vmatprep.subr.bf16.mxu1 %v2607_v16  ;;  %v2312_v28 = vld [vmem:[#allocation11 + $0x3c8] sm:$0xff]  ;;  %v2653_v16 = vunpack.c.l.s8.bf16 %v2310_v48 }
 0x5f3   :  { %v2655_v17 = vunpack.c.l.s8.bf16 %v2312_v28  ;;  %v2662_v0 = vunpack.c.h.s8.bf16 %v2312_v28 }
 0x5f5   :  { %2935 = vmatpush1.bf16.msra.mxu0 %v2604_v22  ;;  %3099 = vmatpush1.bf16.msra.mxu1 %v2606_v26  ;;  %v2663_v22 = vunpack.c.h.s8.bf16 %v2313_v34  ;;  %v2318_v26 = vld [vmem:[#allocation11 + $0x3f8] sm:$0xff]  ;;  %v2702_v34 = vunpack.c.h.s8.bf16 %v2331_v51 }
 0x5f6   :  { %2936 = vmatprep.subr.bf16.mxu0 %v2612_v14  ;;  %3100 = vmatprep.subr.bf16.mxu1 %v2614_v40  ;;  %v2320_v14 = vld [vmem:[#allocation11 + $0x408] sm:$0xff]  ;;  %v2660_v40 = vunpack.c.h.s8.bf16 %v2310_v48  ;;  %v2668_v11 = vunpack.c.l.s8.bf16 %v2318_v26  ;;  %v2675_v29 = vunpack.c.h.s8.bf16 %v2318_v26  ;;  %v2712_v48 = vunpack.c.l.s8.bf16 %v2341_v12 }
 0x5f7   :  { %v2348_v26 = vld [vmem:[#allocation11 + $0x4e8] sm:$0xff] }
 0x5f9   :  { %2937 = vmatpush1.bf16.msra.mxu0 %v2611_v39  ;;  %3101 = vmatpush1.bf16.msra.mxu1 %v2613_v24  ;;  %v2317_v39 = vld [vmem:[#allocation11 + $0x3f0] sm:$0xff]  ;;  %v2670_v24 = vunpack.c.l.s8.bf16 %v2320_v14 }
 0x5fa   :  { %2938 = vmatprep.subr.bf16.mxu0 %v2619_v4  ;;  %3102 = vmatprep.subr.bf16.mxu1 %v2621_v25  ;;  %v2319_v4 = vld [vmem:[#allocation11 + $0x400] sm:$0xff]  ;;  %v2667_v25 = vunpack.c.l.s8.bf16 %v2317_v39 }
 0x5fb   :  { %v2669_v27 = vunpack.c.l.s8.bf16 %v2319_v4  ;;  %v2676_v21 = vunpack.c.h.s8.bf16 %v2319_v4 }
 0x5fd   :  { %2939 = vmatpush1.bf16.msra.mxu0 %v2618_v31  ;;  %3103 = vmatpush1.bf16.msra.mxu1 %v2620_v19  ;;  %v2677_v31 = vunpack.c.h.s8.bf16 %v2320_v14  ;;  %v2325_v19 = vld [vmem:[#allocation11 + $0x430] sm:$0xff] }
 0x5fe   :  { %2940 = vmatprep.subr.bf16.mxu0 %v2626_v30  ;;  %3104 = vmatprep.subr.bf16.mxu1 %v2628_v32  ;;  %v2327_v30 = vld [vmem:[#allocation11 + $0x440] sm:$0xff]  ;;  %v2674_v32 = vunpack.c.h.s8.bf16 %v2317_v39  ;;  %v2682_v36 = vunpack.c.l.s8.bf16 %v2325_v19  ;;  %v2689_v10 = vunpack.c.h.s8.bf16 %v2325_v19  ;;  %v2726_v39 = vunpack.c.l.s8.bf16 %v2348_v26 }
 0x5ff   :  { %v2691_v35 = vunpack.c.h.s8.bf16 %v2327_v30  ;;  %v2355_v19 = vld [vmem:[#allocation11 + $0x520] sm:$0xff] }
 0x601   :  { %2941 = vmatpush1.bf16.msra.mxu0 %v2625_v41  ;;  %3105 = vmatpush1.bf16.msra.mxu1 %v2627_v44  ;;  %v2324_v41 = vld [vmem:[#allocation11 + $0x428] sm:$0xff]  ;;  %v2684_v44 = vunpack.c.l.s8.bf16 %v2327_v30 }
 0x602   :  { %2942 = vmatprep.subr.bf16.mxu0 %v2633_v42  ;;  %3106 = vmatprep.subr.bf16.mxu1 %v2635_v33  ;;  %v2326_v42 = vld [vmem:[#allocation11 + $0x438] sm:$0xff]  ;;  %v2681_v33 = vunpack.c.l.s8.bf16 %v2324_v41 }
 0x603   :  { %v2683_v43 = vunpack.c.l.s8.bf16 %v2326_v42 }
 0x605   :  { %2943 = vmatpush1.bf16.msra.mxu0 %v2632_v37  ;;  %3107 = vmatpush1.bf16.msra.mxu1 %v2634_v38  ;;  %v2334_v37 = vld [vmem:[#allocation11 + $0x478] sm:$0xff]  ;;  %v2688_v38 = vunpack.c.h.s8.bf16 %v2324_v41  ;;  %v2740_v41 = vunpack.c.l.s8.bf16 %v2355_v19 }
 0x606   :  { %2953 = vmatprep.subr.bf16.mxu0 %v2640_v47  ;;  %3117 = vmatprep.subr.bf16.mxu1 %v2642_v49  ;;  %v2690_v47 = vunpack.c.h.s8.bf16 %v2326_v42  ;;  %v2696_v49 = vunpack.c.l.s8.bf16 %v2332_v5  ;;  %v2698_v52 = vunpack.c.l.s8.bf16 %v2334_v37 }
 0x608   :  { %2945 = vmatmul.mubr.bf16.vlgmr.msra.gmra.mrb[12].mxu0 %v4687_v6  ;;  %3109 = vmatmul.mubr.bf16.vlgmr.msra.gmra.mrb[20].mxu1 %v4687_v6 }
 0x609   :  { %2954 = vmatpush1.bf16.msra.mxu0 %v2639_v63  ;;  %2985 = vmatprep.mubr.bf16.mxu0 %v4689_v23  ;;  %v2697_v63 = vunpack.c.l.s8.bf16 %v2333_v53 }
 0x60a   :  { %3118 = vmatpush1.bf16.msra.mxu1 %v2641_v8  ;;  %3149 = vmatprep.mubr.bf16.mxu1 %v4689_v23  ;;  %v2703_v8 = vunpack.c.h.s8.bf16 %v2332_v5  ;;  %v2360_v5 = vld [vmem:[#allocation11 + $0x548] sm:$0xff] }
 0x60b   :  { %2955 = vmatprep.subr.bf16.mxu0 %v2647_v61  ;;  %3119 = vmatprep.subr.bf16.mxu1 %v2649_v62  ;;  %v2705_v61 = vunpack.c.h.s8.bf16 %v2334_v37  ;;  %v2339_v62 = vld [vmem:[#allocation11 + $0x4a0] sm:$0xff]  ;;  %v2362_v37 = vld [vmem:[#allocation11 + $0x558] sm:$0xff]  ;;  %v2752_v51 = vunpack.c.l.s8.bf16 %v2360_v5 }
 0x60d   :  { %2956 = vmatpush1.bf16.msra.mxu0 %v2646_v7  ;;  %v2704_v7 = vunpack.c.h.s8.bf16 %v2333_v53 }
 0x60e   :  { %3120 = vmatpush1.bf16.msra.mxu1 %v2648_v9  ;;  %2957 = vmatprep.subr.bf16.mxu0 %v2654_v60  ;;  %v2710_v9 = vunpack.c.l.s8.bf16 %v2339_v62  ;;  %v2338_v60 = vld [vmem:[#allocation11 + $0x498] sm:$0xff] }
 0x60f   :  { %3121 = vmatprep.subr.bf16.mxu1 %v2656_v15  ;;  %v2340_v15 = vld [vmem:[#allocation11 + $0x4a8] sm:$0xff]  ;;  %v2709_v28 = vunpack.c.l.s8.bf16 %v2338_v60  ;;  %v2716_v14 = vunpack.c.h.s8.bf16 %v2338_v60  ;;  %v2761_v60 = vunpack.c.h.s8.bf16 %v2362_v37 }
 0x611   :  { %2958 = vmatpush1.bf16.msra.mxu0 %v2653_v16  ;;  %v2711_v16 = vunpack.c.l.s8.bf16 %v2340_v15 }
 0x612   :  { %3122 = vmatpush1.bf16.msra.mxu1 %v2655_v17  ;;  %2959 = vmatprep.subr.bf16.mxu0 %v2661_v50  ;;  %v2717_v17 = vunpack.c.h.s8.bf16 %v2339_v62  ;;  %v2719_v50 = vunpack.c.h.s8.bf16 %v2341_v12 }
 0x613   :  { %3123 = vmatprep.subr.bf16.mxu1 %v2663_v22  ;;  %v2346_v22 = vld [vmem:[#allocation11 + $0x4d8] sm:$0xff] }
 0x615   :  { %2960 = vmatpush1.bf16.msra.mxu0 %v2660_v40  ;;  %v2718_v40 = vunpack.c.h.s8.bf16 %v2340_v15 }
 0x616   :  { %3124 = vmatpush1.bf16.msra.mxu1 %v2662_v0  ;;  %2961 = vmatprep.subr.bf16.mxu0 %v2668_v11  ;;  %v2724_v0 = vunpack.c.l.s8.bf16 %v2346_v22  ;;  %v2345_v11 = vld [vmem:[#allocation11 + $0x4d0] sm:$0xff] }
 0x617   :  { %3125 = vmatprep.subr.bf16.mxu1 %v2670_v24  ;;  %v2347_v24 = vld [vmem:[#allocation11 + $0x4e0] sm:$0xff]  ;;  %v2723_v4 = vunpack.c.l.s8.bf16 %v2345_v11  ;;  %v2730_v30 = vunpack.c.h.s8.bf16 %v2345_v11 }
 0x619   :  { %2962 = vmatpush1.bf16.msra.mxu0 %v2667_v25  ;;  %v2725_v25 = vunpack.c.l.s8.bf16 %v2347_v24 }
 0x61a   :  { %3126 = vmatpush1.bf16.msra.mxu1 %v2669_v27  ;;  %2963 = vmatprep.subr.bf16.mxu0 %v2675_v29  ;;  %v2731_v27 = vunpack.c.h.s8.bf16 %v2346_v22  ;;  %v2733_v29 = vunpack.c.h.s8.bf16 %v2348_v26 }
 0x61b   :  { %3127 = vmatprep.subr.bf16.mxu1 %v2677_v31  ;;  %v2353_v31 = vld [vmem:[#allocation11 + $0x510] sm:$0xff] }
 0x61d   :  { %2964 = vmatpush1.bf16.msra.mxu0 %v2674_v32  ;;  %v2732_v32 = vunpack.c.h.s8.bf16 %v2347_v24 }
 0x61e   :  { %3128 = vmatpush1.bf16.msra.mxu1 %v2676_v21  ;;  %2965 = vmatprep.subr.bf16.mxu0 %v2682_v36  ;;  %v2738_v21 = vunpack.c.l.s8.bf16 %v2353_v31  ;;  %v2352_v36 = vld [vmem:[#allocation11 + $0x508] sm:$0xff] }
 0x61f   :  { %3129 = vmatprep.subr.bf16.mxu1 %v2684_v44  ;;  %v2354_v44 = vld [vmem:[#allocation11 + $0x518] sm:$0xff]  ;;  %v2737_v42 = vunpack.c.l.s8.bf16 %v2352_v36 }
 0x621   :  { %2966 = vmatpush1.bf16.msra.mxu0 %v2681_v33  ;;  %v2739_v33 = vunpack.c.l.s8.bf16 %v2354_v44 }
 0x622   :  { %3130 = vmatpush1.bf16.msra.mxu1 %v2683_v43  ;;  %2967 = vmatprep.subr.bf16.mxu0 %v2689_v10  ;;  %v2745_v43 = vunpack.c.h.s8.bf16 %v2353_v31  ;;  %v2747_v10 = vunpack.c.h.s8.bf16 %v2355_v19 }
 0x623   :  { %3131 = vmatprep.subr.bf16.mxu1 %v2691_v35  ;;  %v2178_v35 = vmul.f32 0.2, %v4674_v13 }
 0x625   :  { %2968 = vmatpush1.bf16.msra.mxu0 %v2688_v38  ;;  %v2744_v38 = vunpack.c.h.s8.bf16 %v2352_v36  ;;  %v2186_v53 = vsel %vm2170_vm13, %v4674_v13, %v2178_v35  ;;  %v2369_v13 = vld [vmem:[#allocation11 + $0x590] sm:$0xff] }
 0x626   :  { %3132 = vmatpush1.bf16.msra.mxu1 %v2690_v47  ;;  %2969 = vmatprep.subr.bf16.mxu0 %v2696_v49  ;;  %v2181_v47 = vmul.f32 0.2, %v4647_v20  ;;  %v2746_v49 = vunpack.c.h.s8.bf16 %v2354_v44  ;;  %v4701_v62 = vpack.c.bf16 %v2186_v53, %v2186_v53  ;;  %v2387_v53 = vld [vmem:[#allocation11 + $0x620] sm:$0xff] }
 0x627   :  { %3133 = vmatprep.subr.bf16.mxu1 %v2698_v52  ;;  %v2359_v52 = vld [vmem:[#allocation11 + $0x540] sm:$0xff] }
 0x629   :  { %2970 = vmatpush1.bf16.msra.mxu0 %v2695_v54  ;;  %v2754_v54 = vunpack.c.l.s8.bf16 %v2362_v37 }
 0x62a   :  { %3134 = vmatpush1.bf16.msra.mxu1 %v2697_v63  ;;  %2971 = vmatprep.subr.bf16.mxu0 %v2703_v8  ;;  %v2361_v63 = vld [vmem:[#allocation11 + $0x550] sm:$0xff]  ;;  %v2751_v8 = vunpack.c.l.s8.bf16 %v2359_v52 }
 0x62b   :  { %3135 = vmatprep.subr.bf16.mxu1 %v2705_v61  ;;  %v2189_v61 = vsel %vm2173_vm14, %v4647_v20, %v2181_v47  ;;  %v2753_v12 = vunpack.c.l.s8.bf16 %v2361_v63  ;;  %v2760_v20 = vunpack.c.h.s8.bf16 %v2361_v63  ;;  %v2390_v47 = vld [vmem:[#allocation11 + $0x638] sm:$0xff]  ;;  %v2389_v63 = vld [vmem:[#allocation11 + $0x630] sm:$0xff] }
 0x62d   :  { %2972 = vmatpush1.bf16.msra.mxu0 %v2702_v34  ;;  %v2759_v34 = vunpack.c.h.s8.bf16 %v2360_v5 }
 0x62e   :  { %3136 = vmatpush1.bf16.msra.mxu1 %v2704_v7  ;;  %2973 = vmatprep.subr.bf16.mxu0 %v2710_v9  ;;  %v2367_v7 = vld [vmem:[#allocation11 + $0x580] sm:$0xff]  ;;  %v4704_v9 = vpack.c.bf16 %v2189_v61, %v2189_v61  ;;  %v2809_v61 = vunpack.c.l.s8.bf16 %v2389_v63 }
 0x62f   :  { %3137 = vmatprep.subr.bf16.mxu1 %v2712_v48  ;;  %v2758_v48 = vunpack.c.h.s8.bf16 %v2359_v52  ;;  %v2766_v15 = vunpack.c.l.s8.bf16 %v2367_v7  ;;  %v2773_v26 = vunpack.c.h.s8.bf16 %v2367_v7  ;;  %v2395_v7 = vld [vmem:[#allocation11 + $0x660] sm:$0xff] }
 0x631   :  { %2974 = vmatpush1.bf16.msra.mxu0 %v2709_v28  ;;  %v2366_v28 = vld [vmem:[#allocation11 + $0x578] sm:$0xff] }
 0x632   :  { %3138 = vmatpush1.bf16.msra.mxu1 %v2711_v16  ;;  %2975 = vmatprep.subr.bf16.mxu0 %v2717_v17  ;;  %v2768_v16 = vunpack.c.l.s8.bf16 %v2369_v13  ;;  %v2368_v17 = vld [vmem:[#allocation11 + $0x588] sm:$0xff]  ;;  %v2772_v11 = vunpack.c.h.s8.bf16 %v2366_v28 }
 0x633   :  { %3139 = vmatprep.subr.bf16.mxu1 %v2719_v50  ;;  %v2765_v50 = vunpack.c.l.s8.bf16 %v2366_v28  ;;  %v2767_v22 = vunpack.c.l.s8.bf16 %v2368_v17 }
 0x635   :  { %2976 = vmatpush1.bf16.msra.mxu0 %v2716_v14  ;;  %v2775_v14 = vunpack.c.h.s8.bf16 %v2369_v13  ;;  %v2814_v13 = vunpack.c.h.s8.bf16 %v2387_v53 }
 0x636   :  { %3140 = vmatpush1.bf16.msra.mxu1 %v2718_v40  ;;  %2977 = vmatprep.subr.bf16.mxu0 %v2724_v0  ;;  %v2374_v40 = vld [vmem:[#allocation11 + $0x5b8] sm:$0xff]  ;;  %v2376_v0 = vld [vmem:[#allocation11 + $0x5c8] sm:$0xff] }
 0x637   :  { %3141 = vmatprep.subr.bf16.mxu1 %v2726_v39  ;;  %v2774_v39 = vunpack.c.h.s8.bf16 %v2368_v17  ;;  %v2780_v24 = vunpack.c.l.s8.bf16 %v2374_v40  ;;  %v2787_v19 = vunpack.c.h.s8.bf16 %v2374_v40  ;;  %v2404_v40 = vld [vmem:[#allocation11 + $0x6a8] sm:$0xff] }
 0x639   :  { %2978 = vmatpush1.bf16.msra.mxu0 %v2723_v4  ;;  %v2373_v4 = vld [vmem:[#allocation11 + $0x5b0] sm:$0xff] }
 0x63a   :  { %3142 = vmatpush1.bf16.msra.mxu1 %v2725_v25  ;;  %2979 = vmatprep.subr.bf16.mxu0 %v2731_v27  ;;  %v2782_v25 = vunpack.c.l.s8.bf16 %v2376_v0  ;;  %v2375_v27 = vld [vmem:[#allocation11 + $0x5c0] sm:$0xff]  ;;  %v2786_v36 = vunpack.c.h.s8.bf16 %v2373_v4 }
 0x63b   :  { %3143 = vmatprep.subr.bf16.mxu1 %v2733_v29  ;;  %v2779_v29 = vunpack.c.l.s8.bf16 %v2373_v4  ;;  %v2781_v31 = vunpack.c.l.s8.bf16 %v2375_v27  ;;  %v2838_v4 = vunpack.c.l.s8.bf16 %v2404_v40 }
 0x63d   :  { %2980 = vmatpush1.bf16.msra.mxu0 %v2730_v30  ;;  %v2789_v30 = vunpack.c.h.s8.bf16 %v2376_v0 }
 0x63e   :  { %3144 = vmatpush1.bf16.msra.mxu1 %v2732_v32  ;;  %2981 = vmatprep.subr.bf16.mxu0 %v2738_v21  ;;  %v2381_v32 = vld [vmem:[#allocation11 + $0x5f0] sm:$0xff]  ;;  %v2383_v21 = vld [vmem:[#allocation11 + $0x600] sm:$0xff] }
 0x63f   :  { %3145 = vmatprep.subr.bf16.mxu1 %v2740_v41  ;;  %v2788_v41 = vunpack.c.h.s8.bf16 %v2375_v27  ;;  %v2794_v44 = vunpack.c.l.s8.bf16 %v2381_v32  ;;  %v2801_v5 = vunpack.c.h.s8.bf16 %v2381_v32  ;;  %v2803_v37 = vunpack.c.h.s8.bf16 %v2383_v21  ;;  %v2411_v32 = vld [vmem:[#allocation11 + $0x6e0] sm:$0xff] }
 0x641   :  { %2982 = vmatpush1.bf16.msra.mxu0 %v2737_v42  ;;  %v2380_v42 = vld [vmem:[#allocation11 + $0x5e8] sm:$0xff] }
 0x642   :  { %3146 = vmatpush1.bf16.msra.mxu1 %v2739_v33  ;;  %2983 = vmatprep.subr.bf16.mxu0 %v2745_v43  ;;  %v2796_v33 = vunpack.c.l.s8.bf16 %v2383_v21  ;;  %v2382_v43 = vld [vmem:[#allocation11 + $0x5f8] sm:$0xff] }
 0x643   :  { %3147 = vmatprep.subr.bf16.mxu1 %v2747_v10  ;;  %v2793_v10 = vunpack.c.l.s8.bf16 %v2380_v42  ;;  %v2795_v35 = vunpack.c.l.s8.bf16 %v2382_v43 }
 0x645   :  { %2984 = vmatpush1.bf16.msra.mxu0 %v2744_v38  ;;  %v2388_v38 = vld [vmem:[#allocation11 + $0x628] sm:$0xff] }
 0x646   :  { %3148 = vmatpush1.bf16.msra.mxu1 %v2746_v49  ;;  %2994 = vmatprep.subr.bf16.mxu0 %v2752_v51  ;;  %v2800_v49 = vunpack.c.h.s8.bf16 %v2380_v42  ;;  %v2802_v51 = vunpack.c.h.s8.bf16 %v2382_v43  ;;  %v2808_v52 = vunpack.c.l.s8.bf16 %v2388_v38  ;;  %v2852_v42 = vunpack.c.l.s8.bf16 %v2411_v32 }
 0x647   :  { %3158 = vmatprep.subr.bf16.mxu1 %v2754_v54  ;;  %v2810_v54 = vunpack.c.l.s8.bf16 %v2390_v47 }
 0x648   :  { %2986 = vmatmul.mubr.bf16.vlgmr.msra.gmra.mrb[12].mxu0 %v4701_v62 }
 0x649   :  { %3150 = vmatmul.mubr.bf16.vlgmr.msra.gmra.mrb[20].mxu1 %v4701_v62  ;;  %2995 = vmatpush1.bf16.msra.mxu0 %v2751_v8  ;;  %v2807_v8 = vunpack.c.l.s8.bf16 %v2387_v53  ;;  %v2195_v53 = vld [vmem:[#allocation11 + $0x20] sm:$0xff] }
 0x64a   :  { %3026 = vmatprep.mubr.bf16.mxu0 %v4704_v9  ;;  %3159 = vmatpush1.bf16.msra.mxu1 %v2753_v12  ;;  %v2815_v12 = vunpack.c.h.s8.bf16 %v2388_v38  ;;  %v2196_v38 = vld [vmem:[#allocation11 + $0x28] sm:$0xff] }
 0x64b   :  { %3190 = vmatprep.mubr.bf16.mxu1 %v4704_v9  ;;  %2996 = vmatprep.subr.bf16.mxu0 %v2759_v34  ;;  %v2817_v34 = vunpack.c.h.s8.bf16 %v2390_v47  ;;  %v2225_v47 = vld [vmem:[#allocation11 + $0x110] sm:$0xff] }
 0x64c   :  { %3160 = vmatprep.subr.bf16.mxu1 %v2761_v60  ;;  %v2397_v60 = vld [vmem:[#allocation11 + $0x670] sm:$0xff] }
 0x64d   :  { %2997 = vmatpush1.bf16.msra.mxu0 %v2758_v48  ;;  %v2816_v48 = vunpack.c.h.s8.bf16 %v2389_v63  ;;  %v2824_v28 = vunpack.c.l.s8.bf16 %v2397_v60  ;;  %v2477_v63 = vunpack.c.l.s8.bf16 %v2225_v47 }
 0x64e   :  { %3161 = vmatpush1.bf16.msra.mxu1 %v2760_v20  ;;  %2998 = vmatprep.subr.bf16.mxu0 %v2766_v15  ;;  %v2822_v20 = vunpack.c.l.s8.bf16 %v2395_v7  ;;  %v2394_v15 = vld [vmem:[#allocation11 + $0x658] sm:$0xff] }
 0x64f   :  { %3162 = vmatprep.subr.bf16.mxu1 %v2768_v16  ;;  %v2396_v16 = vld [vmem:[#allocation11 + $0x668] sm:$0xff]  ;;  %v2821_v17 = vunpack.c.l.s8.bf16 %v2394_v15  ;;  %v2828_v0 = vunpack.c.h.s8.bf16 %v2394_v15 }
 0x651   :  { %2999 = vmatpush1.bf16.msra.mxu0 %v2765_v50  ;;  %v2823_v50 = vunpack.c.l.s8.bf16 %v2396_v16 }
 0x652   :  { %3163 = vmatpush1.bf16.msra.mxu1 %v2767_v22  ;;  %3000 = vmatprep.subr.bf16.mxu0 %v2773_v26  ;;  %v2829_v22 = vunpack.c.h.s8.bf16 %v2395_v7  ;;  %v2831_v26 = vunpack.c.h.s8.bf16 %v2397_v60  ;;  %v2427_v7 = vunpack.c.h.s8.bf16 %v2196_v38  ;;  %v2203_v60 = vld [vmem:[#allocation11 + $0x60] sm:$0xff] }
 0x653   :  { %3164 = vmatprep.subr.bf16.mxu1 %v2775_v14  ;;  %v2402_v14 = vld [vmem:[#allocation11 + $0x698] sm:$0xff]  ;;  %v2434_v15 = vunpack.c.l.s8.bf16 %v2203_v60 }
 0x655   :  { %3001 = vmatpush1.bf16.msra.mxu0 %v2772_v11  ;;  %v2830_v11 = vunpack.c.h.s8.bf16 %v2396_v16 }
 0x656   :  { %3165 = vmatpush1.bf16.msra.mxu1 %v2774_v39  ;;  %3002 = vmatprep.subr.bf16.mxu0 %v2780_v24  ;;  %v2836_v39 = vunpack.c.l.s8.bf16 %v2402_v14  ;;  %v2401_v24 = vld [vmem:[#allocation11 + $0x690] sm:$0xff] }
 0x657   :  { %3166 = vmatprep.subr.bf16.mxu1 %v2782_v25  ;;  %v2403_v25 = vld [vmem:[#allocation11 + $0x6a0] sm:$0xff]  ;;  %v2835_v27 = vunpack.c.l.s8.bf16 %v2401_v24  ;;  %v2842_v21 = vunpack.c.h.s8.bf16 %v2401_v24  ;;  %v2209_v24 = vld [vmem:[#allocation11 + $0x90] sm:$0xff] }
 0x659   :  { %3003 = vmatpush1.bf16.msra.mxu0 %v2779_v29  ;;  %v2837_v29 = vunpack.c.l.s8.bf16 %v2403_v25 }
 0x65a   :  { %3167 = vmatpush1.bf16.msra.mxu1 %v2781_v31  ;;  %3004 = vmatprep.subr.bf16.mxu0 %v2787_v19  ;;  %v2843_v31 = vunpack.c.h.s8.bf16 %v2402_v14  ;;  %v2845_v19 = vunpack.c.h.s8.bf16 %v2404_v40  ;;  %v2210_v40 = vld [vmem:[#allocation11 + $0x98] sm:$0xff] }
 0x65b   :  { %3168 = vmatprep.subr.bf16.mxu1 %v2789_v30  ;;  %v2409_v30 = vld [vmem:[#allocation11 + $0x6d0] sm:$0xff] }
 0x65d   :  { %3005 = vmatpush1.bf16.msra.mxu0 %v2786_v36  ;;  %v2844_v36 = vunpack.c.h.s8.bf16 %v2403_v25  ;;  %v2211_v25 = vld [vmem:[#allocation11 + $0xa0] sm:$0xff] }
 0x65e   :  { %3169 = vmatpush1.bf16.msra.mxu1 %v2788_v41  ;;  %3006 = vmatprep.subr.bf16.mxu0 %v2794_v44  ;;  %v2850_v41 = vunpack.c.l.s8.bf16 %v2409_v30  ;;  %v2408_v44 = vld [vmem:[#allocation11 + $0x6c8] sm:$0xff] }
 0x65f   :  { %3170 = vmatprep.subr.bf16.mxu1 %v2796_v33  ;;  %v2410_v33 = vld [vmem:[#allocation11 + $0x6d8] sm:$0xff]  ;;  %v2849_v43 = vunpack.c.l.s8.bf16 %v2408_v44 }
 0x661   :  { %3007 = vmatpush1.bf16.msra.mxu0 %v2793_v10  ;;  %v2851_v10 = vunpack.c.l.s8.bf16 %v2410_v33 }
 0x662   :  { %3171 = vmatpush1.bf16.msra.mxu1 %v2795_v35  ;;  %3008 = vmatprep.subr.bf16.mxu0 %v2801_v5  ;;  %v2857_v35 = vunpack.c.h.s8.bf16 %v2409_v30  ;;  %v2859_v5 = vunpack.c.h.s8.bf16 %v2411_v32  ;;  %v2217_v30 = vld [vmem:[#allocation11 + $0xd0] sm:$0xff]  ;;  %v2246_v32 = vld [vmem:[#allocation11 + $0x1b8] sm:$0xff] }
 0x663   :  { %3172 = vmatprep.subr.bf16.mxu1 %v2803_v37  ;;  %v2180_v37 = vmul.f32 0.2, %v4679_v18 }
 0x665   :  { %3009 = vmatpush1.bf16.msra.mxu0 %v2800_v49  ;;  %v2856_v49 = vunpack.c.h.s8.bf16 %v2408_v44  ;;  %v2216_v44 = vld [vmem:[#allocation11 + $0xc8] sm:$0xff] }
 0x666   :  { %3173 = vmatpush1.bf16.msra.mxu1 %v2802_v51  ;;  %3010 = vmatprep.subr.bf16.mxu0 %v2808_v52  ;;  %v2858_v51 = vunpack.c.h.s8.bf16 %v2410_v33  ;;  %v2420_v52 = vunpack.c.l.s8.bf16 %v2196_v38  ;;  %v2218_v33 = vld [vmem:[#allocation11 + $0xd8] sm:$0xff]  ;;  %v2281_v38 = vld [vmem:[#allocation11 + $0x2d0] sm:$0xff] }
 0x667   :  { %3174 = vmatprep.subr.bf16.mxu1 %v2810_v54  ;;  %v2188_v54 = vsel %vm2172_vm15, %v4679_v18, %v2180_v37  ;;  %v2426_v18 = vunpack.c.h.s8.bf16 %v2195_v53  ;;  %v2224_v37 = vld [vmem:[#allocation11 + $0x108] sm:$0xff] }
 0x669   :  { %3011 = vmatpush1.bf16.msra.mxu0 %v2807_v8  ;;  %v2197_v8 = vld [vmem:[#allocation11 + $0x30] sm:$0xff] }
 0x66a   :  { %3175 = vmatpush1.bf16.msra.mxu1 %v2809_v61  ;;  %3012 = vmatprep.subr.bf16.mxu0 %v2815_v12  ;;  %v2419_v61 = vunpack.c.l.s8.bf16 %v2195_v53  ;;  %v4712_v12 = vpack.c.bf16 %v2188_v54, %v2188_v54  ;;  %v2589_v53 = vunpack.c.l.s8.bf16 %v2281_v38  ;;  %v2253_v54 = vld [vmem:[#allocation11 + $0x1f0] sm:$0xff] }
 0x66b   :  { %3176 = vmatprep.subr.bf16.mxu1 %v2817_v34  ;;  %v2421_v34 = vunpack.c.l.s8.bf16 %v2197_v8 }
 0x66d   :  { %3013 = vmatpush1.bf16.msra.mxu0 %v2814_v13  ;;  %v2484_v13 = vunpack.c.h.s8.bf16 %v2225_v47  ;;  %v2468_v47 = vunpack.c.h.s8.bf16 %v2216_v44 }
 0x66e   :  { %3177 = vmatpush1.bf16.msra.mxu1 %v2816_v48  ;;  %3014 = vmatprep.subr.bf16.mxu0 %v2822_v20  ;;  %v2232_v48 = vld [vmem:[#allocation11 + $0x148] sm:$0xff]  ;;  %v2428_v20 = vunpack.c.h.s8.bf16 %v2197_v8  ;;  %v2533_v8 = vunpack.c.l.s8.bf16 %v2253_v54 }
 0x66f   :  { %3178 = vmatprep.subr.bf16.mxu1 %v2824_v28  ;;  %v2202_v28 = vld [vmem:[#allocation11 + $0x58] sm:$0xff]  ;;  %v2491_v16 = vunpack.c.l.s8.bf16 %v2232_v48  ;;  %v2498_v14 = vunpack.c.h.s8.bf16 %v2232_v48  ;;  %v2540_v48 = vunpack.c.h.s8.bf16 %v2253_v54 }
 0x671   :  { %3015 = vmatpush1.bf16.msra.mxu0 %v2821_v17  ;;  %v2204_v17 = vld [vmem:[#allocation11 + $0x68] sm:$0xff] }
 0x672   :  { %3179 = vmatpush1.bf16.msra.mxu1 %v2823_v50  ;;  %3016 = vmatprep.subr.bf16.mxu0 %v2829_v22  ;;  %v2433_v50 = vunpack.c.l.s8.bf16 %v2202_v28  ;;  %v2435_v22 = vunpack.c.l.s8.bf16 %v2204_v17 }
 0x673   :  { %3180 = vmatprep.subr.bf16.mxu1 %v2831_v26  ;;  %v2441_v26 = vunpack.c.h.s8.bf16 %v2203_v60  ;;  %v2288_v60 = vld [vmem:[#allocation11 + $0x308] sm:$0xff] }
 0x675   :  { %3017 = vmatpush1.bf16.msra.mxu0 %v2828_v0  ;;  %v2239_v0 = vld [vmem:[#allocation11 + $0x180] sm:$0xff] }
 0x676   :  { %3181 = vmatpush1.bf16.msra.mxu1 %v2830_v11  ;;  %3018 = vmatprep.subr.bf16.mxu0 %v2836_v39  ;;  %v2440_v11 = vunpack.c.h.s8.bf16 %v2202_v28  ;;  %v2442_v39 = vunpack.c.h.s8.bf16 %v2204_v17  ;;  %v2260_v28 = vld [vmem:[#allocation11 + $0x228] sm:$0xff] }
 0x677   :  { %3182 = vmatprep.subr.bf16.mxu1 %v2838_v4  ;;  %v2505_v4 = vunpack.c.l.s8.bf16 %v2239_v0  ;;  %v2547_v17 = vunpack.c.l.s8.bf16 %v2260_v28 }
 0x679   :  { %3019 = vmatpush1.bf16.msra.mxu0 %v2835_v27  ;;  %v2447_v27 = vunpack.c.l.s8.bf16 %v2209_v24 }
 0x67a   :  { %3183 = vmatpush1.bf16.msra.mxu1 %v2837_v29  ;;  %3020 = vmatprep.subr.bf16.mxu0 %v2843_v31  ;;  %v2449_v29 = vunpack.c.l.s8.bf16 %v2211_v25  ;;  %v2455_v31 = vunpack.c.h.s8.bf16 %v2210_v40 }
 0x67b   :  { %3184 = vmatprep.subr.bf16.mxu1 %v2845_v19  ;;  %v2512_v19 = vunpack.c.h.s8.bf16 %v2239_v0  ;;  %v2554_v0 = vunpack.c.h.s8.bf16 %v2260_v28 }
 0x67d   :  { %3021 = vmatpush1.bf16.msra.mxu0 %v2842_v21  ;;  %v2454_v21 = vunpack.c.h.s8.bf16 %v2209_v24  ;;  %v2267_v24 = vld [vmem:[#allocation11 + $0x260] sm:$0xff] }
 0x67e   :  { %3185 = vmatpush1.bf16.msra.mxu1 %v2844_v36  ;;  %3022 = vmatprep.subr.bf16.mxu0 %v2850_v41  ;;  %v2456_v36 = vunpack.c.h.s8.bf16 %v2211_v25  ;;  %v2462_v41 = vunpack.c.l.s8.bf16 %v2217_v30  ;;  %v2561_v25 = vunpack.c.l.s8.bf16 %v2267_v24 }
 0x67f   :  { %3186 = vmatprep.subr.bf16.mxu1 %v2852_v42  ;;  %v2519_v42 = vunpack.c.l.s8.bf16 %v2246_v32 }
 0x681   :  { %3023 = vmatpush1.bf16.msra.mxu0 %v2849_v43  ;;  %v2461_v43 = vunpack.c.l.s8.bf16 %v2216_v44  ;;  %v2274_v44 = vld [vmem:[#allocation11 + $0x298] sm:$0xff] }
 0x682   :  { %3187 = vmatpush1.bf16.msra.mxu1 %v2851_v10  ;;  %3024 = vmatprep.subr.bf16.mxu0 %v2857_v35  ;;  %v2463_v10 = vunpack.c.l.s8.bf16 %v2218_v33  ;;  %v2469_v35 = vunpack.c.h.s8.bf16 %v2217_v30 }
 0x683   :  { %3188 = vmatprep.subr.bf16.mxu1 %v2859_v5  ;;  %v2526_v5 = vunpack.c.h.s8.bf16 %v2246_v32  ;;  %v2568_v32 = vunpack.c.h.s8.bf16 %v2267_v24 }
 0x685   :  { %3025 = vmatpush1.bf16.msra.mxu0 %v2856_v49  ;;  %v2470_v49 = vunpack.c.h.s8.bf16 %v2218_v33  ;;  %v2575_v33 = vunpack.c.l.s8.bf16 %v2274_v44 }
 0x686   :  { %3189 = vmatpush1.bf16.msra.mxu1 %v2858_v51  ;;  %3199 = vmatprep.subr.bf16.mxu0 %v2420_v52  ;;  %v2476_v51 = vunpack.c.l.s8.bf16 %v2224_v37  ;;  %v2223_v52 = vld [vmem:[#allocation11 + $0x100] sm:$0xff] }
 0x687   :  { %3740 = vmatprep.subr.bf16.mxu1 %v2477_v63  ;;  %v2475_v63 = vunpack.c.l.s8.bf16 %v2223_v52 }
 0x688   :  { %3027 = vmatmul.mubr.bf16.vlgmr.msra.gmra.mrb[12].mxu0 %v4712_v12 }
 0x689   :  { %3191 = vmatmul.mubr.bf16.vlgmr.msra.gmra.mrb[20].mxu1 %v4712_v12  ;;  %3200 = vmatpush1.bf16.msra.mxu0 %v2419_v61  ;;  %v2483_v61 = vunpack.c.h.s8.bf16 %v2224_v37 }
 0x68a   :  { %3231 = vmatprep.mubr.bf16.mxu0 %v4655_v45  ;;  %3741 = vmatpush3.bf16.msra.mxu1 %v2421_v34  ;;  %v2596_v34 = vunpack.c.h.s8.bf16 %v2281_v38  ;;  %v2582_v38 = vunpack.c.h.s8.bf16 %v2274_v44 }
 0x68b   :  { %3395 = vmatprep.mubr.bf16.mxu1 %v4655_v45  ;;  %3201 = vmatprep.subr.bf16.mxu0 %v2427_v7  ;;  %v2448_v45 = vunpack.c.l.s8.bf16 %v2210_v40  ;;  %v2231_v7 = vld [vmem:[#allocation11 + $0x140] sm:$0xff] }
 0x68c   :  { %3742 = vmatprep.subr.bf16.mxu1 %v2484_v13  ;;  %v2482_v13 = vunpack.c.h.s8.bf16 %v2223_v52  ;;  %v2309_v52 = vld [vmem:[#allocation11 + $0x3b0] sm:$0xff] }
 0x68d   :  { %3202 = vmatpush1.bf16.msra.mxu0 %v2426_v18  ;;  %v2490_v18 = vunpack.c.l.s8.bf16 %v2231_v7  ;;  %v2645_v54 = vunpack.c.l.s8.bf16 %v2309_v52 }
 0x68e   :  { %3743 = vmatpush3.bf16.msra.mxu1 %v2428_v20  ;;  %3203 = vmatprep.subr.bf16.mxu0 %v2434_v15  ;;  %v2230_v20 = vld [vmem:[#allocation11 + $0x138] sm:$0xff]  ;;  %v2603_v15 = vunpack.c.l.s8.bf16 %v2288_v60 }
 0x68f   :  { %3744 = vmatprep.subr.bf16.mxu1 %v2491_v16  ;;  %v2489_v16 = vunpack.c.l.s8.bf16 %v2230_v20  ;;  %v2496_v40 = vunpack.c.h.s8.bf16 %v2230_v20  ;;  %v2316_v20 = vld [vmem:[#allocation11 + $0x3e8] sm:$0xff] }
 0x691   :  { %3204 = vmatpush1.bf16.msra.mxu0 %v2433_v50  ;;  %v2497_v50 = vunpack.c.h.s8.bf16 %v2231_v7 }
 0x692   :  { %3745 = vmatpush3.bf16.msra.mxu1 %v2435_v22  ;;  %3205 = vmatprep.subr.bf16.mxu0 %v2441_v26  ;;  %v2610_v22 = vunpack.c.h.s8.bf16 %v2288_v60  ;;  %v2238_v26 = vld [vmem:[#allocation11 + $0x178] sm:$0xff]  ;;  %v2652_v60 = vunpack.c.h.s8.bf16 %v2309_v52 }
 0x693   :  { %3746 = vmatprep.subr.bf16.mxu1 %v2498_v14  ;;  %v2295_v14 = vld [vmem:[#allocation11 + $0x340] sm:$0xff] }
 0x695   :  { %3206 = vmatpush1.bf16.msra.mxu0 %v2440_v11  ;;  %v2504_v11 = vunpack.c.l.s8.bf16 %v2238_v26 }
 0x696   :  { %3747 = vmatpush3.bf16.msra.mxu1 %v2442_v39  ;;  %3207 = vmatprep.subr.bf16.mxu0 %v2448_v45  ;;  %v2237_v39 = vld [vmem:[#allocation11 + $0x170] sm:$0xff]  ;;  %v2617_v45 = vunpack.c.l.s8.bf16 %v2295_v14 }
 0x697   :  { %3748 = vmatprep.subr.bf16.mxu1 %v2505_v4  ;;  %v2503_v4 = vunpack.c.l.s8.bf16 %v2237_v39  ;;  %v2510_v30 = vunpack.c.h.s8.bf16 %v2237_v39 }
 0x699   :  { %3208 = vmatpush1.bf16.msra.mxu0 %v2447_v27  ;;  %v2511_v27 = vunpack.c.h.s8.bf16 %v2238_v26 }
 0x69a   :  { %3749 = vmatpush3.bf16.msra.mxu1 %v2449_v29  ;;  %3209 = vmatprep.subr.bf16.mxu0 %v2455_v31  ;;  %v2624_v29 = vunpack.c.h.s8.bf16 %v2295_v14  ;;  %v2245_v31 = vld [vmem:[#allocation11 + $0x1b0] sm:$0xff] }
 0x69b   :  { %3750 = vmatprep.subr.bf16.mxu1 %v2512_v19  ;;  %v2302_v19 = vld [vmem:[#allocation11 + $0x378] sm:$0xff]  ;;  %v2265_v14 = vld [vmem:[#allocation11 + $0x250] sm:$0xff] }
 0x69d   :  { %3210 = vmatpush1.bf16.msra.mxu0 %v2454_v21  ;;  %v2518_v21 = vunpack.c.l.s8.bf16 %v2245_v31 }
 0x69e   :  { %3751 = vmatpush3.bf16.msra.mxu1 %v2456_v36  ;;  %3211 = vmatprep.subr.bf16.mxu0 %v2462_v41  ;;  %v2244_v36 = vld [vmem:[#allocation11 + $0x1a8] sm:$0xff]  ;;  %v2631_v41 = vunpack.c.l.s8.bf16 %v2302_v19 }
 0x69f   :  { %3752 = vmatprep.subr.bf16.mxu1 %v2519_v42  ;;  %v2517_v42 = vunpack.c.l.s8.bf16 %v2244_v36  ;;  %v2524_v37 = vunpack.c.h.s8.bf16 %v2244_v36 }
 0x6a1   :  { %3212 = vmatpush1.bf16.msra.mxu0 %v2461_v43  ;;  %v2525_v43 = vunpack.c.h.s8.bf16 %v2245_v31 }
 0x6a2   :  { %3753 = vmatpush3.bf16.msra.mxu1 %v2463_v10  ;;  %3213 = vmatprep.subr.bf16.mxu0 %v2469_v35  ;;  %v2638_v10 = vunpack.c.h.s8.bf16 %v2302_v19  ;;  %v2252_v35 = vld [vmem:[#allocation11 + $0x1e8] sm:$0xff] }
 0x6a3   :  { %3754 = vmatprep.subr.bf16.mxu1 %v2526_v5  ;;  %v2337_v5 = vld [vmem:[#allocation11 + $0x490] sm:$0xff]  ;;  %v2272_v19 = vld [vmem:[#allocation11 + $0x288] sm:$0xff] }
 0x6a5   :  { %3214 = vmatpush1.bf16.msra.mxu0 %v2468_v47  ;;  %v2532_v47 = vunpack.c.l.s8.bf16 %v2252_v35 }
 0x6a6   :  { %3755 = vmatpush3.bf16.msra.mxu1 %v2470_v49  ;;  %3215 = vmatprep.subr.bf16.mxu0 %v2476_v51  ;;  %v2251_v49 = vld [vmem:[#allocation11 + $0x1e0] sm:$0xff]  ;;  %v2701_v51 = vunpack.c.l.s8.bf16 %v2337_v5 }
 0x6a7   :  { %3762 = vmatprep.subr.bf16.mxu1 %v2589_v53  ;;  %v2531_v53 = vunpack.c.l.s8.bf16 %v2251_v49  ;;  %v2538_v7 = vunpack.c.h.s8.bf16 %v2251_v49 }
 0x6a9   :  { %3396 = vmatmul.mubr.bf16.vlgmr.msra.gmra.mrb[24].mxu1 %v4657_v46  ;;  %3216 = vmatpush1.bf16.msra.mxu0 %v2475_v63  ;;  %v2539_v63 = vunpack.c.h.s8.bf16 %v2252_v35 }
 0x6aa   :  { %3763 = vmatpush3.bf16.msra.mxu1 %v2533_v8  ;;  %3435 = vmatprep.mubr.bf16.mxu1 %v4667_v59  ;;  %v2259_v8 = vld [vmem:[#allocation11 + $0x220] sm:$0xff] }
 0x6ab   :  { %3217 = vmatprep.subr.bf16.mxu0 %v2483_v61  ;;  %3764 = vmatprep.subr.bf16.mxu1 %v2596_v34  ;;  %v2708_v61 = vunpack.c.h.s8.bf16 %v2337_v5  ;;  %v2344_v34 = vld [vmem:[#allocation11 + $0x4c8] sm:$0xff]  ;;  %v2553_v28 = vunpack.c.h.s8.bf16 %v2259_v8  ;;  %v2279_v5 = vld [vmem:[#allocation11 + $0x2c0] sm:$0xff] }
 0x6ad   :  { %3218 = vmatpush1.bf16.msra.mxu0 %v2482_v13  ;;  %v2546_v13 = vunpack.c.l.s8.bf16 %v2259_v8 }
 0x6ae   :  { %3765 = vmatpush3.bf16.msra.mxu1 %v2540_v48  ;;  %3219 = vmatprep.subr.bf16.mxu0 %v2490_v18  ;;  %v2258_v48 = vld [vmem:[#allocation11 + $0x218] sm:$0xff]  ;;  %v2715_v18 = vunpack.c.l.s8.bf16 %v2344_v34 }
 0x6af   :  { %3766 = vmatprep.subr.bf16.mxu1 %v2603_v15  ;;  %v2659_v15 = vunpack.c.l.s8.bf16 %v2316_v20 }
 0x6b1   :  { %3220 = vmatpush1.bf16.msra.mxu0 %v2489_v16  ;;  %v2722_v16 = vunpack.c.h.s8.bf16 %v2344_v34  ;;  %v2286_v34 = vld [vmem:[#allocation11 + $0x2f8] sm:$0xff] }
 0x6b2   :  { %3767 = vmatpush3.bf16.msra.mxu1 %v2547_v17  ;;  %3221 = vmatprep.subr.bf16.mxu0 %v2497_v50  ;;  %v2266_v17 = vld [vmem:[#allocation11 + $0x258] sm:$0xff]  ;;  %v2552_v50 = vunpack.c.h.s8.bf16 %v2258_v48 }
 0x6b3   :  { %3768 = vmatprep.subr.bf16.mxu1 %v2610_v22  ;;  %v2666_v22 = vunpack.c.h.s8.bf16 %v2316_v20  ;;  %v2560_v26 = vunpack.c.l.s8.bf16 %v2266_v17 }
 0x6b5   :  { %3222 = vmatpush1.bf16.msra.mxu0 %v2496_v40 }
 0x6b6   :  { %3769 = vmatpush3.bf16.msra.mxu1 %v2554_v0  ;;  %3223 = vmatprep.subr.bf16.mxu0 %v2504_v11  ;;  %v2323_v0 = vld [vmem:[#allocation11 + $0x420] sm:$0xff]  ;;  %v2559_v11 = vunpack.c.l.s8.bf16 %v2265_v14 }
 0x6b7   :  { %3770 = vmatprep.subr.bf16.mxu1 %v2617_v45  ;;  %v2673_v39 = vunpack.c.l.s8.bf16 %v2323_v0  ;;  %v2567_v45 = vunpack.c.h.s8.bf16 %v2266_v17 }
 0x6b9   :  { %3224 = vmatpush1.bf16.msra.mxu0 %v2503_v4  ;;  %v2273_v4 = vld [vmem:[#allocation11 + $0x290] sm:$0xff] }
 0x6ba   :  { %3771 = vmatpush3.bf16.msra.mxu1 %v2561_v25  ;;  %3225 = vmatprep.subr.bf16.mxu0 %v2511_v27  ;;  %v2358_v25 = vld [vmem:[#allocation11 + $0x538] sm:$0xff]  ;;  %v2566_v27 = vunpack.c.h.s8.bf16 %v2265_v14  ;;  %v2574_v31 = vunpack.c.l.s8.bf16 %v2273_v4 }
 0x6bb   :  { %3772 = vmatprep.subr.bf16.mxu1 %v2624_v29  ;;  %v2680_v29 = vunpack.c.h.s8.bf16 %v2323_v0  ;;  %v2750_v44 = vunpack.c.h.s8.bf16 %v2358_v25 }
 0x6bd   :  { %3226 = vmatpush1.bf16.msra.mxu0 %v2510_v30  ;;  %v2743_v30 = vunpack.c.l.s8.bf16 %v2358_v25  ;;  %v2300_v25 = vld [vmem:[#allocation11 + $0x368] sm:$0xff] }
 0x6be   :  { %3773 = vmatpush3.bf16.msra.mxu1 %v2568_v32  ;;  %3227 = vmatprep.subr.bf16.mxu0 %v2518_v21  ;;  %v2330_v32 = vld [vmem:[#allocation11 + $0x458] sm:$0xff]  ;;  %v2573_v21 = vunpack.c.l.s8.bf16 %v2272_v19 }
 0x6bf   :  { %3774 = vmatprep.subr.bf16.mxu1 %v2631_v41  ;;  %v2687_v36 = vunpack.c.l.s8.bf16 %v2330_v32  ;;  %v2581_v41 = vunpack.c.h.s8.bf16 %v2273_v4 }
 0x6c1   :  { %3228 = vmatpush1.bf16.msra.mxu0 %v2517_v42  ;;  %v2280_v42 = vld [vmem:[#allocation11 + $0x2c8] sm:$0xff] }
 0x6c2   :  { %3775 = vmatpush3.bf16.msra.mxu1 %v2575_v33  ;;  %3229 = vmatprep.subr.bf16.mxu0 %v2525_v43  ;;  %v2393_v33 = vld [vmem:[#allocation11 + $0x650] sm:$0xff]  ;;  %v2580_v43 = vunpack.c.h.s8.bf16 %v2272_v19  ;;  %v2588_v35 = vunpack.c.l.s8.bf16 %v2280_v42 }
 0x6c3   :  { %3776 = vmatprep.subr.bf16.mxu1 %v2638_v10  ;;  %v2694_v10 = vunpack.c.h.s8.bf16 %v2330_v32  ;;  %v2820_v52 = vunpack.c.h.s8.bf16 %v2393_v33 }
 0x6c5   :  { %3230 = vmatpush1.bf16.msra.mxu0 %v2524_v37  ;;  %v2813_v37 = vunpack.c.l.s8.bf16 %v2393_v33 }
 0x6c6   :  { %3777 = vmatpush3.bf16.msra.mxu1 %v2582_v38  ;;  %3240 = vmatprep.subr.bf16.mxu0 %v2532_v47  ;;  %v2365_v38 = vld [vmem:[#allocation11 + $0x570] sm:$0xff]  ;;  %v2587_v47 = vunpack.c.l.s8.bf16 %v2279_v5 }
 0x6c7   :  { %3784 = vmatprep.subr.bf16.mxu1 %v2701_v51  ;;  %v2757_v49 = vunpack.c.l.s8.bf16 %v2365_v38  ;;  %v2595_v51 = vunpack.c.h.s8.bf16 %v2280_v42  ;;  %v2764_v8 = vunpack.c.h.s8.bf16 %v2365_v38  ;;  %v2307_v42 = vld [vmem:[#allocation11 + $0x3a0] sm:$0xff] }
 0x6c8   :  { %3232 = vmatmul.mubr.bf16.vlgmr.msra.gmra.mrb[16].mxu0 %v4657_v46  ;;  %v2545_v46 = vunpack.c.l.s8.bf16 %v2258_v48  ;;  %v2643_v33 = vunpack.c.l.s8.bf16 %v2307_v42 }
 0x6c9   :  { %3436 = vmatmul.mubr.bf16.vlgmr.msra.gmra.mrb[28].mxu1 %v4687_v6  ;;  %3241 = vmatpush1.bf16.msra.mxu0 %v2531_v53  ;;  %v2287_v53 = vld [vmem:[#allocation11 + $0x300] sm:$0xff] }
 0x6ca   :  { %3272 = vmatprep.mubr.bf16.mxu0 %v4667_v59  ;;  %3785 = vmatpush3.bf16.msra.mxu1 %v2645_v54  ;;  %v2351_v59 = vld [vmem:[#allocation11 + $0x500] sm:$0xff]  ;;  %v2400_v54 = vld [vmem:[#allocation11 + $0x688] sm:$0xff] }
 0x6cb   :  { %3475 = vmatprep.mubr.bf16.mxu1 %v4689_v23  ;;  %3242 = vmatprep.subr.bf16.mxu0 %v2539_v63  ;;  %v2729_v40 = vunpack.c.l.s8.bf16 %v2351_v59  ;;  %v2736_v24 = vunpack.c.h.s8.bf16 %v2351_v59  ;;  %v2594_v63 = vunpack.c.h.s8.bf16 %v2279_v5  ;;  %v2834_v20 = vunpack.c.h.s8.bf16 %v2400_v54  ;;  %v2293_v59 = vld [vmem:[#allocation11 + $0x330] sm:$0xff] }
 0x6cc   :  { %3786 = vmatprep.subr.bf16.mxu1 %v2708_v61  ;;  %v2602_v61 = vunpack.c.l.s8.bf16 %v2287_v53 }
 0x6cd   :  { %3243 = vmatpush1.bf16.msra.mxu0 %v2538_v7  ;;  %v2827_v7 = vunpack.c.l.s8.bf16 %v2400_v54 }
 0x6ce   :  { %3787 = vmatpush3.bf16.msra.mxu1 %v2652_v60  ;;  %3244 = vmatprep.subr.bf16.mxu0 %v2546_v13  ;;  %v2372_v60 = vld [vmem:[#allocation11 + $0x5a8] sm:$0xff]  ;;  %v2601_v13 = vunpack.c.l.s8.bf16 %v2286_v34 }
 0x6cf   :  { %3788 = vmatprep.subr.bf16.mxu1 %v2715_v18  ;;  %v2771_v48 = vunpack.c.l.s8.bf16 %v2372_v60  ;;  %v2609_v18 = vunpack.c.h.s8.bf16 %v2287_v53  ;;  %v2321_v53 = vld [vmem:[#allocation11 + $0x410] sm:$0xff] }
 0x6d1   :  { %3245 = vmatpush1.bf16.msra.mxu0 %v2545_v46  ;;  %v2294_v46 = vld [vmem:[#allocation11 + $0x338] sm:$0xff] }
 0x6d2   :  { %3789 = vmatpush3.bf16.msra.mxu1 %v2659_v15  ;;  %3246 = vmatprep.subr.bf16.mxu0 %v2553_v28  ;;  %v2407_v15 = vld [vmem:[#allocation11 + $0x6c0] sm:$0xff]  ;;  %v2608_v28 = vunpack.c.h.s8.bf16 %v2286_v34  ;;  %v2616_v17 = vunpack.c.l.s8.bf16 %v2294_v46 }
 0x6d3   :  { %3790 = vmatprep.subr.bf16.mxu1 %v2722_v16  ;;  %v2778_v16 = vunpack.c.h.s8.bf16 %v2372_v60  ;;  %v2848_v0 = vunpack.c.h.s8.bf16 %v2407_v15  ;;  %v2336_v60 = vld [vmem:[#allocation11 + $0x488] sm:$0xff] }
 0x6d5   :  { %3247 = vmatpush1.bf16.msra.mxu0 %v2552_v50  ;;  %v2841_v50 = vunpack.c.l.s8.bf16 %v2407_v15  ;;  %v2343_v15 = vld [vmem:[#allocation11 + $0x4c0] sm:$0xff] }
 0x6d6   :  { %3791 = vmatpush3.bf16.msra.mxu1 %v2666_v22  ;;  %3248 = vmatprep.subr.bf16.mxu0 %v2560_v26  ;;  %v2379_v22 = vld [vmem:[#allocation11 + $0x5e0] sm:$0xff]  ;;  %v2615_v26 = vunpack.c.l.s8.bf16 %v2293_v59 }
 0x6d7   :  { %3792 = vmatprep.subr.bf16.mxu1 %v2729_v40  ;;  %v2785_v14 = vunpack.c.l.s8.bf16 %v2379_v22  ;;  %v2623_v40 = vunpack.c.h.s8.bf16 %v2294_v46  ;;  %v2707_v46 = vunpack.c.h.s8.bf16 %v2336_v60 }
 0x6d9   :  { %3249 = vmatpush1.bf16.msra.mxu0 %v2559_v11  ;;  %v2301_v11 = vld [vmem:[#allocation11 + $0x370] sm:$0xff] }
 0x6da   :  { %3793 = vmatpush3.bf16.msra.mxu1 %v2673_v39  ;;  %3250 = vmatprep.subr.bf16.mxu0 %v2567_v45  ;;  %v2414_v39 = vld [vmem:[#allocation11 + $0x6f8] sm:$0xff]  ;;  %v2622_v45 = vunpack.c.h.s8.bf16 %v2293_v59  ;;  %v2630_v4 = vunpack.c.l.s8.bf16 %v2301_v11 }
 0x6db   :  { %3794 = vmatprep.subr.bf16.mxu1 %v2736_v24  ;;  %v2792_v24 = vunpack.c.h.s8.bf16 %v2379_v22  ;;  %v2862_v32 = vunpack.c.h.s8.bf16 %v2414_v39  ;;  %v2350_v22 = vld [vmem:[#allocation11 + $0x4f8] sm:$0xff] }
 0x6dd   :  { %3251 = vmatpush1.bf16.msra.mxu0 %v2566_v27  ;;  %v2855_v27 = vunpack.c.l.s8.bf16 %v2414_v39  ;;  %v2357_v39 = vld [vmem:[#allocation11 + $0x530] sm:$0xff] }
 0x6de   :  { %3795 = vmatpush3.bf16.msra.mxu1 %v2680_v29  ;;  %3252 = vmatprep.subr.bf16.mxu0 %v2574_v31  ;;  %v2386_v29 = vld [vmem:[#allocation11 + $0x618] sm:$0xff]  ;;  %v2629_v31 = vunpack.c.l.s8.bf16 %v2300_v25 }
 0x6df   :  { %3796 = vmatprep.subr.bf16.mxu1 %v2743_v30  ;;  %v2799_v19 = vunpack.c.l.s8.bf16 %v2386_v29  ;;  %v2637_v30 = vunpack.c.h.s8.bf16 %v2301_v11  ;;  %v2735_v11 = vunpack.c.h.s8.bf16 %v2350_v22 }
 0x6e1   :  { %3253 = vmatpush1.bf16.msra.mxu0 %v2573_v21  ;;  %v2308_v21 = vld [vmem:[#allocation11 + $0x3a8] sm:$0xff] }
 0x6e2   :  { %3797 = vmatpush3.bf16.msra.mxu1 %v2687_v36  ;;  %3254 = vmatprep.subr.bf16.mxu0 %v2581_v41  ;;  %v2636_v36 = vunpack.c.h.s8.bf16 %v2300_v25  ;;  %v2806_v41 = vunpack.c.h.s8.bf16 %v2386_v29  ;;  %v2364_v29 = vld [vmem:[#allocation11 + $0x568] sm:$0xff] }
 0x6e3   :  { %3798 = vmatprep.subr.bf16.mxu1 %v2750_v44  ;;  %v2644_v44 = vunpack.c.l.s8.bf16 %v2308_v21 }
 0x6e5   :  { %3255 = vmatpush1.bf16.msra.mxu0 %v2580_v43  ;;  %v2651_v43 = vunpack.c.h.s8.bf16 %v2308_v21  ;;  %v2763_v21 = vunpack.c.h.s8.bf16 %v2364_v29 }
 0x6e6   :  { %3799 = vmatpush3.bf16.msra.mxu1 %v2694_v10  ;;  %3256 = vmatprep.subr.bf16.mxu0 %v2588_v35  ;;  %v2315_v10 = vld [vmem:[#allocation11 + $0x3e0] sm:$0xff]  ;;  %v2650_v35 = vunpack.c.h.s8.bf16 %v2307_v42  ;;  %v2370_v42 = vld [vmem:[#allocation11 + $0x598] sm:$0xff] }
 0x6e7   :  { %3806 = vmatprep.subr.bf16.mxu1 %v2813_v37  ;;  %v2658_v5 = vunpack.c.l.s8.bf16 %v2315_v10  ;;  %v2314_v37 = vld [vmem:[#allocation11 + $0x3d8] sm:$0xff] }
 0x6e8   :  { %v2657_v38 = vunpack.c.l.s8.bf16 %v2314_v37 }
 0x6e9   :  { %3476 = vmatmul.mubr.bf16.vlgmr.msra.gmra.mrb[32].mxu1 %v4701_v62  ;;  %3257 = vmatpush1.bf16.msra.mxu0 %v2587_v47  ;;  %v2665_v47 = vunpack.c.h.s8.bf16 %v2315_v10  ;;  %v2378_v10 = vld [vmem:[#allocation11 + $0x5d8] sm:$0xff] }
 0x6ea   :  { %3807 = vmatpush3.bf16.msra.mxu1 %v2757_v49  ;;  %3515 = vmatprep.mubr.bf16.mxu1 %v4704_v9  ;;  %v2322_v49 = vld [vmem:[#allocation11 + $0x418] sm:$0xff] }
 0x6eb   :  { %3258 = vmatprep.subr.bf16.mxu0 %v2595_v51  ;;  %3808 = vmatprep.subr.bf16.mxu1 %v2820_v52  ;;  %v2664_v51 = vunpack.c.h.s8.bf16 %v2314_v37  ;;  %v2672_v52 = vunpack.c.l.s8.bf16 %v2322_v49  ;;  %v2679_v54 = vunpack.c.h.s8.bf16 %v2322_v49  ;;  %v2377_v37 = vld [vmem:[#allocation11 + $0x5d0] sm:$0xff] }
 0x6ec   :  { %v2385_v49 = vld [vmem:[#allocation11 + $0x610] sm:$0xff] }
 0x6ed   :  { %3259 = vmatpush1.bf16.msra.mxu0 %v2594_v63  ;;  %v2329_v63 = vld [vmem:[#allocation11 + $0x450] sm:$0xff] }
 0x6ee   :  { %3809 = vmatpush3.bf16.msra.mxu1 %v2764_v8  ;;  %3260 = vmatprep.subr.bf16.mxu0 %v2602_v61  ;;  %v2686_v8 = vunpack.c.l.s8.bf16 %v2329_v63  ;;  %v2328_v61 = vld [vmem:[#allocation11 + $0x448] sm:$0xff] }
 0x6ef   :  { %3810 = vmatprep.subr.bf16.mxu1 %v2827_v7  ;;  %v2685_v34 = vunpack.c.l.s8.bf16 %v2328_v61  ;;  %v2693_v7 = vunpack.c.h.s8.bf16 %v2329_v63 }
 0x6f1   :  { %3261 = vmatpush1.bf16.msra.mxu0 %v2601_v13  ;;  %v2692_v13 = vunpack.c.h.s8.bf16 %v2328_v61 }
 0x6f2   :  { %3811 = vmatpush3.bf16.msra.mxu1 %v2771_v48  ;;  %3262 = vmatprep.subr.bf16.mxu0 %v2609_v18  ;;  %v2700_v48 = vunpack.c.l.s8.bf16 %v2336_v60  ;;  %v2335_v18 = vld [vmem:[#allocation11 + $0x480] sm:$0xff] }
 0x6f3   :  { %3812 = vmatprep.subr.bf16.mxu1 %v2834_v20  ;;  %v2699_v20 = vunpack.c.l.s8.bf16 %v2335_v18 }
 0x6f5   :  { %3263 = vmatpush1.bf16.msra.mxu0 %v2608_v28  ;;  %v2706_v28 = vunpack.c.h.s8.bf16 %v2335_v18 }
 0x6f6   :  { %3813 = vmatpush3.bf16.msra.mxu1 %v2778_v16  ;;  %3264 = vmatprep.subr.bf16.mxu0 %v2616_v17  ;;  %v2714_v16 = vunpack.c.l.s8.bf16 %v2343_v15  ;;  %v2342_v17 = vld [vmem:[#allocation11 + $0x4b8] sm:$0xff] }
 0x6f7   :  { %3814 = vmatprep.subr.bf16.mxu1 %v2841_v50  ;;  %v2713_v59 = vunpack.c.l.s8.bf16 %v2342_v17  ;;  %v2721_v50 = vunpack.c.h.s8.bf16 %v2343_v15 }
 0x6f9   :  { %3265 = vmatpush1.bf16.msra.mxu0 %v2615_v26  ;;  %v2720_v26 = vunpack.c.h.s8.bf16 %v2342_v17 }
 0x6fa   :  { %3815 = vmatpush3.bf16.msra.mxu1 %v2785_v14  ;;  %3266 = vmatprep.subr.bf16.mxu0 %v2623_v40  ;;  %v2728_v14 = vunpack.c.l.s8.bf16 %v2350_v22  ;;  %v2349_v40 = vld [vmem:[#allocation11 + $0x4f0] sm:$0xff] }
 0x6fb   :  { %3816 = vmatprep.subr.bf16.mxu1 %v2848_v0  ;;  %v2727_v0 = vunpack.c.l.s8.bf16 %v2349_v40 }
 0x6fd   :  { %3267 = vmatpush1.bf16.msra.mxu0 %v2622_v45  ;;  %v2734_v45 = vunpack.c.h.s8.bf16 %v2349_v40 }
 0x6fe   :  { %3817 = vmatpush3.bf16.msra.mxu1 %v2792_v24  ;;  %3268 = vmatprep.subr.bf16.mxu0 %v2630_v4  ;;  %v2742_v24 = vunpack.c.l.s8.bf16 %v2357_v39  ;;  %v2356_v4 = vld [vmem:[#allocation11 + $0x528] sm:$0xff] }
 0x6ff   :  { %3818 = vmatprep.subr.bf16.mxu1 %v2855_v27  ;;  %v2741_v25 = vunpack.c.l.s8.bf16 %v2356_v4  ;;  %v2749_v27 = vunpack.c.h.s8.bf16 %v2357_v39 }
 0x701   :  { %3269 = vmatpush1.bf16.msra.mxu0 %v2629_v31  ;;  %v2748_v31 = vunpack.c.h.s8.bf16 %v2356_v4 }
 0x702   :  { %3819 = vmatpush3.bf16.msra.mxu1 %v2799_v19  ;;  %3270 = vmatprep.subr.bf16.mxu0 %v2637_v30  ;;  %v2756_v19 = vunpack.c.l.s8.bf16 %v2364_v29  ;;  %v2363_v30 = vld [vmem:[#allocation11 + $0x560] sm:$0xff]  ;;  %v2398_v29 = vld [vmem:[#allocation11 + $0x678] sm:$0xff] }
 0x703   :  { %3820 = vmatprep.subr.bf16.mxu1 %v2862_v32  ;;  %v2755_v32 = vunpack.c.l.s8.bf16 %v2363_v30 }
 0x705   :  { %3271 = vmatpush1.bf16.msra.mxu0 %v2636_v36  ;;  %v2371_v36 = vld [vmem:[#allocation11 + $0x5a0] sm:$0xff] }
 0x706   :  { %3821 = vmatpush3.bf16.msra.mxu1 %v2806_v41  ;;  %3281 = vmatprep.subr.bf16.mxu0 %v2644_v44  ;;  %v2762_v41 = vunpack.c.h.s8.bf16 %v2363_v30  ;;  %v2770_v44 = vunpack.c.l.s8.bf16 %v2371_v36 }
 0x708   :  { %3273 = vmatmul.mubr.bf16.vlgmr.msra.gmra.mrb[16].mxu0 %v4687_v6  ;;  %v2671_v6 = vunpack.c.l.s8.bf16 %v2321_v53 }
 0x709   :  { %3516 = vmatmul.mubr.bf16.vlgmr.msra.gmra.mrb[36].mxu1 %v4712_v12  ;;  %3282 = vmatpush1.bf16.msra.mxu0 %v2643_v33  ;;  %v2769_v33 = vunpack.c.l.s8.bf16 %v2370_v42 }
 0x70a   :  { %3313 = vmatprep.mubr.bf16.mxu0 %v4689_v23  ;;  %3283 = vmatprep.subr.bf16.mxu0 %v2651_v43  ;;  %v2678_v23 = vunpack.c.h.s8.bf16 %v2321_v53  ;;  %v2777_v43 = vunpack.c.h.s8.bf16 %v2371_v36  ;;  %v2406_v36 = vld [vmem:[#allocation11 + $0x6b8] sm:$0xff] }
 0x70d   :  { %3284 = vmatpush1.bf16.msra.mxu0 %v2650_v35  ;;  %v2776_v35 = vunpack.c.h.s8.bf16 %v2370_v42  ;;  %v2405_v42 = vld [vmem:[#allocation11 + $0x6b0] sm:$0xff] }
 0x70e   :  { %3285 = vmatprep.subr.bf16.mxu0 %v2658_v5  ;;  %v2784_v5 = vunpack.c.l.s8.bf16 %v2378_v10 }
 0x711   :  { %3286 = vmatpush1.bf16.msra.mxu0 %v2657_v38  ;;  %v2783_v38 = vunpack.c.l.s8.bf16 %v2377_v37 }
 0x712   :  { %3287 = vmatprep.subr.bf16.mxu0 %v2665_v47  ;;  %v4733_v47 = vld [vmem:[#allocation13 + $0x1d] sm:$0xff] }
 0x713   :  { %v3583_v18 = vrot.slane %v4733_v47, %v4464_v55 }
 0x715   :  { %3288 = vmatpush1.bf16.msra.mxu0 %v2664_v51 }
 0x716   :  { %3289 = vmatprep.subr.bf16.mxu0 %v2672_v52 }
 0x719   :  { %3290 = vmatpush1.bf16.msra.mxu0 %v2671_v6  ;;  %v2790_v6 = vunpack.c.h.s8.bf16 %v2377_v37  ;;  %v2412_v37 = vld [vmem:[#allocation11 + $0x6e8] sm:$0xff] }
 0x71a   :  { %3291 = vmatprep.subr.bf16.mxu0 %v2679_v54  ;;  %v3571_v54 = vrot.slane %v4733_v47, %v4433_v56 }
 0x71d   :  { %3292 = vmatpush1.bf16.msra.mxu0 %v2678_v23  ;;  %v2798_v23 = vunpack.c.l.s8.bf16 %v2385_v49 }
 0x71e   :  { %3293 = vmatprep.subr.bf16.mxu0 %v2686_v8  ;;  %v2384_v8 = vld [vmem:[#allocation11 + $0x608] sm:$0xff] }
 0x721   :  { %3294 = vmatpush1.bf16.msra.mxu0 %v2685_v34  ;;  %v3579_v34 = vrot.slane %v4733_v47, %v4467_v58 }
 0x722   :  { %3295 = vmatprep.subr.bf16.mxu0 %v2693_v7  ;;  %v3575_v7 = vrot.slane %v4733_v47, %v4436_v57 }
 0x725   :  { %3296 = vmatpush1.bf16.msra.mxu0 %v2692_v13 }
 0x726   :  { %3297 = vmatprep.subr.bf16.mxu0 %v2700_v48 }
 0x729   :  { %3298 = vmatpush1.bf16.msra.mxu0 %v2699_v20 }
 0x72a   :  { %3299 = vmatprep.subr.bf16.mxu0 %v2707_v46 }
 0x72d   :  { %3300 = vmatpush1.bf16.msra.mxu0 %v2706_v28  ;;  %v2797_v28 = vunpack.c.l.s8.bf16 %v2384_v8 }
 0x72e   :  { %3301 = vmatprep.subr.bf16.mxu0 %v2714_v16 }
 0x731   :  { %3302 = vmatpush1.bf16.msra.mxu0 %v2713_v59 }
 0x732   :  { %3303 = vmatprep.subr.bf16.mxu0 %v2721_v50 }
 0x735   :  { %3304 = vmatpush1.bf16.msra.mxu0 %v2720_v26 }
 0x736   :  { %3305 = vmatprep.subr.bf16.mxu0 %v2728_v14  ;;  %v2392_v14 = vld [vmem:[#allocation11 + $0x648] sm:$0xff] }
 0x739   :  { %3306 = vmatpush1.bf16.msra.mxu0 %v2727_v0  ;;  %v2812_v0 = vunpack.c.l.s8.bf16 %v2392_v14 }
 0x73a   :  { %3307 = vmatprep.subr.bf16.mxu0 %v2735_v11  ;;  %v2391_v11 = vld [vmem:[#allocation11 + $0x640] sm:$0xff] }
 0x73b   :  { %v2811_v39 = vunpack.c.l.s8.bf16 %v2391_v11  ;;  %v2818_v4 = vunpack.c.h.s8.bf16 %v2391_v11 }
 0x73d   :  { %3308 = vmatpush1.bf16.msra.mxu0 %v2734_v45  ;;  %v2819_v45 = vunpack.c.h.s8.bf16 %v2392_v14 }
 0x73e   :  { %3309 = vmatprep.subr.bf16.mxu0 %v2742_v24  ;;  %v2399_v24 = vld [vmem:[#allocation11 + $0x680] sm:$0xff] }
 0x741   :  { %3310 = vmatpush1.bf16.msra.mxu0 %v2741_v25 }
 0x742   :  { %3311 = vmatprep.subr.bf16.mxu0 %v2749_v27  ;;  %v2826_v27 = vunpack.c.l.s8.bf16 %v2399_v24 }
 0x745   :  { %3312 = vmatpush1.bf16.msra.mxu0 %v2748_v31 }
 0x746   :  { %3322 = vmatprep.subr.bf16.mxu0 %v2756_v19 }
 0x748   :  { %3314 = vmatmul.mubr.bf16.vlgmr.msra.gmra.mrb[16].mxu0 %v4701_v62  ;;  %v4731_v62 = vld [vmem:[#allocation13 + $0x2c] sm:$0xff] }
 0x749   :  { %3323 = vmatpush1.bf16.msra.mxu0 %v2755_v32  ;;  %3354 = vmatprep.mubr.bf16.mxu0 %v4704_v9  ;;  %v2791_v9 = vunpack.c.h.s8.bf16 %v2378_v10  ;;  %v3527_v51 = vrot.slane %v4731_v62, %v4433_v56  ;;  %v3535_v52 = vrot.slane %v4731_v62, %v4467_v58  ;;  %v3531_v53 = vrot.slane %v4731_v62, %v4436_v57  ;;  %v2413_v10 = vld [vmem:[#allocation11 + $0x6f0] sm:$0xff] }
 0x74a   :  { %3324 = vmatprep.subr.bf16.mxu0 %v2763_v21  ;;  %v3539_v63 = vrot.slane %v4731_v62, %v4464_v55  ;;  %v2805_v58 = vunpack.c.h.s8.bf16 %v2385_v49  ;;  %v2804_v55 = vunpack.c.h.s8.bf16 %v2384_v8  ;;  %v2825_v32 = vunpack.c.l.s8.bf16 %v2398_v29 }
 0x74b   :  { %v2833_v21 = vunpack.c.h.s8.bf16 %v2399_v24  ;;  %v2853_v49 = vunpack.c.l.s8.bf16 %v2412_v37  ;;  %v3547_v14 = vrot.slane %v4731_v62, %v4577_v3 }
 0x74d   :  { %3325 = vmatpush1.bf16.msra.mxu0 %v2762_v41  ;;  %v2832_v41 = vunpack.c.h.s8.bf16 %v2398_v29 }
 0x74e   :  { %3326 = vmatprep.subr.bf16.mxu0 %v2770_v44  ;;  %v2840_v44 = vunpack.c.l.s8.bf16 %v2406_v36 }
 0x751   :  { %3327 = vmatpush1.bf16.msra.mxu0 %v2769_v33  ;;  %v2839_v33 = vunpack.c.l.s8.bf16 %v2405_v42 }
 0x752   :  { %3328 = vmatprep.subr.bf16.mxu0 %v2777_v43  ;;  %v2847_v43 = vunpack.c.h.s8.bf16 %v2406_v36 }
 0x755   :  { %3329 = vmatpush1.bf16.msra.mxu0 %v2776_v35  ;;  %v2846_v35 = vunpack.c.h.s8.bf16 %v2405_v42 }
 0x756   :  { %3330 = vmatprep.subr.bf16.mxu0 %v2784_v5  ;;  %v2854_v5 = vunpack.c.l.s8.bf16 %v2413_v10 }
 0x759   :  { %3331 = vmatpush1.bf16.msra.mxu0 %v2783_v38 }
 0x75a   :  { %3332 = vmatprep.subr.bf16.mxu0 %v2791_v9 }
 0x75b   :  { %v3028_v61 = vpop.f32.mrb[12].mxu0 }
 0x75c   :  { %v3559_v60 = vmul.f32 %v3527_v51, %v3028_v61  ;;  %v3192_v13 = vpop.f32.mrb[20].mxu1  ;;  %v3030_v48 = vpop.f32.mrb[13].mxu0 }
 0x75d   :  { %v3561_v56 = vmul.f32 %v3535_v52, %v3192_v13  ;;  %v3560_v20 = vmul.f32 %v3531_v53, %v3030_v48  ;;  %v3194_v46 = vpop.f32.mrb[21].mxu1  ;;  %v3032_v15 = vpop.f32.mrb[14].mxu0  ;;  %3333 = vmatpush1.bf16.msra.mxu0 %v2790_v6  ;;  %v2861_v53 = vunpack.c.h.s8.bf16 %v2413_v10 }
 0x75e   :  { %v3603_v16 = vadd.f32 %v3571_v54, %v3559_v60  ;;  %v3562_v17 = vmul.f32 %v3539_v63, %v3194_v46  ;;  %v3196_v59 = vpop.f32.mrb[22].mxu1  ;;  %v3033_v50 = vpop.f32.mrb[15].mxu0  ;;  %3334 = vmatprep.subr.bf16.mxu0 %v2798_v23  ;;  %v2860_v54 = vunpack.c.h.s8.bf16 %v2412_v37 }
 0x75f   :  { %v3605_v22 = vadd.f32 %v3579_v34, %v3561_v56  ;;  %v3604_v57 = vadd.f32 %v3575_v7, %v3560_v20  ;;  %v3197_v26 = vpop.f32.mrb[23].mxu1  ;;  %v3595_v50 = vrot.slane %v4733_v47, %v4574_v2 }
 0x760   :  { %4077 = vtanh.f32 %v3603_v16  ;;  %v3606_v40 = vadd.f32 %v3583_v18, %v3562_v17  ;;  %v3551_v16 = vrot.slane %v4731_v62, %v4574_v2  ;;  %v3543_v26 = vrot.slane %v4731_v62, %v4571_v1 }
 0x761   :  { %4079 = vtanh.f32 %v3605_v22  ;;  %3335 = vmatpush1.bf16.msra.mxu0 %v2797_v28 }
 0x762   :  { %4081 = vtanh.f32 %v3604_v57  ;;  %3336 = vmatprep.subr.bf16.mxu0 %v2805_v58 }
 0x763   :  { %4083 = vtanh.f32 %v3606_v40  ;;  %v3587_v40 = vrot.slane %v4733_v47, %v4571_v1 }
 0x765   :  { %3337 = vmatpush1.bf16.msra.mxu0 %v2804_v55 }
 0x766   :  { %3338 = vmatprep.subr.bf16.mxu0 %v2812_v0  ;;  %v3591_v0 = vrot.slane %v4733_v47, %v4577_v3 }
 0x769   :  { %3339 = vmatpush1.bf16.msra.mxu0 %v2811_v39 }
 0x76a   :  { %v4078_v25 = vpop.eup %4077  ;;  %3340 = vmatprep.subr.bf16.mxu0 %v2819_v45 }
 0x76b   :  { %v4080_v31 = vpop.eup %4079  ;;  %3617 = vst [vmem:[#allocation14] sm:$0xff] %v4078_v25 }
 0x76c   :  { %v4082_v19 = vpop.eup %4081  ;;  %3619 = vst [vmem:[#allocation14 + $0x10] sm:$0xff] %v4080_v31 }
 0x76d   :  { %v4084_v30 = vpop.eup %4083  ;;  %3618 = vst [vmem:[#allocation14 + $0x8] sm:$0xff] %v4082_v19  ;;  %3341 = vmatpush1.bf16.msra.mxu0 %v2818_v4 }
 0x76e   :  { %3620 = vst [vmem:[#allocation14 + $0x18] sm:$0xff] %v4084_v30  ;;  %3342 = vmatprep.subr.bf16.mxu0 %v2826_v27 }
 0x771   :  { %3343 = vmatpush1.bf16.msra.mxu0 %v2825_v32 }
 0x772   :  { %3344 = vmatprep.subr.bf16.mxu0 %v2833_v21 }
 0x775   :  { %3345 = vmatpush1.bf16.msra.mxu0 %v2832_v41 }
 0x776   :  { %3346 = vmatprep.subr.bf16.mxu0 %v2840_v44 }
 0x779   :  { %3347 = vmatpush1.bf16.msra.mxu0 %v2839_v33 }
 0x77a   :  { %3348 = vmatprep.subr.bf16.mxu0 %v2847_v43 }
 0x77c   :  { %v3756_v38 = vpop.f32.mrb[24].mxu1 }
 0x77d   :  { %v3757_v9 = vpop.f32.mrb[25].mxu1  ;;  %3349 = vmatpush1.bf16.msra.mxu0 %v2846_v35 }
 0x77e   :  { %v3758_v51 = vadd.f32 %v3757_v9, %v3756_v38  ;;  %v3759_v52 = vpop.f32.mrb[26].mxu1  ;;  %3350 = vmatprep.subr.bf16.mxu0 %v2854_v5 }
 0x77f   :  { %v3760_v6 = vpop.f32.mrb[27].mxu1 }
 0x781   :  { %3351 = vmatpush1.bf16.msra.mxu0 %v2853_v49 }
 0x782   :  { %3352 = vmatprep.subr.bf16.mxu0 %v2861_v53 }
 0x785   :  { %3353 = vmatpush1.bf16.msra.mxu0 %v2860_v54 }
 0x788   :  { %3355 = vmatmul.mubr.bf16.vlgmr.msra.gmra.mrb[16].mxu0 %v4712_v12 }
 0x79c   :  { %v3778_v63 = vpop.f32.mrb[28].mxu1 }
 0x79d   :  { %v3779_v23 = vpop.f32.mrb[29].mxu1 }
 0x79e   :  { %v3780_v8 = vadd.f32 %v3779_v23, %v3778_v63  ;;  %v3781_v61 = vpop.f32.mrb[30].mxu1 }
 0x79f   :  { %v3782_v34 = vpop.f32.mrb[31].mxu1 }
 0x7a0   :  { %v3438_v7 = vadd.f32 %v3780_v8, %v3758_v51 }
 0x7bc   :  { %v3800_v60 = vpop.f32.mrb[32].mxu1 }
 0x7bd   :  { %v3801_v13 = vpop.f32.mrb[33].mxu1 }
 0x7be   :  { %v3802_v48 = vadd.f32 %v3801_v13, %v3800_v60  ;;  %v3803_v18 = vpop.f32.mrb[34].mxu1 }
 0x7bf   :  { %v3804_v56 = vpop.f32.mrb[35].mxu1 }
 0x7c0   :  { %v3478_v20 = vadd.f32 %v3802_v48, %v3438_v7 }
 0x7dc   :  { %v3822_v46 = vpop.f32.mrb[36].mxu1 }
 0x7dd   :  { %v3823_v15 = vpop.f32.mrb[37].mxu1 }
 0x7de   :  { %v3824_v28 = vadd.f32 %v3823_v15, %v3822_v46  ;;  %v3825_v17 = vpop.f32.mrb[38].mxu1 }
 0x7df   :  { %v3826_v12 = vpop.f32.mrb[39].mxu1 }
 0x7e0   :  { %v3518_v59 = vadd.f32 %v3824_v28, %v3478_v20 }
 0x7e2   :  { %v3565_v58 = vmul.f32 %v3551_v16, %v3518_v59 }
 0x7e4   :  { %v3609_v22 = vadd.f32 %v3595_v50, %v3565_v58 }
 0x7e6   :  { %4085 = vtanh.f32 %v3609_v22 }
 0x7f0   :  { %v4086_v57 = vpop.eup %4085 }
 0x7f1   :  { %3623 = vst [vmem:[#allocation14 + $0x30] sm:$0xff] %v4086_v57 }
 0x85b   :  { %v3356_v55 = vpop.f32.mrb[16].mxu0 }
 0x85c   :  { %v3563_v11 = vmul.f32 %v3543_v26, %v3356_v55  ;;  %v3358_v2 = vpop.f32.mrb[17].mxu0 }
 0x85d   :  { %v3564_v39 = vmul.f32 %v3547_v14, %v3358_v2  ;;  %v3360_v45 = vpop.f32.mrb[18].mxu0 }
 0x85e   :  { %v3607_v24 = vadd.f32 %v3587_v40, %v3563_v11  ;;  %v3361_v4 = vpop.f32.mrb[19].mxu0 }
 0x85f   :  { %v3608_v25 = vadd.f32 %v3591_v0, %v3564_v39 }
 0x860   :  { %4087 = vtanh.f32 %v3607_v24 }
 0x861   :  { %4089 = vtanh.f32 %v3608_v25 }
 0x86a   :  { %v4088_v27 = vpop.eup %4087 }
 0x86b   :  { %v4090_v62 = vpop.eup %4089  ;;  %3621 = vst [vmem:[#allocation14 + $0x20] sm:$0xff] %v4088_v27 }
 0x86c   :  { %3622 = vst [vmem:[#allocation14 + $0x28] sm:$0xff] %v4090_v62 }
 0x86d   :  { %4256 = shalt.err (!%p4253_p4)
}
 0x86e   :  { %s4257_s20 = scalar_lea.hbm %s4783_s7, 896 }
 0x86f   :  { %p4258_p5 = scmp.ne.s32.totalorder %s4783_s7, %s4257_s20  ;;  %p4261_p6 = scmp.lt.u32.totalorder %s4257_s20, %s4783_s7 }
 0x871   :  { %p4263_p7 = pnand %p4261_p6, %p4258_p5 }
 0x873   :  { %4266 = shalt.err (!%p4263_p7)
}
 0x874   :  { %3633 = dma.vmem_to_hbm [thread:$0]  %s3631_s16, 896, %s4783_s7, [#allocation4]  }
 0x875   :  { %4275 = dma.done.wait [#allocation4], 896  }
 0x876   :  { %4276 = vsyncadd [#allocation4], 4294966400 }
 0x877   :  { %3637 = vsyncpa [#allocation3], 1 }
 0x878   :  { %3638 = vsyncpa [#allocation6], 1 }
 0x879   :  { %3639 = vsyncpa [#allocation9], 1 }
 0x87a   :  { %3640 = vsyncpa [#allocation12], 1 }
 0x87b   :  { %3641 = vsyncpa [#allocation4], 1 }

</bundles_post_ra>
